<compile_context>
chip_gen: v7x
topology: tpu7x:2x2x1
jax: 0.10.0
libtpu: 0.0.40
codegen_flags: <defaults>
</compile_context>

<pallas_src>
import jax
import jax.numpy as jnp
from jax.experimental import pallas as pl
from jax.experimental.pallas import tpu as pltpu

# ---- model hyper-parameters (small, consistent with the module signature) ----
N = 16            # nodes per graph
F_IN = 4          # num_node_features
EMB = 32          # embedding_size (= per-head channels C, concat=False)
HEADS = 2         # heads
EDGE_DIM = 2      # edge_dim of GATv2Conv
N_LAYERS = 3
NEG_SLOPE_GAT = 0.2    # GATv2Conv internal leaky_relu
NEG_SLOPE_OUT = 0.01   # F.leaky_relu default in the outer loop
B = 4                  # graphs per batch (leading "parallel" grid axis)

HC = HEADS * EMB       # 64


# --------------------------- fused Pallas kernel ------------------------------
def gat_fused_kernel(x_ref, ea_ref, mask_ref, wf_ref, wl_ref, wr_ref, pvec_ref, o_ref):
    """One grid step == one graph. Full forward pass, output stored once."""
    # ---- unpack packed small parameters (single [7, HC] DMA) ----
    bf = pvec_ref[0:1, 0:EMB]                      # [1, EMB]   Linear bias
    bl = pvec_ref[1:2, :]                          # [1, HC]    lin_l bias
    br = pvec_ref[2:3, :]                          # [1, HC]    lin_r bias
    bout = pvec_ref[3:4, 0:EMB]                    # [1, EMB]   conv output bias
    att3 = pvec_ref[4:5, :].reshape(1, 1, HC)      # [1,1,HC]   attention vector a

    mask = mask_ref[...]                           # [N, N] 0/1 adjacency (+self loops)
    ea = ea_ref[...]                               # [EDGE_DIM, N, N]

    # ---- edge projection (layer-invariant): VPU broadcast FMAs, once per call ----
    e = None
    for d in range(EDGE_DIM):
        we_d = pvec_ref[5 + d:6 + d, :].reshape(1, 1, HC)       # row d of lin_edge W
        term = ea[d][:, :, None] * we_d                         # [N, N, HC]
        e = term if e is None else e + term

    # ---- input Linear ----
    h = jnp.dot(x_ref[...], wf_ref[...], preferred_element_type=jnp.float32) + bf

    # ---- 3 shared GATv2 layers, fully in-kernel (h never leaves the chip) ----
    for _layer in range(N_LAYERS):
        xl = jnp.dot(h, wl_ref[...], preferred_element_type=jnp.float32) + bl  # [N, HC]
        xr = jnp.dot(h, wr_ref[...], preferred_element_type=jnp.float32) + br  # [N, HC]

        # s[i, j, :] = x_r[i] + x_l[j] + e(j->i)  over both heads (64 lanes wide)
        s = xr[:, None, :] + xl[None, :, :] + e                                 # [N,N,HC]
        s = jnp.where(s > 0, s, NEG_SLOPE_GAT * s)
        w = s * att3                                                            # [N,N,HC]

        # per-head attention scores without an offset-32 lane slice of the slab
        sum_all = jnp.sum(w, axis=-1)                                           # [N, N]
        sum_h0 = jnp.sum(w[:, :, :EMB], axis=-1)                                # [N, N]
        if HEADS == 2:
            scores = (sum_h0, sum_all - sum_h0)
        else:  # generic fallback
            scores = tuple(jnp.sum(w[:, :, hd * EMB:(hd + 1) * EMB], axis=-1)
                           for hd in range(HEADS))

        acc = jnp.zeros((xl.shape[0], EMB), jnp.float32)
        for hd in range(HEADS):
            sc = jnp.where(mask > 0, scores[hd], -1e30)
            m = jnp.max(sc, axis=1, keepdims=True)
            p = jnp.exp(sc - m) * mask
            denom = jnp.sum(p, axis=1, keepdims=True)                           # [N, 1]
            xl_h = xl[:, hd * EMB:(hd + 1) * EMB]                               # [N, EMB]
            acc_h = jnp.dot(p, xl_h, preferred_element_type=jnp.float32)        # unnormalized
            acc = acc + acc_h * (1.0 / denom)    # fold softmax norm into output scale

        out = acc * (1.0 / HEADS) + bout         # concat=False -> mean over heads + bias
        h = jnp.where(out > 0, out, NEG_SLOPE_OUT * out)   # outer F.leaky_relu

    o_ref[...] = h                               # single HBM writeback per graph


# ------------------------------ wrapper ---------------------------------------
def pack_vec_params(p):
    """Pack all tiny vector params into one [5 + EDGE_DIM, HC] array (1 DMA)."""
    def pad(v):
        return jnp.pad(v, (0, HC - v.shape[0]))
    rows = [pad(p["bf"]), p["bl"], p["br"], pad(p["bias"]), p["att"].reshape(HC)]
    rows += [p["we"][d] for d in range(EDGE_DIM)]
    return jnp.stack(rows, axis=0).astype(jnp.float32)


def gat_forward(xb, eab, maskb, params):
    """xb [B,N,F_IN], eab [B,EDGE_DIM,N,N], maskb [B,N,N] -> [B,N,EMB]."""
    b, n, fin = xb.shape
    pvec = pack_vec_params(params)
    return pl.pallas_call(
        gat_fused_kernel,
        out_shape=jax.ShapeDtypeStruct((b, n, EMB), jnp.float32),
        grid=(b,),
        in_specs=[
            pl.BlockSpec((None, n, fin), lambda g: (g, 0, 0)),
            pl.BlockSpec((None, EDGE_DIM, n, n), lambda g: (g, 0, 0, 0)),
            pl.BlockSpec((None, n, n), lambda g: (g, 0, 0)),
            pl.BlockSpec((fin, EMB), lambda g: (0, 0)),
            pl.BlockSpec((EMB, HC), lambda g: (0, 0)),
            pl.BlockSpec((EMB, HC), lambda g: (0, 0)),
            pl.BlockSpec((5 + EDGE_DIM, HC), lambda g: (0, 0)),
        ],
        out_specs=pl.BlockSpec((None, n, EMB), lambda g: (g, 0, 0)),
        compiler_params=pltpu.CompilerParams(dimension_semantics=("parallel",)),
    )(xb, eab, maskb, params["wf"], params["wl"], params["wr"], pvec)


# ------------------------------ glue ------------------------------------------
def build_dense_graph(edge_index, edge_attr, n):
    """Densify edge list; add self loops with fill_value='mean' (GATv2 default)."""
    src, tgt = edge_index[0], edge_index[1]
    sums = jnp.zeros((n, EDGE_DIM), jnp.float32).at[tgt].add(edge_attr)
    counts = jnp.zeros((n,), jnp.float32).at[tgt].add(1.0)
    loop_attr = sums / jnp.maximum(counts, 1.0)[:, None]

    mask = jnp.zeros((n, n), jnp.float32).at[tgt, src].set(1.0)
    ea = jnp.zeros((n, n, EDGE_DIM), jnp.float32).at[tgt, src].set(edge_attr)
    diag = jnp.arange(n)
    mask = mask.at[diag, diag].set(1.0)
    ea = ea.at[diag, diag].set(loop_attr)
    return jnp.transpose(ea, (2, 0, 1)), mask      # [EDGE_DIM, N, N], [N, N]


# ------------------ pure-JAX reference (same math) for sanity -----------------
def ref_single(x, ea, mask, p):
    n = x.shape[0]
    e = jnp.einsum('dij,df->ijf', ea, p["we"])     # [N, N, HC]
    attf = p["att"].reshape(HC)
    h = x @ p["wf"] + p["bf"]
    for _ in range(N_LAYERS):
        xl = h @ p["wl"] + p["bl"]
        xr = h @ p["wr"] + p["br"]
        s = xr[:, None, :] + xl[None, :, :] + e
        s = jnp.where(s > 0, s, NEG_SLOPE_GAT * s)
        w = s * attf
        acc = jnp.zeros((n, EMB), jnp.float32)
        for hd in range(HEADS):
            sl = slice(hd * EMB, (hd + 1) * EMB)
            sc = jnp.sum(w[:, :, sl], axis=-1)
            sc = jnp.where(mask > 0, sc, -1e30)
            pe = jnp.exp(sc - sc.max(axis=1, keepdims=True)) * mask
            alpha = pe / pe.sum(axis=1, keepdims=True)
            acc = acc + alpha @ xl[:, sl]
        out = acc / HEADS + p["bias"]
        h = jnp.where(out > 0, out, NEG_SLOPE_OUT * out)
    return h


# ------------------------------ main -------------------------------------------
if __name__ == "__main__":
    key = jax.random.PRNGKey(0)
    keys = jax.random.split(key, 12)

    def init(k, shape, scale=0.1):
        return scale * jax.random.normal(k, shape, jnp.float32)

    params = {
        "wf":   init(keys[0], (F_IN, EMB)),            # nn.Linear(F_IN, EMB)
        "bf":   init(keys[1], (EMB,)),
        "wl":   init(keys[2], (EMB, HC)),              # GATv2 lin_l
        "bl":   init(keys[3], (HC,)),
        "wr":   init(keys[4], (EMB, HC)),              # GATv2 lin_r
        "br":   init(keys[5], (HC,)),
        "we":   init(keys[6], (EDGE_DIM, HC)),         # GATv2 lin_edge (no bias)
        "att":  init(keys[7], (HEADS, EMB)),           # attention vector a
        "bias": init(keys[8], (EMB,)),                 # output bias (concat=False)
    }

    # deterministic batch of B small graphs; graph b: node i receives edges from
    # (i+1+b)%N and (i+3+2b)%N (unique, no self edges for b < 4)
    xb = jax.random.normal(keys[9], (B, N, F_IN), jnp.float32)
    idx = jnp.arange(N)
    ekeys = jax.random.split(keys[10], B)
    ea_list, mask_list = [], []
    for b in range(B):
        src = jnp.concatenate([(idx + 1 + b) % N, (idx + 3 + 2 * b) % N]).astype(jnp.int32)
        tgt = jnp.concatenate([idx, idx]).astype(jnp.int32)
        edge_index = jnp.stack([src, tgt])                           # [2, 2N]
        edge_attr = jax.random.normal(ekeys[b], (2 * N, EDGE_DIM), jnp.float32)
        ea_b, mask_b = build_dense_graph(edge_index, edge_attr, N)
        ea_list.append(ea_b)
        mask_list.append(mask_b)
    eab = jnp.stack(ea_list)          # [B, EDGE_DIM, N, N]
    maskb = jnp.stack(mask_list)      # [B, N, N]

    out = gat_forward(xb, eab, maskb, params)
    out = jax.block_until_ready(out)

    ref = jax.vmap(lambda x, ea, m: ref_single(x, ea, m, params))(xb, eab, maskb)
    assert out.shape == (B, N, EMB)
    assert jnp.allclose(out, ref, rtol=1e-3, atol=1e-3), "kernel/reference mismatch"

    print("KERNEL_OK")
</pallas_src>

<mosaic_0001>
module attributes {stable_mosaic.version = 11 : i64} {
  func.func @gat_fused_kernel(%arg0: i32, %arg1: memref<1x16x4xf32, #tpu.memory_space<vmem>>, %arg2: memref<1x2x16x16xf32, #tpu.memory_space<vmem>>, %arg3: memref<1x16x16xf32, #tpu.memory_space<vmem>>, %arg4: memref<4x32xf32, #tpu.memory_space<vmem>>, %arg5: memref<32x64xf32, #tpu.memory_space<vmem>>, %arg6: memref<32x64xf32, #tpu.memory_space<vmem>>, %arg7: memref<7x64xf32, #tpu.memory_space<vmem>>, %arg8: memref<1x16x32xf32, #tpu.memory_space<vmem>>) attributes {dimension_semantics = [#tpu.dimension_semantics<parallel>], iteration_bounds = array<i64: 4>, scalar_prefetch = 0 : i64, scratch_operands = 0 : i64, tpu.core_type = #tpu.core_type<tc>, window_params = [{transform_indices = @transform_0, window_bounds = array<i64: 1, 16, 4>}, {transform_indices = @transform_1, window_bounds = array<i64: 1, 2, 16, 16>}, {transform_indices = @transform_2, window_bounds = array<i64: 1, 16, 16>}, {pipeline_mode = #tpu.pipeline_mode<synchronous>, transform_indices = @transform_3, window_bounds = array<i64: 4, 32>}, {pipeline_mode = #tpu.pipeline_mode<synchronous>, transform_indices = @transform_4, window_bounds = array<i64: 32, 64>}, {pipeline_mode = #tpu.pipeline_mode<synchronous>, transform_indices = @transform_5, window_bounds = array<i64: 32, 64>}, {pipeline_mode = #tpu.pipeline_mode<synchronous>, transform_indices = @transform_6, window_bounds = array<i64: 7, 64>}, {transform_indices = @transform_7, window_bounds = array<i64: 1, 16, 32>}]} {
    %c0 = arith.constant 0 : index
    %c0_0 = arith.constant 0 : index
    %0 = vector.load %arg7[%c0, %c0_0] : memref<7x64xf32, #tpu.memory_space<vmem>>, vector<1x32xf32>
    %c1 = arith.constant 1 : index
    %c0_1 = arith.constant 0 : index
    %1 = vector.load %arg7[%c1, %c0_1] : memref<7x64xf32, #tpu.memory_space<vmem>>, vector<1x64xf32>
    %c2 = arith.constant 2 : index
    %c0_2 = arith.constant 0 : index
    %2 = vector.load %arg7[%c2, %c0_2] : memref<7x64xf32, #tpu.memory_space<vmem>>, vector<1x64xf32>
    %c3 = arith.constant 3 : index
    %c0_3 = arith.constant 0 : index
    %3 = vector.load %arg7[%c3, %c0_3] : memref<7x64xf32, #tpu.memory_space<vmem>>, vector<1x32xf32>
    %c4 = arith.constant 4 : index
    %c0_4 = arith.constant 0 : index
    %4 = vector.load %arg7[%c4, %c0_4] : memref<7x64xf32, #tpu.memory_space<vmem>>, vector<1x64xf32>
    %5 = vector.shape_cast %4 : vector<1x64xf32> to vector<1x1x64xf32>
    %c0_5 = arith.constant 0 : index
    %c0_6 = arith.constant 0 : index
    %c0_7 = arith.constant 0 : index
    %6 = vector.load %arg3[%c0_5, %c0_6, %c0_7] : memref<1x16x16xf32, #tpu.memory_space<vmem>>, vector<1x16x16xf32>
    %7 = vector.shape_cast %6 : vector<1x16x16xf32> to vector<16x16xf32>
    %c0_8 = arith.constant 0 : index
    %c0_9 = arith.constant 0 : index
    %c0_10 = arith.constant 0 : index
    %c0_11 = arith.constant 0 : index
    %8 = vector.load %arg2[%c0_8, %c0_9, %c0_10, %c0_11] : memref<1x2x16x16xf32, #tpu.memory_space<vmem>>, vector<1x2x16x16xf32>
    %9 = vector.shape_cast %8 : vector<1x2x16x16xf32> to vector<2x16x16xf32>
    %c5 = arith.constant 5 : index
    %c0_12 = arith.constant 0 : index
    %10 = vector.load %arg7[%c5, %c0_12] : memref<7x64xf32, #tpu.memory_space<vmem>>, vector<1x64xf32>
    %11 = vector.shape_cast %10 : vector<1x64xf32> to vector<1x1x64xf32>
    %12 = vector.extract_strided_slice %9 {offsets = [0, 0, 0], sizes = [1, 16, 16], strides = [1, 1, 1]} : vector<2x16x16xf32> to vector<1x16x16xf32>
    %13 = vector.shape_cast %12 : vector<1x16x16xf32> to vector<16x16xf32>
    %14 = vector.shape_cast %13 : vector<16x16xf32> to vector<16x16x1xf32>
    %15 = vector.broadcast %14 : vector<16x16x1xf32> to vector<16x16x64xf32>
    %16 = vector.broadcast %11 : vector<1x1x64xf32> to vector<16x16x64xf32>
    %17 = arith.mulf %15, %16 : vector<16x16x64xf32>
    %c6 = arith.constant 6 : index
    %c0_13 = arith.constant 0 : index
    %18 = vector.load %arg7[%c6, %c0_13] : memref<7x64xf32, #tpu.memory_space<vmem>>, vector<1x64xf32>
    %19 = vector.shape_cast %18 : vector<1x64xf32> to vector<1x1x64xf32>
    %20 = vector.extract_strided_slice %9 {offsets = [1, 0, 0], sizes = [1, 16, 16], strides = [1, 1, 1]} : vector<2x16x16xf32> to vector<1x16x16xf32>
    %21 = vector.shape_cast %20 : vector<1x16x16xf32> to vector<16x16xf32>
    %22 = vector.shape_cast %21 : vector<16x16xf32> to vector<16x16x1xf32>
    %23 = vector.broadcast %22 : vector<16x16x1xf32> to vector<16x16x64xf32>
    %24 = vector.broadcast %19 : vector<1x1x64xf32> to vector<16x16x64xf32>
    %25 = arith.mulf %23, %24 : vector<16x16x64xf32>
    %26 = arith.addf %17, %25 : vector<16x16x64xf32>
    %c0_14 = arith.constant 0 : index
    %c0_15 = arith.constant 0 : index
    %c0_16 = arith.constant 0 : index
    %27 = vector.load %arg1[%c0_14, %c0_15, %c0_16] : memref<1x16x4xf32, #tpu.memory_space<vmem>>, vector<1x16x4xf32>
    %28 = vector.shape_cast %27 : vector<1x16x4xf32> to vector<16x4xf32>
    %c0_17 = arith.constant 0 : index
    %c0_18 = arith.constant 0 : index
    %29 = vector.load %arg4[%c0_17, %c0_18] : memref<4x32xf32, #tpu.memory_space<vmem>>, vector<4x32xf32>
    %cst = arith.constant dense<0.000000e+00> : vector<16x32xf32>
    %30 = tpu.matmul %28, %29, %cst {dimension_numbers = #tpu.dot_dimension_numbers<[1], [0], [0], [1], [0, 0, 1, 1], [], []>} : vector<16x4xf32>, vector<4x32xf32>, vector<16x32xf32> -> vector<16x32xf32>
    %31 = vector.broadcast %0 : vector<1x32xf32> to vector<16x32xf32>
    %32 = arith.addf %30, %31 : vector<16x32xf32>
    %c0_19 = arith.constant 0 : index
    %c0_20 = arith.constant 0 : index
    %33 = vector.load %arg5[%c0_19, %c0_20] : memref<32x64xf32, #tpu.memory_space<vmem>>, vector<32x64xf32>
    %cst_21 = arith.constant dense<0.000000e+00> : vector<16x64xf32>
    %34 = tpu.matmul %32, %33, %cst_21 {dimension_numbers = #tpu.dot_dimension_numbers<[1], [0], [0], [1], [0, 0, 1, 1], [], []>} : vector<16x32xf32>, vector<32x64xf32>, vector<16x64xf32> -> vector<16x64xf32>
    %35 = vector.broadcast %1 : vector<1x64xf32> to vector<16x64xf32>
    %36 = arith.addf %34, %35 : vector<16x64xf32>
    %c0_22 = arith.constant 0 : index
    %c0_23 = arith.constant 0 : index
    %37 = vector.load %arg6[%c0_22, %c0_23] : memref<32x64xf32, #tpu.memory_space<vmem>>, vector<32x64xf32>
    %cst_24 = arith.constant dense<0.000000e+00> : vector<16x64xf32>
    %38 = tpu.matmul %32, %37, %cst_24 {dimension_numbers = #tpu.dot_dimension_numbers<[1], [0], [0], [1], [0, 0, 1, 1], [], []>} : vector<16x32xf32>, vector<32x64xf32>, vector<16x64xf32> -> vector<16x64xf32>
    %39 = vector.broadcast %2 : vector<1x64xf32> to vector<16x64xf32>
    %40 = arith.addf %38, %39 : vector<16x64xf32>
    %41 = vector.shape_cast %40 : vector<16x64xf32> to vector<16x1x64xf32>
    %42 = vector.shape_cast %36 : vector<16x64xf32> to vector<1x16x64xf32>
    %43 = vector.broadcast %41 : vector<16x1x64xf32> to vector<16x16x64xf32>
    %44 = vector.broadcast %42 : vector<1x16x64xf32> to vector<16x16x64xf32>
    %45 = arith.addf %43, %44 : vector<16x16x64xf32>
    %46 = arith.addf %45, %26 : vector<16x16x64xf32>
    %cst_25 = arith.constant 0.000000e+00 : f32
    %47 = vector.broadcast %cst_25 : f32 to vector<16x16x64xf32>
    %48 = arith.cmpf ogt, %46, %47 : vector<16x16x64xf32>
    %cst_26 = arith.constant 2.000000e-01 : f32
    %49 = vector.broadcast %cst_26 : f32 to vector<16x16x64xf32>
    %50 = arith.mulf %49, %46 : vector<16x16x64xf32>
    %51 = arith.select %48, %46, %50 : vector<16x16x64xi1>, vector<16x16x64xf32>
    %52 = vector.broadcast %5 : vector<1x1x64xf32> to vector<16x16x64xf32>
    %53 = arith.mulf %51, %52 : vector<16x16x64xf32>
    %cst_27 = arith.constant dense<0.000000e+00> : vector<16x16xf32>
    %54 = vector.multi_reduction <add>, %53, %cst_27 [2] : vector<16x16x64xf32> to vector<16x16xf32>
    %55 = vector.extract_strided_slice %53 {offsets = [0, 0, 0], sizes = [16, 16, 32], strides = [1, 1, 1]} : vector<16x16x64xf32> to vector<16x16x32xf32>
    %cst_28 = arith.constant dense<0.000000e+00> : vector<16x16xf32>
    %56 = vector.multi_reduction <add>, %55, %cst_28 [2] : vector<16x16x32xf32> to vector<16x16xf32>
    %57 = arith.subf %54, %56 : vector<16x16xf32>
    %cst_29 = arith.constant 0.000000e+00 : f32
    %58 = vector.broadcast %cst_29 : f32 to vector<16x32xf32>
    %cst_30 = arith.constant 0.000000e+00 : f32
    %59 = vector.broadcast %cst_30 : f32 to vector<16x16xf32>
    %60 = arith.cmpf ogt, %7, %59 : vector<16x16xf32>
    %cst_31 = arith.constant -1.000000e+30 : f32
    %61 = vector.broadcast %cst_31 : f32 to vector<16x16xf32>
    %62 = arith.select %60, %56, %61 : vector<16x16xi1>, vector<16x16xf32>
    %cst_32 = arith.constant dense<0xFF800000> : vector<16xf32>
    %63 = vector.multi_reduction <maximumf>, %62, %cst_32 [1] : vector<16x16xf32> to vector<16xf32>
    %64 = vector.shape_cast %63 : vector<16xf32> to vector<16x1xf32>
    %65 = vector.broadcast %64 : vector<16x1xf32> to vector<16x16xf32>
    %66 = arith.subf %62, %65 : vector<16x16xf32>
    %67 = math.exp %66 : vector<16x16xf32>
    %68 = arith.mulf %67, %7 : vector<16x16xf32>
    %cst_33 = arith.constant dense<0.000000e+00> : vector<16xf32>
    %69 = vector.multi_reduction <add>, %68, %cst_33 [1] : vector<16x16xf32> to vector<16xf32>
    %70 = vector.shape_cast %69 : vector<16xf32> to vector<16x1xf32>
    %71 = vector.extract_strided_slice %36 {offsets = [0, 0], sizes = [16, 32], strides = [1, 1]} : vector<16x64xf32> to vector<16x32xf32>
    %cst_34 = arith.constant dense<0.000000e+00> : vector<16x32xf32>
    %72 = tpu.matmul %68, %71, %cst_34 {dimension_numbers = #tpu.dot_dimension_numbers<[1], [0], [0], [1], [0, 0, 1, 1], [], []>} : vector<16x16xf32>, vector<16x32xf32>, vector<16x32xf32> -> vector<16x32xf32>
    %cst_35 = arith.constant 1.000000e+00 : f32
    %73 = vector.broadcast %cst_35 : f32 to vector<16x1xf32>
    %74 = arith.divf %73, %70 : vector<16x1xf32>
    %75 = vector.broadcast %74 : vector<16x1xf32> to vector<16x32xf32>
    %76 = arith.mulf %72, %75 : vector<16x32xf32>
    %77 = arith.addf %58, %76 : vector<16x32xf32>
    %cst_36 = arith.constant 0.000000e+00 : f32
    %78 = vector.broadcast %cst_36 : f32 to vector<16x16xf32>
    %79 = arith.cmpf ogt, %7, %78 : vector<16x16xf32>
    %cst_37 = arith.constant -1.000000e+30 : f32
    %80 = vector.broadcast %cst_37 : f32 to vector<16x16xf32>
    %81 = arith.select %79, %57, %80 : vector<16x16xi1>, vector<16x16xf32>
    %cst_38 = arith.constant dense<0xFF800000> : vector<16xf32>
    %82 = vector.multi_reduction <maximumf>, %81, %cst_38 [1] : vector<16x16xf32> to vector<16xf32>
    %83 = vector.shape_cast %82 : vector<16xf32> to vector<16x1xf32>
    %84 = vector.broadcast %83 : vector<16x1xf32> to vector<16x16xf32>
    %85 = arith.subf %81, %84 : vector<16x16xf32>
    %86 = math.exp %85 : vector<16x16xf32>
    %87 = arith.mulf %86, %7 : vector<16x16xf32>
    %cst_39 = arith.constant dense<0.000000e+00> : vector<16xf32>
    %88 = vector.multi_reduction <add>, %87, %cst_39 [1] : vector<16x16xf32> to vector<16xf32>
    %89 = vector.shape_cast %88 : vector<16xf32> to vector<16x1xf32>
    %90 = vector.extract_strided_slice %36 {offsets = [0, 32], sizes = [16, 32], strides = [1, 1]} : vector<16x64xf32> to vector<16x32xf32>
    %cst_40 = arith.constant dense<0.000000e+00> : vector<16x32xf32>
    %91 = tpu.matmul %87, %90, %cst_40 {dimension_numbers = #tpu.dot_dimension_numbers<[1], [0], [0], [1], [0, 0, 1, 1], [], []>} : vector<16x16xf32>, vector<16x32xf32>, vector<16x32xf32> -> vector<16x32xf32>
    %cst_41 = arith.constant 1.000000e+00 : f32
    %92 = vector.broadcast %cst_41 : f32 to vector<16x1xf32>
    %93 = arith.divf %92, %89 : vector<16x1xf32>
    %94 = vector.broadcast %93 : vector<16x1xf32> to vector<16x32xf32>
    %95 = arith.mulf %91, %94 : vector<16x32xf32>
    %96 = arith.addf %77, %95 : vector<16x32xf32>
    %cst_42 = arith.constant 5.000000e-01 : f32
    %97 = vector.broadcast %cst_42 : f32 to vector<16x32xf32>
    %98 = arith.mulf %96, %97 : vector<16x32xf32>
    %99 = vector.broadcast %3 : vector<1x32xf32> to vector<16x32xf32>
    %100 = arith.addf %98, %99 : vector<16x32xf32>
    %cst_43 = arith.constant 0.000000e+00 : f32
    %101 = vector.broadcast %cst_43 : f32 to vector<16x32xf32>
    %102 = arith.cmpf ogt, %100, %101 : vector<16x32xf32>
    %cst_44 = arith.constant 0.00999999977 : f32
    %103 = vector.broadcast %cst_44 : f32 to vector<16x32xf32>
    %104 = arith.mulf %103, %100 : vector<16x32xf32>
    %105 = arith.select %102, %100, %104 : vector<16x32xi1>, vector<16x32xf32>
    %c0_45 = arith.constant 0 : index
    %c0_46 = arith.constant 0 : index
    %106 = vector.load %arg5[%c0_45, %c0_46] : memref<32x64xf32, #tpu.memory_space<vmem>>, vector<32x64xf32>
    %cst_47 = arith.constant dense<0.000000e+00> : vector<16x64xf32>
    %107 = tpu.matmul %105, %106, %cst_47 {dimension_numbers = #tpu.dot_dimension_numbers<[1], [0], [0], [1], [0, 0, 1, 1], [], []>} : vector<16x32xf32>, vector<32x64xf32>, vector<16x64xf32> -> vector<16x64xf32>
    %108 = vector.broadcast %1 : vector<1x64xf32> to vector<16x64xf32>
    %109 = arith.addf %107, %108 : vector<16x64xf32>
    %c0_48 = arith.constant 0 : index
    %c0_49 = arith.constant 0 : index
    %110 = vector.load %arg6[%c0_48, %c0_49] : memref<32x64xf32, #tpu.memory_space<vmem>>, vector<32x64xf32>
    %cst_50 = arith.constant dense<0.000000e+00> : vector<16x64xf32>
    %111 = tpu.matmul %105, %110, %cst_50 {dimension_numbers = #tpu.dot_dimension_numbers<[1], [0], [0], [1], [0, 0, 1, 1], [], []>} : vector<16x32xf32>, vector<32x64xf32>, vector<16x64xf32> -> vector<16x64xf32>
    %112 = vector.broadcast %2 : vector<1x64xf32> to vector<16x64xf32>
    %113 = arith.addf %111, %112 : vector<16x64xf32>
    %114 = vector.shape_cast %113 : vector<16x64xf32> to vector<16x1x64xf32>
    %115 = vector.shape_cast %109 : vector<16x64xf32> to vector<1x16x64xf32>
    %116 = vector.broadcast %114 : vector<16x1x64xf32> to vector<16x16x64xf32>
    %117 = vector.broadcast %115 : vector<1x16x64xf32> to vector<16x16x64xf32>
    %118 = arith.addf %116, %117 : vector<16x16x64xf32>
    %119 = arith.addf %118, %26 : vector<16x16x64xf32>
    %cst_51 = arith.constant 0.000000e+00 : f32
    %120 = vector.broadcast %cst_51 : f32 to vector<16x16x64xf32>
    %121 = arith.cmpf ogt, %119, %120 : vector<16x16x64xf32>
    %cst_52 = arith.constant 2.000000e-01 : f32
    %122 = vector.broadcast %cst_52 : f32 to vector<16x16x64xf32>
    %123 = arith.mulf %122, %119 : vector<16x16x64xf32>
    %124 = arith.select %121, %119, %123 : vector<16x16x64xi1>, vector<16x16x64xf32>
    %125 = vector.broadcast %5 : vector<1x1x64xf32> to vector<16x16x64xf32>
    %126 = arith.mulf %124, %125 : vector<16x16x64xf32>
    %cst_53 = arith.constant dense<0.000000e+00> : vector<16x16xf32>
    %127 = vector.multi_reduction <add>, %126, %cst_53 [2] : vector<16x16x64xf32> to vector<16x16xf32>
    %128 = vector.extract_strided_slice %126 {offsets = [0, 0, 0], sizes = [16, 16, 32], strides = [1, 1, 1]} : vector<16x16x64xf32> to vector<16x16x32xf32>
    %cst_54 = arith.constant dense<0.000000e+00> : vector<16x16xf32>
    %129 = vector.multi_reduction <add>, %128, %cst_54 [2] : vector<16x16x32xf32> to vector<16x16xf32>
    %130 = arith.subf %127, %129 : vector<16x16xf32>
    %cst_55 = arith.constant 0.000000e+00 : f32
    %131 = vector.broadcast %cst_55 : f32 to vector<16x32xf32>
    %cst_56 = arith.constant 0.000000e+00 : f32
    %132 = vector.broadcast %cst_56 : f32 to vector<16x16xf32>
    %133 = arith.cmpf ogt, %7, %132 : vector<16x16xf32>
    %cst_57 = arith.constant -1.000000e+30 : f32
    %134 = vector.broadcast %cst_57 : f32 to vector<16x16xf32>
    %135 = arith.select %133, %129, %134 : vector<16x16xi1>, vector<16x16xf32>
    %cst_58 = arith.constant dense<0xFF800000> : vector<16xf32>
    %136 = vector.multi_reduction <maximumf>, %135, %cst_58 [1] : vector<16x16xf32> to vector<16xf32>
    %137 = vector.shape_cast %136 : vector<16xf32> to vector<16x1xf32>
    %138 = vector.broadcast %137 : vector<16x1xf32> to vector<16x16xf32>
    %139 = arith.subf %135, %138 : vector<16x16xf32>
    %140 = math.exp %139 : vector<16x16xf32>
    %141 = arith.mulf %140, %7 : vector<16x16xf32>
    %cst_59 = arith.constant dense<0.000000e+00> : vector<16xf32>
    %142 = vector.multi_reduction <add>, %141, %cst_59 [1] : vector<16x16xf32> to vector<16xf32>
    %143 = vector.shape_cast %142 : vector<16xf32> to vector<16x1xf32>
    %144 = vector.extract_strided_slice %109 {offsets = [0, 0], sizes = [16, 32], strides = [1, 1]} : vector<16x64xf32> to vector<16x32xf32>
    %cst_60 = arith.constant dense<0.000000e+00> : vector<16x32xf32>
    %145 = tpu.matmul %141, %144, %cst_60 {dimension_numbers = #tpu.dot_dimension_numbers<[1], [0], [0], [1], [0, 0, 1, 1], [], []>} : vector<16x16xf32>, vector<16x32xf32>, vector<16x32xf32> -> vector<16x32xf32>
    %cst_61 = arith.constant 1.000000e+00 : f32
    %146 = vector.broadcast %cst_61 : f32 to vector<16x1xf32>
    %147 = arith.divf %146, %143 : vector<16x1xf32>
    %148 = vector.broadcast %147 : vector<16x1xf32> to vector<16x32xf32>
    %149 = arith.mulf %145, %148 : vector<16x32xf32>
    %150 = arith.addf %131, %149 : vector<16x32xf32>
    %cst_62 = arith.constant 0.000000e+00 : f32
    %151 = vector.broadcast %cst_62 : f32 to vector<16x16xf32>
    %152 = arith.cmpf ogt, %7, %151 : vector<16x16xf32>
    %cst_63 = arith.constant -1.000000e+30 : f32
    %153 = vector.broadcast %cst_63 : f32 to vector<16x16xf32>
    %154 = arith.select %152, %130, %153 : vector<16x16xi1>, vector<16x16xf32>
    %cst_64 = arith.constant dense<0xFF800000> : vector<16xf32>
    %155 = vector.multi_reduction <maximumf>, %154, %cst_64 [1] : vector<16x16xf32> to vector<16xf32>
    %156 = vector.shape_cast %155 : vector<16xf32> to vector<16x1xf32>
    %157 = vector.broadcast %156 : vector<16x1xf32> to vector<16x16xf32>
    %158 = arith.subf %154, %157 : vector<16x16xf32>
    %159 = math.exp %158 : vector<16x16xf32>
    %160 = arith.mulf %159, %7 : vector<16x16xf32>
    %cst_65 = arith.constant dense<0.000000e+00> : vector<16xf32>
    %161 = vector.multi_reduction <add>, %160, %cst_65 [1] : vector<16x16xf32> to vector<16xf32>
    %162 = vector.shape_cast %161 : vector<16xf32> to vector<16x1xf32>
    %163 = vector.extract_strided_slice %109 {offsets = [0, 32], sizes = [16, 32], strides = [1, 1]} : vector<16x64xf32> to vector<16x32xf32>
    %cst_66 = arith.constant dense<0.000000e+00> : vector<16x32xf32>
    %164 = tpu.matmul %160, %163, %cst_66 {dimension_numbers = #tpu.dot_dimension_numbers<[1], [0], [0], [1], [0, 0, 1, 1], [], []>} : vector<16x16xf32>, vector<16x32xf32>, vector<16x32xf32> -> vector<16x32xf32>
    %cst_67 = arith.constant 1.000000e+00 : f32
    %165 = vector.broadcast %cst_67 : f32 to vector<16x1xf32>
    %166 = arith.divf %165, %162 : vector<16x1xf32>
    %167 = vector.broadcast %166 : vector<16x1xf32> to vector<16x32xf32>
    %168 = arith.mulf %164, %167 : vector<16x32xf32>
    %169 = arith.addf %150, %168 : vector<16x32xf32>
    %cst_68 = arith.constant 5.000000e-01 : f32
    %170 = vector.broadcast %cst_68 : f32 to vector<16x32xf32>
    %171 = arith.mulf %169, %170 : vector<16x32xf32>
    %172 = vector.broadcast %3 : vector<1x32xf32> to vector<16x32xf32>
    %173 = arith.addf %171, %172 : vector<16x32xf32>
    %cst_69 = arith.constant 0.000000e+00 : f32
    %174 = vector.broadcast %cst_69 : f32 to vector<16x32xf32>
    %175 = arith.cmpf ogt, %173, %174 : vector<16x32xf32>
    %cst_70 = arith.constant 0.00999999977 : f32
    %176 = vector.broadcast %cst_70 : f32 to vector<16x32xf32>
    %177 = arith.mulf %176, %173 : vector<16x32xf32>
    %178 = arith.select %175, %173, %177 : vector<16x32xi1>, vector<16x32xf32>
    %c0_71 = arith.constant 0 : index
    %c0_72 = arith.constant 0 : index
    %179 = vector.load %arg5[%c0_71, %c0_72] : memref<32x64xf32, #tpu.memory_space<vmem>>, vector<32x64xf32>
    %cst_73 = arith.constant dense<0.000000e+00> : vector<16x64xf32>
    %180 = tpu.matmul %178, %179, %cst_73 {dimension_numbers = #tpu.dot_dimension_numbers<[1], [0], [0], [1], [0, 0, 1, 1], [], []>} : vector<16x32xf32>, vector<32x64xf32>, vector<16x64xf32> -> vector<16x64xf32>
    %181 = vector.broadcast %1 : vector<1x64xf32> to vector<16x64xf32>
    %182 = arith.addf %180, %181 : vector<16x64xf32>
    %c0_74 = arith.constant 0 : index
    %c0_75 = arith.constant 0 : index
    %183 = vector.load %arg6[%c0_74, %c0_75] : memref<32x64xf32, #tpu.memory_space<vmem>>, vector<32x64xf32>
    %cst_76 = arith.constant dense<0.000000e+00> : vector<16x64xf32>
    %184 = tpu.matmul %178, %183, %cst_76 {dimension_numbers = #tpu.dot_dimension_numbers<[1], [0], [0], [1], [0, 0, 1, 1], [], []>} : vector<16x32xf32>, vector<32x64xf32>, vector<16x64xf32> -> vector<16x64xf32>
    %185 = vector.broadcast %2 : vector<1x64xf32> to vector<16x64xf32>
    %186 = arith.addf %184, %185 : vector<16x64xf32>
    %187 = vector.shape_cast %186 : vector<16x64xf32> to vector<16x1x64xf32>
    %188 = vector.shape_cast %182 : vector<16x64xf32> to vector<1x16x64xf32>
    %189 = vector.broadcast %187 : vector<16x1x64xf32> to vector<16x16x64xf32>
    %190 = vector.broadcast %188 : vector<1x16x64xf32> to vector<16x16x64xf32>
    %191 = arith.addf %189, %190 : vector<16x16x64xf32>
    %192 = arith.addf %191, %26 : vector<16x16x64xf32>
    %cst_77 = arith.constant 0.000000e+00 : f32
    %193 = vector.broadcast %cst_77 : f32 to vector<16x16x64xf32>
    %194 = arith.cmpf ogt, %192, %193 : vector<16x16x64xf32>
    %cst_78 = arith.constant 2.000000e-01 : f32
    %195 = vector.broadcast %cst_78 : f32 to vector<16x16x64xf32>
    %196 = arith.mulf %195, %192 : vector<16x16x64xf32>
    %197 = arith.select %194, %192, %196 : vector<16x16x64xi1>, vector<16x16x64xf32>
    %198 = vector.broadcast %5 : vector<1x1x64xf32> to vector<16x16x64xf32>
    %199 = arith.mulf %197, %198 : vector<16x16x64xf32>
    %cst_79 = arith.constant dense<0.000000e+00> : vector<16x16xf32>
    %200 = vector.multi_reduction <add>, %199, %cst_79 [2] : vector<16x16x64xf32> to vector<16x16xf32>
    %201 = vector.extract_strided_slice %199 {offsets = [0, 0, 0], sizes = [16, 16, 32], strides = [1, 1, 1]} : vector<16x16x64xf32> to vector<16x16x32xf32>
    %cst_80 = arith.constant dense<0.000000e+00> : vector<16x16xf32>
    %202 = vector.multi_reduction <add>, %201, %cst_80 [2] : vector<16x16x32xf32> to vector<16x16xf32>
    %203 = arith.subf %200, %202 : vector<16x16xf32>
    %cst_81 = arith.constant 0.000000e+00 : f32
    %204 = vector.broadcast %cst_81 : f32 to vector<16x32xf32>
    %cst_82 = arith.constant 0.000000e+00 : f32
    %205 = vector.broadcast %cst_82 : f32 to vector<16x16xf32>
    %206 = arith.cmpf ogt, %7, %205 : vector<16x16xf32>
    %cst_83 = arith.constant -1.000000e+30 : f32
    %207 = vector.broadcast %cst_83 : f32 to vector<16x16xf32>
    %208 = arith.select %206, %202, %207 : vector<16x16xi1>, vector<16x16xf32>
    %cst_84 = arith.constant dense<0xFF800000> : vector<16xf32>
    %209 = vector.multi_reduction <maximumf>, %208, %cst_84 [1] : vector<16x16xf32> to vector<16xf32>
    %210 = vector.shape_cast %209 : vector<16xf32> to vector<16x1xf32>
    %211 = vector.broadcast %210 : vector<16x1xf32> to vector<16x16xf32>
    %212 = arith.subf %208, %211 : vector<16x16xf32>
    %213 = math.exp %212 : vector<16x16xf32>
    %214 = arith.mulf %213, %7 : vector<16x16xf32>
    %cst_85 = arith.constant dense<0.000000e+00> : vector<16xf32>
    %215 = vector.multi_reduction <add>, %214, %cst_85 [1] : vector<16x16xf32> to vector<16xf32>
    %216 = vector.shape_cast %215 : vector<16xf32> to vector<16x1xf32>
    %217 = vector.extract_strided_slice %182 {offsets = [0, 0], sizes = [16, 32], strides = [1, 1]} : vector<16x64xf32> to vector<16x32xf32>
    %cst_86 = arith.constant dense<0.000000e+00> : vector<16x32xf32>
    %218 = tpu.matmul %214, %217, %cst_86 {dimension_numbers = #tpu.dot_dimension_numbers<[1], [0], [0], [1], [0, 0, 1, 1], [], []>} : vector<16x16xf32>, vector<16x32xf32>, vector<16x32xf32> -> vector<16x32xf32>
    %cst_87 = arith.constant 1.000000e+00 : f32
    %219 = vector.broadcast %cst_87 : f32 to vector<16x1xf32>
    %220 = arith.divf %219, %216 : vector<16x1xf32>
    %221 = vector.broadcast %220 : vector<16x1xf32> to vector<16x32xf32>
    %222 = arith.mulf %218, %221 : vector<16x32xf32>
    %223 = arith.addf %204, %222 : vector<16x32xf32>
    %cst_88 = arith.constant 0.000000e+00 : f32
    %224 = vector.broadcast %cst_88 : f32 to vector<16x16xf32>
    %225 = arith.cmpf ogt, %7, %224 : vector<16x16xf32>
    %cst_89 = arith.constant -1.000000e+30 : f32
    %226 = vector.broadcast %cst_89 : f32 to vector<16x16xf32>
    %227 = arith.select %225, %203, %226 : vector<16x16xi1>, vector<16x16xf32>
    %cst_90 = arith.constant dense<0xFF800000> : vector<16xf32>
    %228 = vector.multi_reduction <maximumf>, %227, %cst_90 [1] : vector<16x16xf32> to vector<16xf32>
    %229 = vector.shape_cast %228 : vector<16xf32> to vector<16x1xf32>
    %230 = vector.broadcast %229 : vector<16x1xf32> to vector<16x16xf32>
    %231 = arith.subf %227, %230 : vector<16x16xf32>
    %232 = math.exp %231 : vector<16x16xf32>
    %233 = arith.mulf %232, %7 : vector<16x16xf32>
    %cst_91 = arith.constant dense<0.000000e+00> : vector<16xf32>
    %234 = vector.multi_reduction <add>, %233, %cst_91 [1] : vector<16x16xf32> to vector<16xf32>
    %235 = vector.shape_cast %234 : vector<16xf32> to vector<16x1xf32>
    %236 = vector.extract_strided_slice %182 {offsets = [0, 32], sizes = [16, 32], strides = [1, 1]} : vector<16x64xf32> to vector<16x32xf32>
    %cst_92 = arith.constant dense<0.000000e+00> : vector<16x32xf32>
    %237 = tpu.matmul %233, %236, %cst_92 {dimension_numbers = #tpu.dot_dimension_numbers<[1], [0], [0], [1], [0, 0, 1, 1], [], []>} : vector<16x16xf32>, vector<16x32xf32>, vector<16x32xf32> -> vector<16x32xf32>
    %cst_93 = arith.constant 1.000000e+00 : f32
    %238 = vector.broadcast %cst_93 : f32 to vector<16x1xf32>
    %239 = arith.divf %238, %235 : vector<16x1xf32>
    %240 = vector.broadcast %239 : vector<16x1xf32> to vector<16x32xf32>
    %241 = arith.mulf %237, %240 : vector<16x32xf32>
    %242 = arith.addf %223, %241 : vector<16x32xf32>
    %cst_94 = arith.constant 5.000000e-01 : f32
    %243 = vector.broadcast %cst_94 : f32 to vector<16x32xf32>
    %244 = arith.mulf %242, %243 : vector<16x32xf32>
    %245 = vector.broadcast %3 : vector<1x32xf32> to vector<16x32xf32>
    %246 = arith.addf %244, %245 : vector<16x32xf32>
    %cst_95 = arith.constant 0.000000e+00 : f32
    %247 = vector.broadcast %cst_95 : f32 to vector<16x32xf32>
    %248 = arith.cmpf ogt, %246, %247 : vector<16x32xf32>
    %cst_96 = arith.constant 0.00999999977 : f32
    %249 = vector.broadcast %cst_96 : f32 to vector<16x32xf32>
    %250 = arith.mulf %249, %246 : vector<16x32xf32>
    %251 = arith.select %248, %246, %250 : vector<16x32xi1>, vector<16x32xf32>
    %c0_97 = arith.constant 0 : index
    %c0_98 = arith.constant 0 : index
    %c0_99 = arith.constant 0 : index
    %252 = vector.load %arg8[%c0_97, %c0_98, %c0_99] : memref<1x16x32xf32, #tpu.memory_space<vmem>>, vector<1x16x32xf32>
    %253 = vector.shape_cast %252 : vector<1x16x32xf32> to vector<16x32xf32>
    %254 = vector.shape_cast %251 : vector<16x32xf32> to vector<1x16x32xf32>
    tpu.vector_store %arg8[%c0_97, %c0_98, %c0_99], %254 {strides = array<i32>} : memref<1x16x32xf32, #tpu.memory_space<vmem>>, vector<1x16x32xf32>,
    return
  }
  func.func @transform_0(%arg0: i32) -> (i32, i32, i32) {
    %c0_i32 = arith.constant 0 : i32
    %c0_i32_0 = arith.constant 0 : i32
    %c0_i32_1 = arith.constant 0 : i32
    return %arg0, %c0_i32, %c0_i32_0 : i32, i32, i32
  }
  func.func @transform_1(%arg0: i32) -> (i32, i32, i32, i32) {
    %c0_i32 = arith.constant 0 : i32
    %c0_i32_0 = arith.constant 0 : i32
    %c0_i32_1 = arith.constant 0 : i32
    %c0_i32_2 = arith.constant 0 : i32
    return %arg0, %c0_i32, %c0_i32_0, %c0_i32_1 : i32, i32, i32, i32
  }
  func.func @transform_2(%arg0: i32) -> (i32, i32, i32) {
    %c0_i32 = arith.constant 0 : i32
    %c0_i32_0 = arith.constant 0 : i32
    %c0_i32_1 = arith.constant 0 : i32
    return %arg0, %c0_i32, %c0_i32_0 : i32, i32, i32
  }
  func.func @transform_3(%arg0: i32) -> (i32, i32) {
    %c0_i32 = arith.constant 0 : i32
    %c0_i32_0 = arith.constant 0 : i32
    %c0_i32_1 = arith.constant 0 : i32
    return %c0_i32, %c0_i32_0 : i32, i32
  }
  func.func @transform_4(%arg0: i32) -> (i32, i32) {
    %c0_i32 = arith.constant 0 : i32
    %c0_i32_0 = arith.constant 0 : i32
    %c0_i32_1 = arith.constant 0 : i32
    return %c0_i32, %c0_i32_0 : i32, i32
  }
  func.func @transform_5(%arg0: i32) -> (i32, i32) {
    %c0_i32 = arith.constant 0 : i32
    %c0_i32_0 = arith.constant 0 : i32
    %c0_i32_1 = arith.constant 0 : i32
    return %c0_i32, %c0_i32_0 : i32, i32
  }
  func.func @transform_6(%arg0: i32) -> (i32, i32) {
    %c0_i32 = arith.constant 0 : i32
    %c0_i32_0 = arith.constant 0 : i32
    %c0_i32_1 = arith.constant 0 : i32
    return %c0_i32, %c0_i32_0 : i32, i32
  }
  func.func @transform_7(%arg0: i32) -> (i32, i32, i32) {
    %c0_i32 = arith.constant 0 : i32
    %c0_i32_0 = arith.constant 0 : i32
    %c0_i32_1 = arith.constant 0 : i32
    return %arg0, %c0_i32, %c0_i32_0 : i32, i32, i32
  }
}

</mosaic_0001>

<bundles_post_ra>
// kernel: tpu_custom_call.1
= control target key start
LH: loop header
LB: loop body
LE: loop exit
PB: predicated region body
PF: predicated region fallthrough
CT: control target
= control target key end

     0   :  { %12 = vsyncpa [#allocation3], 0  ;;  %s8408_s0 = inlined_call_operand.vmem [shape: f32[4,16,4], index: 0, kind: input, shape index: {}]   ;;  %s8409_s1 = inlined_call_operand.hbm [shape: f32[4,2,16,16], index: 1, kind: input, shape index: {}]   ;;  %s8410_s2 = inlined_call_operand.vmem [shape: f32[4,16,16], index: 2, kind: input, shape index: {}]   ;;  %s8411_s3 = inlined_call_operand.hbm [shape: f32[4,32], index: 3, kind: input, shape index: {}]   ;;  %s8412_s4 = inlined_call_operand.hbm [shape: f32[32,64], index: 4, kind: input, shape index: {}]   ;;  %s8413_s5 = inlined_call_operand.vmem [shape: f32[32,64], index: 5, kind: input, shape index: {}]   ;;  %s8414_s6 = inlined_call_operand.hbm [shape: f32[7,64], index: 6, kind: input, shape index: {}]   ;;  %s8415_s7 = inlined_call_operand.hbm [shape: f32[4,16,32], index: 7, kind: output, shape index: {}]  }
   0x1   :  { %14 = vsyncpa [#allocation3 + $0x1], 0 }
   0x2   :  { %15 = vsyncpa [#allocation6], 0 }
   0x3   :  { %16 = vsyncpa [#allocation9], 0 }
   0x4   :  { %17 = vsyncpa [#allocation4], 0 }
   0x5   :  { %19 = vsyncpa [#allocation4 + $0x1], 0  ;;  %s5958_s24 = smov 0   ;;  %s5960_s25 = smov 0  }
   0x6   :  { %s5962_s26 = smov 0   ;;  %s5964_s27 = smov 0  }
   0x7 LB: > { %s5979_s28 = sadd.s32 4294967295, %s5905_s27   ;;  %s5249_s29 = sadd.s32 4294967294, %s5905_s27   ;;  %s5905_s27 = sphi %s5964_s27, %s8643_s27   ;;  %s5901_s26 = sphi %s5962_s26, %s8642_s26   ;;  %s5897_s25 = sphi %s5960_s25, %s8641_s25   ;;  %s5893_s24 = sphi %s5958_s24, %s8640_s24  }
   0x8   : > { %p71_p0 = scmp.ne.s32.totalorder %s5897_s25, %s5893_s24  ;;  %p8416_p1 = scmp.eq.s32.totalorder %s5979_s28, 0 }
   0x9   : > { %p211_p3 = scmp.eq.s32.totalorder %s5249_s29, 3  ;;  %p5250_p5 = scmp.ge.s32.totalorder %s5905_s27, 1 }
   0xa   : > { %p5988_p4 = por %p8416_p1, %p71_p0  ;;  %p218_p7 = scmp.lt.s32.totalorder %s5905_s27, 5 }
   0xb   : > { %p5993_p6 = por %p211_p3, %p71_p0  ;;  %s5907_s10 = smov [#allocation5]  }
   0xc   : > { %s8505_s30 = scalar_select %p5988_p4, 1, 0 }
   0xd   : > { %s8506_s8 = scalar_select %p5993_p6, 1, 0 }
   0xe   : > { %p5998_p8 = pnand %p5250_p5, %p218_p7  ;;  %s231_s11 = sshll.u32 %s5907_s10, 4  ;;  %s232_s11 = int_to_ptr.vmem [resolvable:$true] %s231_s11 }
   0xf   : > { %s5908_s12 = smov [#allocation7]   ;;  %s5909_s15 = smov [#allocation8]  }
  0x10   : > { %s8507_s9 = scalar_select %p5998_p8, 1, 0 }
  0x11   : > { %p5575_p9 = pneg %p5998_p8  ;;  %s241_s13 = sshll.u32 %s5908_s12, 4  ;;  %s6010_s13 = int_to_ptr.vmem [resolvable:$true] %s241_s13 }
  0x12   : > { %s6012_s16 = sshll.u32 %s5909_s15, 4  ;;  %s5717_s19 = scalar_lea.hbm %s8411_s3, 64  ;;  %s259_s16 = int_to_ptr.vmem [resolvable:$true] %s6012_s16 }
  0x13   : > { %p6006_p10 = pnand %p5575_p9, %p8416_p1  ;;  %p5718_p11 = scmp.ne.s32.totalorder %s8411_s3, %s5717_s19 }
  0x14   : > { %p5724_p3 = scmp.lt.u32.totalorder %s5717_s19, %s8411_s3 }
  0x15   : > { %p6022_p12 = pneg %p6006_p10 }
  0x17   : > { %p5720_p13 = pnand %p6022_p12, %p5718_p11 }
  0x19   : > { %p5721_p0 = pneg %p5720_p13 }
  0x1b   : > { %p5726_p5 = pnand %p5724_p3, %p5721_p0 }
  0x1d   : > { %5729 = shalt.err (!%p5726_p5)
}
  0x1e   : > { %s5730_s10 = scalar_lea.vmem %s232_s11, 64  ;;  %p5738_p2 = scmp.lt.s32.totalorder %s232_s11, %s232_s11 }
  0x1f   : > { %p5731_p7 = scmp.ne.s32.totalorder %s232_s11, %s5730_s10  ;;  %p5739_p6 = scmp.lt.s32.totalorder %s5730_s10, %s5730_s10 }
  0x21   : > { %p5733_p9 = pnand %p5731_p7, %p6022_p12  ;;  %p5740_p4 = por %p5739_p6, %p5738_p2 }
  0x23   : > { %p5734_p1 = pneg %p5733_p9 }
  0x25   : > { %p5741_p8 = pnand %p5740_p4, %p5734_p1 }
  0x27   : > { %5744 = shalt.err (!%p5741_p8)
}
  0x28   : > { %5578 = dma.hbm_to_vmem [thread:$0]  (!%p6006_p10), %s8411_s3, 64, %s232_s11, [#allocation6]  }
  0x29   : > { %s5745_s19 = scalar_lea.hbm %s8412_s4, 512 }
  0x2a   : > { %p5746_p11 = scmp.ne.s32.totalorder %s8412_s4, %s5745_s19  ;;  %p5752_p1 = scmp.lt.u32.totalorder %s5745_s19, %s8412_s4 }
  0x2c   : > { %p5748_p13 = pnand %p5746_p11, %p6022_p12 }
  0x2e   : > { %p5749_p2 = pneg %p5748_p13 }
  0x30   : > { %p5754_p4 = pnand %p5752_p1, %p5749_p2 }
  0x32   : > { %5757 = shalt.err (!%p5754_p4)
}
  0x33   : > { %s5758_s11 = scalar_lea.vmem %s6010_s13, 512  ;;  %p5766_p3 = scmp.lt.s32.totalorder %s6010_s13, %s6010_s13 }
  0x34   : > { %p5759_p6 = scmp.ne.s32.totalorder %s6010_s13, %s5758_s11  ;;  %p5767_p5 = scmp.lt.s32.totalorder %s5758_s11, %s5758_s11 }
  0x36   : > { %p5761_p8 = pnand %p5759_p6, %p6022_p12  ;;  %p5768_p7 = por %p5767_p5, %p5766_p3 }
  0x38   : > { %p5762_p0 = pneg %p5761_p8 }
  0x3a   : > { %p5769_p9 = pnand %p5768_p7, %p5762_p0 }
  0x3c   : > { %5772 = shalt.err (!%p5769_p9)
}
  0x3d   : > { %s8419_s10 = smov 128   ;;  %s5911_s12 = smov 8  }
  0x3e   : > { %5581 = dma.hbm_to_vmem [thread:$0]  (!%p6006_p10), %s8412_s4, 512, %s6010_s13, [#allocation6], %s8419_s10, %s8419_s10, %s5911_s12  }
  0x3f   : > { %s5773_s20 = scalar_lea.hbm %s8414_s6, 128 }
  0x40   : > { %p5774_p11 = scmp.ne.s32.totalorder %s8414_s6, %s5773_s20  ;;  %p5780_p1 = scmp.lt.u32.totalorder %s5773_s20, %s8414_s6 }
  0x42   : > { %p5776_p13 = pnand %p5774_p11, %p6022_p12 }
  0x44   : > { %p5777_p2 = pneg %p5776_p13 }
  0x46   : > { %p5782_p4 = pnand %p5780_p1, %p5777_p2 }
  0x48   : > { %5785 = shalt.err (!%p5782_p4)
}
  0x49   : > { %s5786_s15 = scalar_lea.vmem %s259_s16, 128  ;;  %p5794_p3 = scmp.lt.s32.totalorder %s259_s16, %s259_s16 }
  0x4a   : > { %p5787_p6 = scmp.ne.s32.totalorder %s259_s16, %s5786_s15  ;;  %p5795_p5 = scmp.lt.s32.totalorder %s5786_s15, %s5786_s15 }
  0x4c   : > { %p5789_p8 = pnand %p5787_p6, %p6022_p12  ;;  %p5796_p7 = por %p5795_p5, %p5794_p3 }
  0x4e   : > { %p5790_p0 = pneg %p5789_p8 }
  0x50   : > { %p5797_p9 = pnand %p5796_p7, %p5790_p0 }
  0x52   : > { %5800 = shalt.err (!%p5797_p9)
}
  0x53   : > { %5584 = dma.hbm_to_vmem [thread:$0]  (!%p6006_p10), %s8414_s6, 128, %s259_s16, [#allocation9]  }
  0x54   : > { %s6084_s22 = sadd.s32 1, %s5905_s27   ;;  %s58_s14 = sadd.s32 1, %s5901_s26 }
  0x55   : > { %s55_s18 = ssub.s32 %s5905_s27, %s6084_s22  ;;  %p65_p11 = scmp.ne.s32.totalorder %s5901_s26, %s5897_s25 }
  0x56   : > { %p56_p12 = scmp.eq.s32.totalorder %s55_s18, 0  ;;  %p66_p13 = scmp.eq.s32.totalorder %s5905_s27, 0 }
  0x57   : > { %p5596_p2 = scmp.lt.s32.totalorder %s5905_s27, 4  ;;  %p8510_p4 = scmp.eq.s32.totalorder %s5979_s28, 3 }
  0x58   : > { %s6094_s19 = scalar_select %p56_p12, %s5901_s26, %s58_s14  }
  0x59   : > { %p67_p1 = por %p66_p13, %p65_p11  ;;  %p6098_p6 = por %p8510_p4, %p65_p11 }
  0x5a   : > { %s277_s21 = sand.u32 1, %s5901_s26   ;;  %s5307_s23 = sshll.u32 %s5905_s27, 9 }
  0x5b   : > { %s5255_s16 = sshll.u32 %s277_s21, 5  ;;  %s6107_s15 = scalar_lea.hbm %s8409_s1, %s5307_s23 }
  0x5c   : > { %s281_s13 = scalar_lea.vmem [#allocation2], %s5255_s16  ;;  %p6109_p10 = pnand %p5596_p2, %p67_p1 }
  0x5d   : > { %s288_s17 = sshll.u32 %s281_s13, 4  ;;  %s6115_s14 = scalar_lea.sflag [#allocation3], %s277_s21  ;;  %s6113_s17 = int_to_ptr.vmem [resolvable:$true] %s288_s17 }
  0x5e   : > { %s5801_s10 = scalar_lea.hbm %s6107_s15, 512  ;;  %p5803_p0 = pneg %p6109_p10 }
  0x5f   : > { %p5802_p8 = scmp.ne.s32.totalorder %s6107_s15, %s5801_s10  ;;  %s5806_s29 = scalar_lea.hbm %s8409_s1, 2048 }
  0x60   : > { %p5807_p7 = scmp.lt.u32.totalorder %s6107_s15, %s8409_s1  ;;  %p5808_p9 = scmp.lt.u32.totalorder %s5806_s29, %s5801_s10 }
  0x61   : > { %p5804_p3 = pnand %p5803_p0, %p5802_p8  ;;  %p5810_p11 = scmp.lt.u32.totalorder %s5801_s10, %s6107_s15 }
  0x62   : > { %p5809_p12 = por %p5808_p9, %p5807_p7 }
  0x63   : > { %p5805_p5 = pneg %p5804_p3 }
  0x64   : > { %p5811_p13 = por %p5810_p11, %p5809_p12 }
  0x66   : > { %p5812_p2 = pnand %p5811_p13, %p5805_p5 }
  0x68   : > { %5815 = shalt.err (!%p5812_p2)
}
  0x69   : > { %s5816_s21 = scalar_lea.vmem %s6113_s17, 512  ;;  %s5912_s23 = smov [#allocation2]  }
  0x6a   : > { %p5817_p1 = scmp.ne.s32.totalorder %s6113_s17, %s5816_s21  ;;  %s5821_s16 = sshll.u32 %s5912_s23, 4  ;;  %s5822_s16 = int_to_ptr.vmem [resolvable:$false] %s5821_s16 }
  0x6b   : > { %s5823_s11 = scalar_lea.vmem %s5822_s16, 1024  ;;  %p5824_p3 = scmp.lt.s32.totalorder %s6113_s17, %s5822_s16 }
  0x6c   : > { %p5819_p4 = pnand %p5817_p1, %p5803_p0  ;;  %p5825_p7 = scmp.lt.s32.totalorder %s5823_s11, %s5816_s21 }
  0x6e   : > { %p5820_p8 = pneg %p5819_p4  ;;  %p5826_p9 = por %p5825_p7, %p5824_p3 }
  0x70   : > { %p5827_p12 = pnand %p5826_p9, %p5820_p8 }
  0x72   : > { %5830 = shalt.err (!%p5827_p12)
}
  0x73   : > { %s8513_s10 = smov 128   ;;  %p8514_p0 = scmp.ne.s32.totalorder %s8507_s9, 0 }
  0x74   : > { %5588 = dma.hbm_to_vmem [thread:$0]  (!%p6109_p10), %s6107_s15, 512, %s6113_s17, %s6115_s14, %s8513_s10, %s8513_s10, %s5911_s12  }
  0x75   : > { %308 = sbr.rel (%p8514_p0) target bundleno = 3081 (0xc09), region = 48 }
  0x7c   : > { %s6149_s29 = sand.u32 1, %s5897_s25   ;;  %p8515_p5 = scmp.ne.s32.totalorder %s8505_s30, 0 }
  0x7d   : > { %s5259_s13 = sshll.u32 %s6149_s29, 5  ;;  %s311_s21 = scalar_lea.sflag [#allocation3], %s6149_s29 }
  0x7e   : > { %s6153_s23 = scalar_lea.vmem [#allocation2], %s5259_s13 }
  0x7f   : > { %5876 = dma.done.wait (%p8515_p5), %s311_s21, 512  }
  0x80   : > { %5878 = vsyncadd (%p8515_p5), %s311_s21, 4294966784  ;;  %p8516_p10 = scmp.eq.s32.totalorder %s5979_s28, 0 }
  0x82   : > { %5880 = dma.done.wait (%p8516_p10), [#allocation6], 576   ;;  %p8517_p11 = pmov %p8516_p10 }
  0x83   : > { %p8518_p13 = pmov %p8516_p10 }
  0x84   : > { %5882 = vsyncadd (%p8517_p11), [#allocation6], 4294966720 }
  0x85   : > { %5884 = dma.done.wait (%p8518_p13), [#allocation9], 128   ;;  %p8519_p2 = pmov %p8516_p10 }
  0x86   : > { %p367_p1 = scmp.lt.s32.totalorder %s5979_s28, 3  ;;  %v8420_v0 = vlaneseq  ;;  %vm860_vm0 = vcmask 1043456   ;;  %vm853_vm1 = vcmask 31744   ;;  %v848_v4 = vld [vmem:[#allocation5] sm:$0xf]  ;;  %v939_v8 = vld [vmem:[#allocation7] sm:$0xff] }
  0x87   : > { %5886 = vsyncadd (%p8519_p2), [#allocation9], 4294967168  ;;  %5374 = vmatprep.subr.msk.mxu0 %vm860_vm0, %v848_v4  ;;  %v6185_v7 = vld [vmem:[%s6153_s23] sm:$0xff]  ;;  %v940_v9 = vld [vmem:[#allocation7 + $0x8] sm:$0xff]  ;;  %vm947_vm2 = vcmask 261120   ;;  %vm1488_vm4 = vcmask 523264  }
  0x88   : > { %s6169_s9 = scalar_select %p367_p1, %s5979_s28, 3  ;;  %v6172_v1 = vshrl.u32 %v8420_v0, 7  ;;  %5375 = vmatpush3.msk.msra.mxu0 %vm860_vm0, %v848_v4  ;;  %v6190_v12 = vpack.c.bf16 %v940_v9, %v939_v8  ;;  %v1029_v13 = vld [vmem:[%s8413_s5] sm:$0xff]  ;;  %v1030_v14 = vld [vmem:[%s8413_s5 + $0x8] sm:$0xff]  ;;  %v6203_v16 = vld [vmem:[%s6153_s23 + $0x10] sm:$0xff] }
  0x89   : > { %v6198_v15 = vpack.c.bf16 %v1030_v14, %v1029_v13  ;;  %v941_v18 = vld [vmem:[#allocation7 + $0x10] sm:$0xff]  ;;  %v942_v19 = vld [vmem:[#allocation7 + $0x18] sm:$0xff]  ;;  %v6227_v27 = vld [vmem:[%s6153_s23 + $0x8] sm:$0xff]  ;;  %s5310_s18 = sshll.u32 %s5979_s28, 8  ;;  %s5110_s28 = scalar_lea.sflag [#allocation4], %s6149_s29 }
  0x8a   : > { %8520 = vst [vmem:[#allocation15_spill] sm:$0xff] %v6172_v1  ;;  %s5308_s30 = sshll.u32 %s6169_s9, 4  ;;  %v6181_v2 = vsub.s32 0, %v6172_v1  ;;  %v402_v3 = vsub.s32 1, %v6172_v1  ;;  %8522 = vst [vmem:[#allocation17_spill] sm:$0xff] %v6190_v12  ;;  %5488 = vmatprep.subr.bf16.mxu1 %v6190_v12  ;;  %v1031_v20 = vld [vmem:[%s8413_s5 + $0x10] sm:$0xff]  ;;  %v6212_v21 = vpack.c.bf16 %v942_v19, %v941_v18  ;;  %s8361_s13 = scalar_lea.hbm %s8415_s7, %s5310_s18 }
  0x8b   : > { %s371_s17 = scalar_lea.vmem %s8408_s0, %s5308_s30  ;;  %8523 = vst [vmem:[#allocation18_spill] sm:$0xff] %v6198_v15  ;;  %5496 = vmatprep.subr.bf16.mxu0 %v6198_v15  ;;  %5490 = vmatpush3.bf16.msra.mxu1 %v6190_v12  ;;  %v1032_v22 = vld [vmem:[%s8413_s5 + $0x18] sm:$0xff]  ;;  %v413_v25 = vsub.s32 2, %v6172_v1  ;;  %v424_v34 = vsub.s32 3, %v6172_v1  ;;  %v435_v39 = vsub.s32 4, %v6172_v1  ;;  %v446_v44 = vsub.s32 5, %v6172_v1 }
  0x8c   : > { %8521 = vst [vmem:[#allocation16_spill] sm:$0xff] %v6181_v2  ;;  %v846_v5 = vld [vmem:[%s371_s17] sm:$0xff]  ;;  %v847_v6 = vld [vmem:[%s371_s17 + $0x8] sm:$0xff]  ;;  %v403_v10 = vrot.slane %v6185_v7, %v402_v3  ;;  %v392_v11 = vrot.slane %v6185_v7, %v6181_v2  ;;  %v605_v17 = vrot.slane %v6203_v16, %v6181_v2  ;;  %8524 = vst [vmem:[#allocation19_spill] sm:$0xff] %v6212_v21  ;;  %5492 = vmatprep.subr.bf16.mxu1 %v6212_v21  ;;  %s7051_s17 = scalar_lea.vmem %s8410_s2, %s5308_s30  ;;  %s5914_s9 = smov 96  }
  0x8d   : > { %5376 = vmatprep.mubr.msk.f32.mxu0 %vm853_vm1, %v846_v5  ;;  %v6217_v23 = vpack.c.bf16 %v1032_v22, %v1031_v20  ;;  %v616_v24 = vrot.slane %v6203_v16, %v402_v3  ;;  %v414_v26 = vrot.slane %v6185_v7, %v413_v25  ;;  %v480_v28 = vrot.slane %v6227_v27, %v6181_v2  ;;  %v6234_v31 = vld [vmem:[%s6153_s23 + $0x18] sm:$0xff]  ;;  %v5270_v61 = vld [vmem:[#allocation8] ss:$0 sm:$0xff]  ;;  %s5263_s30 = sshll.u32 %s6149_s29, 4  ;;  %s5915_s12 = smov [#allocation10]  }
  0x8e   : > { %5377 = vmatmul.mubr.msk.f32.vlgmr.msra.gmra.mrb[0].mxu0 %vm853_vm1, %v847_v6  ;;  %405 = vbcast.lane.b32.xlu1 %v403_v10, 256  ;;  %v491_v29 = vrot.slane %v6227_v27, %v402_v3  ;;  %v627_v30 = vrot.slane %v6203_v16, %v413_v25  ;;  %v693_v32 = vrot.slane %v6234_v31, %v6181_v2  ;;  %v457_v49 = vsub.s32 6, %v6172_v1  ;;  %s366_s14 = scalar_lea.vmem [#allocation10], %s5263_s30  ;;  %s5835_s23 = sshll.u32 %s5915_s12, 4  ;;  %s5836_s23 = int_to_ptr.vmem [resolvable:$false] %s5835_s23 }
  0x8f   : > { %394 = vbcast.lane.b32.xlu0 %v392_v11, 256  ;;  %5498 = vmatpush3.bf16.msra.mxu0 %v6198_v15  ;;  %8525 = vst [vmem:[#allocation20_spill] sm:$0xff] %v6217_v23  ;;  %v704_v33 = vrot.slane %v6234_v31, %v402_v3  ;;  %v425_v35 = vrot.slane %v6185_v7, %v424_v34  ;;  %v468_v54 = vsub.s32 7, %v6172_v1  ;;  %s5123_s16 = sshll.u32 %s366_s14, 4  ;;  %s5837_s15 = scalar_lea.vmem %s5836_s23, 512  ;;  %s8363_s16 = int_to_ptr.vmem [resolvable:$true] %s5123_s16 }
  0x90   : > { %5500 = vmatprep.subr.bf16.mxu0 %v6217_v23  ;;  %5494 = vmatpush3.bf16.msra.mxu1 %v6212_v21  ;;  %v502_v36 = vrot.slane %v6227_v27, %v413_v25  ;;  %v638_v37 = vrot.slane %v6203_v16, %v424_v34  ;;  %v715_v38 = vrot.slane %v6234_v31, %v413_v25  ;;  %s5831_s21 = scalar_lea.vmem %s8363_s16, 256  ;;  %p5838_p7 = scmp.lt.s32.totalorder %s8363_s16, %s5836_s23 }
  0x91   : > { %v436_v40 = vrot.slane %v6185_v7, %v435_v39  ;;  %v513_v41 = vrot.slane %v6227_v27, %v424_v34  ;;  %v649_v42 = vrot.slane %v6203_v16, %v435_v39  ;;  %v726_v43 = vrot.slane %v6234_v31, %v424_v34  ;;  %p5832_p4 = scmp.ne.s32.totalorder %s8363_s16, %s5831_s21  ;;  %p5839_p9 = scmp.lt.s32.totalorder %s5837_s15, %s5831_s21 }
  0x92   : > { %409 = vbcast.lane.b32.xlu1 %v403_v10, 264  ;;  %v447_v45 = vrot.slane %v6185_v7, %v446_v44  ;;  %v524_v46 = vrot.slane %v6227_v27, %v435_v39  ;;  %v660_v47 = vrot.slane %v6203_v16, %v446_v44  ;;  %v737_v48 = vrot.slane %v6234_v31, %v435_v39 }
  0x93   : > { %398 = vbcast.lane.b32.xlu0 %v392_v11, 264  ;;  %5502 = vmatpush3.bf16.msra.mxu0 %v6217_v23  ;;  %v458_v50 = vrot.slane %v6185_v7, %v457_v49  ;;  %v535_v51 = vrot.slane %v6227_v27, %v446_v44  ;;  %v671_v52 = vrot.slane %v6203_v16, %v457_v49  ;;  %v5913_v39 = vmov 1966171168   ;;  %p5833_p8 = pnand %p5832_p4, %p6098_p6  ;;  %p5840_p12 = por %p5839_p9, %p5838_p7 }
  0x94   : > { %v748_v53 = vrot.slane %v6234_v31, %v446_v44  ;;  %v469_v55 = vrot.slane %v6185_v7, %v468_v54  ;;  %v546_v56 = vrot.slane %v6227_v27, %v457_v49  ;;  %v682_v57 = vrot.slane %v6203_v16, %v468_v54  ;;  %v5274_v44 = vld [vmem:[#allocation8 + $0x1] ss:$0 sm:$0xff] }
  0x95   : > { %v759_v58 = vrot.slane %v6234_v31, %v457_v49  ;;  %v557_v59 = vrot.slane %v6227_v27, %v468_v54  ;;  %v770_v60 = vrot.slane %v6234_v31, %v468_v54  ;;  %p5834_p3 = pneg %p5833_p8 }
  0x96   : > { %611 = vbcast.lane.b32.xlu1 %v605_v17, 264 }
  0x97   : > { %607 = vbcast.lane.b32.xlu0 %v605_v17, 256  ;;  %p5841_p0 = pnand %p5840_p12, %p5834_p3 }
  0x9a   : > { %622 = vbcast.lane.b32.xlu1 %v616_v24, 264 }
  0x9b   : > { %618 = vbcast.lane.b32.xlu0 %v616_v24, 256 }
  0x9e   : > { %420 = vbcast.lane.b32.xlu1 %v414_v26, 264 }
  0x9f   : > { %416 = vbcast.lane.b32.xlu0 %v414_v26, 256 }
  0xa2   : > { %486 = vbcast.lane.b32.xlu1 %v480_v28, 264 }
  0xa3   : > { %482 = vbcast.lane.b32.xlu0 %v480_v28, 256 }
  0xa6   : > { %497 = vbcast.lane.b32.xlu1 %v491_v29, 264 }
  0xa7   : > { %493 = vbcast.lane.b32.xlu0 %v491_v29, 256 }
  0xaa   : > { %633 = vbcast.lane.b32.xlu1 %v627_v30, 264 }
  0xab   : > { %629 = vbcast.lane.b32.xlu0 %v627_v30, 256 }
  0xae   : > { %699 = vbcast.lane.b32.xlu1 %v693_v32, 264 }
  0xaf   : > { %695 = vbcast.lane.b32.xlu0 %v693_v32, 256 }
  0xb2   : > { %710 = vbcast.lane.b32.xlu1 %v704_v33, 264 }
  0xb3   : > { %706 = vbcast.lane.b32.xlu0 %v704_v33, 256 }
  0xb6   : > { %431 = vbcast.lane.b32.xlu1 %v425_v35, 264 }
  0xb7   : > { %427 = vbcast.lane.b32.xlu0 %v425_v35, 256 }
  0xba   : > { %508 = vbcast.lane.b32.xlu1 %v502_v36, 264 }
  0xbb   : > { %504 = vbcast.lane.b32.xlu0 %v502_v36, 256 }
  0xbe   : > { %644 = vbcast.lane.b32.xlu1 %v638_v37, 264 }
  0xbf   : > { %640 = vbcast.lane.b32.xlu0 %v638_v37, 256 }
  0xc2   : > { %721 = vbcast.lane.b32.xlu1 %v715_v38, 264 }
  0xc3   : > { %717 = vbcast.lane.b32.xlu0 %v715_v38, 256 }
  0xc6   : > { %442 = vbcast.lane.b32.xlu1 %v436_v40, 264 }
  0xc7   : > { %438 = vbcast.lane.b32.xlu0 %v436_v40, 256  ;;  %v1116_v40 = vunpack.c.l.s4 %v5913_v39 }
  0xca   : > { %519 = vbcast.lane.b32.xlu1 %v513_v41, 264 }
  0xcb   : > { %515 = vbcast.lane.b32.xlu0 %v513_v41, 256 }
  0xce   : > { %655 = vbcast.lane.b32.xlu1 %v649_v42, 264 }
  0xcf   : > { %651 = vbcast.lane.b32.xlu0 %v649_v42, 256 }
  0xd2   : > { %732 = vbcast.lane.b32.xlu1 %v726_v43, 264 }
  0xd3   : > { %728 = vbcast.lane.b32.xlu0 %v726_v43, 256  ;;  %v1117_v43 = vunpack.c.0.s8 %v1116_v40 }
  0xd6   : > { %453 = vbcast.lane.b32.xlu1 %v447_v45, 264 }
  0xd7   : > { %449 = vbcast.lane.b32.xlu0 %v447_v45, 256  ;;  %v5277_v45 = vld [vmem:[#allocation8 + $0x2] ss:$0 sm:$0xff] }
  0xda   : > { %530 = vbcast.lane.b32.xlu1 %v524_v46, 264 }
  0xdb   : > { %526 = vbcast.lane.b32.xlu0 %v524_v46, 256  ;;  %v6325_v46 = vsub.s32 %v1117_v43, %v6172_v1 }
  0xdd   : > { %8526 = vst [vmem:[#allocation21_spill] sm:$0xff] %v6325_v46 }
  0xde   : > { %666 = vbcast.lane.b32.xlu1 %v660_v47, 264 }
  0xdf   : > { %662 = vbcast.lane.b32.xlu0 %v660_v47, 256 }
  0xe2   : > { %743 = vbcast.lane.b32.xlu1 %v737_v48, 264 }
  0xe3   : > { %739 = vbcast.lane.b32.xlu0 %v737_v48, 256 }
  0xe6   : > { %464 = vbcast.lane.b32.xlu1 %v458_v50, 264 }
  0xe7   : > { %460 = vbcast.lane.b32.xlu0 %v458_v50, 256 }
  0xea   : > { %541 = vbcast.lane.b32.xlu1 %v535_v51, 264 }
  0xeb   : > { %537 = vbcast.lane.b32.xlu0 %v535_v51, 256 }
  0xee   : > { %677 = vbcast.lane.b32.xlu1 %v671_v52, 264 }
  0xef   : > { %673 = vbcast.lane.b32.xlu0 %v671_v52, 256 }
  0xf2   : > { %754 = vbcast.lane.b32.xlu1 %v748_v53, 264 }
  0xf3   : > { %750 = vbcast.lane.b32.xlu0 %v748_v53, 256 }
  0xf6   : > { %475 = vbcast.lane.b32.xlu1 %v469_v55, 264 }
  0xf7   : > { %471 = vbcast.lane.b32.xlu0 %v469_v55, 256 }
  0xfa   : > { %552 = vbcast.lane.b32.xlu1 %v546_v56, 264 }
  0xfb   : > { %548 = vbcast.lane.b32.xlu0 %v546_v56, 256 }
  0xfe   : > { %688 = vbcast.lane.b32.xlu1 %v682_v57, 264 }
  0xff   : > { %684 = vbcast.lane.b32.xlu0 %v682_v57, 256 }
 0x100   : > { %v6270_v5 = vpop.permute.xlu1 %405 }
 0x101   : > { %v6272_v6 = vpop.permute.xlu0 %394 }
 0x102   : > { %765 = vbcast.lane.b32.xlu1 %v759_v58, 264 }
 0x103   : > { %761 = vbcast.lane.b32.xlu0 %v759_v58, 256 }
 0x104   : > { %v6274_v7 = vpop.permute.xlu1 %409 }
 0x105   : > { %v6276_v8 = vpop.permute.xlu0 %398 }
 0x106   : > { %563 = vbcast.lane.b32.xlu1 %v557_v59, 264 }
 0x107   : > { %559 = vbcast.lane.b32.xlu0 %v557_v59, 256 }
 0x108   : > { %v6278_v9 = vpop.permute.xlu1 %611 }
 0x109   : > { %v608_v10 = vpop.permute.xlu0 %607 }
 0x10a   : > { %776 = vbcast.lane.b32.xlu1 %v770_v60, 264 }
 0x10b   : > { %772 = vbcast.lane.b32.xlu0 %v770_v60, 256 }
 0x10c   : > { %v6280_v11 = vpop.permute.xlu1 %622 }
 0x10d   : > { %v6282_v13 = vpop.permute.xlu0 %618 }
 0x110   : > { %v6284_v14 = vpop.permute.xlu1 %420 }
 0x111   : > { %v6286_v16 = vpop.permute.xlu0 %416 }
 0x114   : > { %v487_v17 = vpop.permute.xlu1 %486 }
 0x115   : > { %v483_v18 = vpop.permute.xlu0 %482 }
 0x118   : > { %v6288_v19 = vpop.permute.xlu1 %497 }
 0x119   : > { %v6290_v20 = vpop.permute.xlu0 %493 }
 0x11c   : > { %v6292_v22 = vpop.permute.xlu1 %633 }
 0x11d   : > { %v6294_v24 = vpop.permute.xlu0 %629 }
 0x120   : > { %v700_v25 = vpop.permute.xlu1 %699 }
 0x121   : > { %v696_v26 = vpop.permute.xlu0 %695 }
 0x124   : > { %v6296_v27 = vpop.permute.xlu1 %710 }
 0x125   : > { %v6298_v28 = vpop.permute.xlu0 %706 }
 0x128   : > { %v6300_v29 = vpop.permute.xlu1 %431 }
 0x129   : > { %v6302_v30 = vpop.permute.xlu0 %427 }
 0x12c   : > { %v6304_v31 = vpop.permute.xlu1 %508 }
 0x12d   : > { %v6306_v32 = vpop.permute.xlu0 %504 }
 0x130   : > { %v6308_v33 = vpop.permute.xlu1 %644 }
 0x131   : > { %v6310_v34 = vpop.permute.xlu0 %640 }
 0x134   : > { %v6312_v35 = vpop.permute.xlu1 %721 }
 0x135   : > { %v6314_v36 = vpop.permute.xlu0 %717 }
 0x138   : > { %v6316_v37 = vpop.permute.xlu1 %442 }
 0x139   : > { %v6318_v38 = vpop.permute.xlu0 %438 }
 0x13c   : > { %v6320_v41 = vpop.permute.xlu1 %519 }
 0x13d   : > { %v6322_v42 = vpop.permute.xlu0 %515 }
 0x140   : > { %v6327_v47 = vpop.permute.xlu1 %655 }
 0x141   : > { %v6329_v48 = vpop.permute.xlu0 %651 }
 0x144   : > { %v6343_v59 = vpop.permute.xlu1 %732 }
 0x145   : > { %v6345_v60 = vpop.permute.xlu0 %728 }
 0x161   : > { %v5378_v62 = vpop.f32.mrb[0].mxu0 }
 0x162   : > { %v930_v63 = vpop.f32.mrb[1].mxu0  ;;  %v936_v4 = vadd.f32 %v5378_v62, %v5270_v61 }
 0x163   : > { %v931_v3 = vadd.f32 %v5270_v61, %v930_v63 }
 0x165   : > { %5387 = vmatprep.mubr.msk.f32.mxu1 %vm947_vm2, %v931_v3  ;;  %5398 = vmatprep.mubr.msk.f32.mxu0 %vm947_vm2, %v931_v3  ;;  %v6357_v3 = vld [vmem:[#allocation8 + $0x5] ss:$0 sm:$0xff] }
 0x166   : > { %5388 = vmatmul.mubr.msk.f32.vlgmr.msra.gmra.mrb[0].mxu1 %vm947_vm2, %v936_v4  ;;  %5399 = vmatmul.mubr.msk.f32.vlgmr.msra.gmra.mrb[2].mxu0 %vm947_vm2, %v936_v4  ;;  %v6359_v4 = vld [vmem:[#allocation8 + $0x6] ss:$0 sm:$0xff]  ;;  %v586_v40 = vmul.f32 %v6357_v3, %v487_v17  ;;  %v588_v23 = vmul.f32 %v6357_v3, %v6288_v19 }
 0x167   : > { %v799_v43 = vmul.f32 %v6359_v4, %v700_v25  ;;  %v585_v25 = vmul.f32 %v6357_v3, %v483_v18  ;;  %v803_v1 = vmul.f32 %v6359_v4, %v6312_v35 }
 0x239   : > { %v5389_v49 = vpop.f32.mrb[0].mxu1  ;;  %v5400_v50 = vpop.f32.mrb[2].mxu0 }
 0x23a   : > { %v6331_v51 = vadd.f32 %v5389_v49, %v5274_v44  ;;  %v6333_v52 = vadd.f32 %v5400_v50, %v5277_v45  ;;  %v1020_v53 = vpop.f32.mrb[1].mxu1  ;;  %v1103_v54 = vpop.f32.mrb[3].mxu0  ;;  %v782_v49 = vmul.f32 %v6359_v4, %v608_v10  ;;  %v6383_v10 = vadd.f32 %v799_v43, %v586_v40 }
 0x23b   : > { %v6335_v55 = vadd.f32 %v5274_v44, %v1020_v53  ;;  %v6337_v56 = vadd.f32 %v5277_v45, %v1103_v54  ;;  %v569_v45 = vmul.f32 %v6357_v3, %v6272_v6  ;;  %v6370_v50 = vpop.permute.xlu1 %453  ;;  %v6372_v53 = vpop.permute.xlu0 %449  ;;  %v570_v54 = vmul.f32 %v6357_v3, %v6276_v8 }
 0x23c   : > { %v1170_v57 = vrot.slane %v6333_v52, %v6325_v46  ;;  %8527 = vst [vmem:[#allocation22_spill] sm:$0xff] %v6383_v10  ;;  %v801_v43 = vmul.f32 %v6359_v4, %v6296_v27  ;;  %v800_v27 = vmul.f32 %v6359_v4, %v6298_v28 }
 0x23d   : > { %v5503_v58 = vpack.c.bf16 %v6331_v51, %v6335_v55  ;;  %v6352_v62 = vrot.slane %v6337_v56, %v6325_v46  ;;  %v6388_v21 = vadd.f32 %v782_v49, %v569_v45 }
 0x23e   : > { %v6348_v61 = vrot.slane %v1170_v57, %v6325_v46  ;;  %v1178_v44 = vcombine.high %v1170_v57, %v1170_v57  ;;  %v798_v57 = vmul.f32 %v6359_v4, %v696_v26  ;;  %v6420_v15 = vadd.f32 %v801_v43, %v588_v23 }
 0x23f   : > { %5504 = vmatprep.subr.bf16.mxu1 %v5503_v58  ;;  %v6363_v39 = vrot.slane %v6352_v62, %v6325_v46  ;;  %8528 = vst [vmem:[#allocation23_spill] sm:$0xff] %v6388_v21  ;;  %v6402_v45 = vpop.permute.xlu0 %526 }
 0x240   : > { %5506 = vmatpush3.bf16.msra.mxu1 %v5503_v58  ;;  %v1247_v63 = vrot.slane %v6348_v61, %v6181_v2  ;;  %v783_v58 = vmul.f32 %v6359_v4, %v6278_v9  ;;  %v6386_v0 = vrot.slane %v1178_v44, %v6325_v46  ;;  %v6398_v40 = vadd.f32 %v798_v57, %v585_v25  ;;  %v531_v44 = vpop.permute.xlu1 %530 }
 0x241   : > { %5512 = vmatprep.subr.bf16.mxu1 %v6190_v12  ;;  %v1215_v6 = vrot.slane %v6363_v39, %v6181_v2  ;;  %v1208_v57 = vcombine.high %v6348_v61, %v6348_v61  ;;  %8531 = vst [vmem:[#allocation26_spill] sm:$0xff] %v6420_v15 }
 0x242   : > { %v1309_v17 = vadd.f32 %v1247_v63, %v6331_v51  ;;  %v6392_v12 = vadd.f32 %v783_v58, %v570_v54  ;;  %v1308_v26 = vadd.f32 %v1247_v63, %v6335_v55  ;;  %8530 = vst [vmem:[#allocation25_spill] sm:$0xff] %v6398_v40  ;;  %v1163_v54 = vcombine.high %v6333_v52, %v6333_v52 }
 0x243   : > { %v1292_v8 = vadd.f32 %v1215_v6, %v6335_v55  ;;  %v1293_v9 = vadd.f32 %v1215_v6, %v6331_v51  ;;  %v6405_v6 = vld [vmem:[#allocation8 + $0x4] ss:$0 sm:$0xff]  ;;  %v1251_v63 = vrot.slane %v6386_v0, %v6181_v2  ;;  %v587_v58 = vmul.f32 %v6357_v3, %v6290_v20 }
 0x244   : > { %8529 = vst [vmem:[#allocation24_spill] sm:$0xff] %v6392_v12  ;;  %v1341_v18 = vadd.f32 %v1309_v17, %v6383_v10  ;;  %v1340_v17 = vadd.f32 %v1308_v26, %v6398_v40  ;;  %v6423_v20 = vrot.slane %v1163_v54, %v6325_v46  ;;  %v6426_v26 = vpop.permute.xlu1 %666  ;;  %v1255_v40 = vrot.slane %v1208_v57, %v6181_v2 }
 0x245   : > { %v1324_v49 = vadd.f32 %v1292_v8, %v6388_v21  ;;  %v1325_v25 = vadd.f32 %v1293_v9, %v6392_v12  ;;  %v1311_v28 = vadd.f32 %v1251_v63, %v6331_v51  ;;  %v6428_v9 = vpop.permute.xlu0 %662  ;;  %v6434_v54 = vadd.f32 %v800_v27, %v587_v58 }
 0x246   : > { %vm1373_vm3 = vcmp.gt.f32.partialorder %v1341_v18, 0.0  ;;  %v1405_v19 = vmul.f32 0.2, %v1341_v18  ;;  %vm1372_vm5 = vcmp.gt.f32.partialorder %v1340_v17, 0.0  ;;  %v1404_v10 = vmul.f32 0.2, %v1340_v17 }
 0x247   : > { %v1388_v52 = vmul.f32 0.2, %v1324_v49  ;;  %vm1356_vm6 = vcmp.gt.f32.partialorder %v1324_v49, 0.0  ;;  %vm1357_vm7 = vcmp.gt.f32.partialorder %v1325_v25, 0.0  ;;  %8532 = vst [vmem:[#allocation27_spill] sm:$0xff] %v6434_v54  ;;  %v590_v12 = vmul.f32 %v6357_v3, %v6304_v31 }
 0x248   : > { %v1437_v8 = vsel %vm1373_vm3, %v1341_v18, %v1405_v19  ;;  %v1436_v18 = vsel %vm1372_vm5, %v1340_v17, %v1404_v10  ;;  %v1389_v19 = vmul.f32 0.2, %v1325_v25  ;;  %v1343_v10 = vadd.f32 %v1311_v28, %v6420_v15 }
 0x249   : > { %v1473_v21 = vmul.f32 %v6405_v6, %v1437_v8  ;;  %v1310_v8 = vadd.f32 %v1251_v63, %v6335_v55  ;;  %v1472_v23 = vmul.f32 %v6405_v6, %v1436_v18  ;;  %v1420_v43 = vsel %vm1356_vm6, %v1324_v49, %v1388_v52  ;;  %v740_v28 = vpop.permute.xlu0 %739 }
 0x24a   : > { %v1421_v57 = vsel %vm1357_vm7, %v1325_v25, %v1389_v19  ;;  %v6447_v58 = vrot.slane %v6423_v20, %v6325_v46  ;;  %v1407_v31 = vmul.f32 0.2, %v1343_v10  ;;  %v1313_v35 = vadd.f32 %v1255_v40, %v6331_v51  ;;  %v744_v25 = vpop.permute.xlu1 %743 }
 0x24b   : > { %v1540_v61 = vsel %vm1488_vm4, %v1473_v21, 0.0  ;;  %v1537_v17 = vsel %vm1488_vm4, %v1472_v23, 0.0  ;;  %v1636_v63 = vsel %vm947_vm2, %v1473_v21, 0.0  ;;  %v1342_v49 = vadd.f32 %v1310_v8, %v6434_v54 }
 0x24c   : > { %1541 = vadd.xlane.f32.xlu0 %v1540_v61  ;;  %1538 = vadd.xlane.f32.xlu1 %v1537_v17  ;;  %v1456_v61 = vmul.f32 %v6405_v6, %v1420_v43  ;;  %v589_v27 = vmul.f32 %v6357_v3, %v6306_v32  ;;  %v6452_v52 = vadd.f32 %v803_v1, %v590_v12  ;;  %vm1375_vm8 = vcmp.gt.f32.partialorder %v1343_v10, 0.0 }
 0x24d   : > { %v802_v21 = vmul.f32 %v6359_v4, %v6314_v36  ;;  %v594_v18 = vmul.f32 %v6357_v3, %v531_v44  ;;  %v807_v19 = vmul.f32 %v6359_v4, %v744_v25  ;;  %v1633_v8 = vsel %vm947_vm2, %v1472_v23, 0.0 }
 0x24e   : > { %8533 = vst [vmem:[#allocation28_spill] sm:$0xff] %v6452_v52  ;;  %v1457_v43 = vmul.f32 %v6405_v6, %v1421_v57  ;;  %v1129_v17 = vcombine.high %v6352_v62, %v6352_v62  ;;  %v1489_v1 = vsel %vm1488_vm4, %v1456_v61, 0.0  ;;  %v1406_v12 = vmul.f32 0.2, %v1342_v49 }
 0x24f   : > { %v1312_v32 = vadd.f32 %v1255_v40, %v6335_v55  ;;  %v1263_v36 = vrot.slane %v6447_v58, %v6181_v2  ;;  %vm1374_vm9 = vcmp.gt.f32.partialorder %v1342_v49, 0.0  ;;  %v1439_v44 = vsel %vm1375_vm8, %v1343_v10, %v1407_v31 }
 0x250   : > { %1637 = vadd.xlane.f32.xlu0 %v1636_v63  ;;  %1634 = vadd.xlane.f32.xlu1 %v1633_v8  ;;  %v1345_v63 = vadd.f32 %v1313_v35, %v6452_v52  ;;  %v6467_v23 = vadd.f32 %v802_v21, %v589_v27  ;;  %v593_v57 = vmul.f32 %v6357_v3, %v6402_v45  ;;  %v1492_v25 = vsel %vm1488_vm4, %v1457_v43, 0.0  ;;  %v6473_v8 = vpop.permute.xlu0 %460 }
 0x251   : > { %v806_v62 = vmul.f32 %v6359_v4, %v740_v28  ;;  %v1588_v40 = vsel %vm947_vm2, %v1457_v43, 0.0  ;;  %v1438_v15 = vsel %vm1374_vm9, %v1342_v49, %v1406_v12  ;;  %v6478_v31 = vadd.f32 %v807_v19, %v594_v18 }
 0x252   : > { %8534 = vst [vmem:[#allocation29_spill] sm:$0xff] %v6467_v23  ;;  %v1344_v10 = vadd.f32 %v1312_v32, %v6467_v23  ;;  %v6481_v35 = vrot.slane %v1129_v17, %v6325_v46  ;;  %v1409_v45 = vmul.f32 0.2, %v1345_v63  ;;  %v1317_v27 = vadd.f32 %v1263_v36, %v6331_v51 }
 0x253   : > { %8535 = vst [vmem:[#allocation30_spill] sm:$0xff] %v6478_v31  ;;  %vm1377_vm10 = vcmp.gt.f32.partialorder %v1345_v63, 0.0  ;;  %v1585_v21 = vsel %vm947_vm2, %v1456_v61, 0.0  ;;  %v1474_v28 = vmul.f32 %v6405_v6, %v1438_v15  ;;  %v6486_v43 = vadd.f32 %v806_v62, %v593_v57  ;;  %v6495_v15 = vpop.permute.xlu1 %464 }
 0x254   : > { %1490 = vadd.xlane.f32.xlu0 %v1489_v1  ;;  %1493 = vadd.xlane.f32.xlu1 %v1492_v25  ;;  %v1475_v1 = vmul.f32 %v6405_v6, %v1439_v44  ;;  %v1408_v12 = vmul.f32 0.2, %v1344_v10  ;;  %v1316_v18 = vadd.f32 %v1263_v36, %v6335_v55  ;;  %v1219_v19 = vrot.slane %v6481_v35, %v6181_v2  ;;  %v6497_v44 = vpop.permute.xlu0 %537 }
 0x255   : > { %8536 = vst [vmem:[#allocation31_spill] sm:$0xff] %v6486_v43  ;;  %vm1376_vm11 = vcmp.gt.f32.partialorder %v1344_v10, 0.0  ;;  %v1441_v17 = vsel %vm1377_vm10, %v1345_v63, %v1409_v45  ;;  %v1349_v32 = vadd.f32 %v1317_v27, %v6478_v31  ;;  %v571_v61 = vmul.f32 %v6357_v3, %v6270_v5 }
 0x256   : > { %v1546_v49 = vsel %vm1488_vm4, %v1475_v1, 0.0  ;;  %v784_v57 = vmul.f32 %v6359_v4, %v6282_v13  ;;  %v1114_v36 = vcombine.high %v6337_v56, %v6337_v56  ;;  %v1159_v62 = vcombine.high %v6363_v39, %v6363_v39 }
 0x257   : > { %v1543_v63 = vsel %vm1488_vm4, %v1474_v28, 0.0  ;;  %v1642_v25 = vsel %vm947_vm2, %v1475_v1, 0.0  ;;  %v1477_v5 = vmul.f32 %v6405_v6, %v1441_v17  ;;  %v1348_v45 = vadd.f32 %v1316_v18, %v6486_v43 }
 0x258   : > { %1589 = vadd.xlane.f32.xlu0 %v1588_v40  ;;  %1586 = vadd.xlane.f32.xlu1 %v1585_v21  ;;  %v1440_v40 = vsel %vm1376_vm11, %v1344_v10, %v1408_v12  ;;  %v1413_v27 = vmul.f32 0.2, %v1349_v32  ;;  %v1294_v13 = vadd.f32 %v1219_v19, %v6335_v55  ;;  %v572_v56 = vmul.f32 %v6357_v3, %v6274_v7  ;;  %v6521_v12 = vpop.permute.xlu1 %541  ;;  %v6523_v18 = vpop.permute.xlu0 %673 }
 0x259   : > { %v785_v39 = vmul.f32 %v6359_v4, %v6280_v11  ;;  %vm1381_vm12 = vcmp.gt.f32.partialorder %v1349_v32, 0.0  ;;  %v6514_v21 = vadd.f32 %v784_v57, %v571_v61  ;;  %v6517_v1 = vrot.slane %v1114_v36, %v6325_v46 }
 0x25a   : > { %v1639_v10 = vsel %vm947_vm2, %v1474_v28, 0.0  ;;  %v1223_v17 = vrot.slane %v1159_v62, %v6181_v2  ;;  %v1552_v7 = vsel %vm1488_vm4, %v1477_v5, 0.0  ;;  %v1412_v11 = vmul.f32 0.2, %v1348_v45 }
 0x25b   : > { %8537 = vst [vmem:[#allocation32_spill] sm:$0xff] %v6514_v21  ;;  %vm1380_vm13 = vcmp.gt.f32.partialorder %v1348_v45, 0.0  ;;  %v1445_v61 = vsel %vm1381_vm12, %v1349_v32, %v1413_v27  ;;  %v1326_v57 = vadd.f32 %v1294_v13, %v6514_v21  ;;  %v1295_v36 = vadd.f32 %v1219_v19, %v6331_v51 }
 0x25c   : > { %1547 = vadd.xlane.f32.xlu0 %v1546_v49  ;;  %1544 = vadd.xlane.f32.xlu1 %v1543_v63  ;;  %v1476_v49 = vmul.f32 %v6405_v6, %v1440_v40  ;;  %v573_v28 = vmul.f32 %v6357_v3, %v6286_v16  ;;  %v786_v63 = vmul.f32 %v6359_v4, %v6294_v24  ;;  %v1648_v32 = vsel %vm947_vm2, %v1477_v5, 0.0  ;;  %v6552_v5 = vpop.permute.xlu0 %750 }
 0x25d   : > { %v6537_v62 = vrot.slane %v6517_v1, %v6325_v46  ;;  %v1444_v27 = vsel %vm1380_vm13, %v1348_v45, %v1412_v11  ;;  %v1481_v19 = vmul.f32 %v6405_v6, %v1445_v61  ;;  %v1296_v13 = vadd.f32 %v1223_v17, %v6335_v55 }
 0x25e   : > { %v1549_v40 = vsel %vm1488_vm4, %v1476_v49, 0.0  ;;  %v1390_v16 = vmul.f32 0.2, %v1326_v57  ;;  %vm1358_vm14 = vcmp.gt.f32.partialorder %v1326_v57, 0.0  ;;  %v577_v45 = vmul.f32 %v6357_v3, %v6318_v38 }
 0x25f   : > { %v790_v11 = vmul.f32 %v6359_v4, %v6329_v48  ;;  %v1645_v61 = vsel %vm947_vm2, %v1476_v49, 0.0  ;;  %v1297_v38 = vadd.f32 %v1223_v17, %v6331_v51  ;;  %v578_v48 = vmul.f32 %v6357_v3, %v6316_v37 }
 0x260   : > { %1643 = vadd.xlane.f32.xlu0 %v1642_v25  ;;  %1640 = vadd.xlane.f32.xlu1 %v1639_v10  ;;  %v6533_v25 = vadd.f32 %v785_v39, %v572_v56  ;;  %v574_v56 = vmul.f32 %v6357_v3, %v6284_v14  ;;  %v787_v39 = vmul.f32 %v6359_v4, %v6292_v22  ;;  %v1660_v17 = vsel %vm947_vm2, %v1481_v19, 0.0 }
 0x261   : > { %v6548_v10 = vadd.f32 %v786_v63, %v573_v28  ;;  %v1480_v14 = vmul.f32 %v6405_v6, %v1444_v27  ;;  %v1231_v22 = vrot.slane %v6537_v62, %v6181_v2  ;;  %v1422_v63 = vsel %vm1358_vm14, %v1326_v57, %v1390_v16 }
 0x262   : > { %8538 = vst [vmem:[#allocation33_spill] sm:$0xff] %v6533_v25  ;;  %v1327_v24 = vadd.f32 %v1295_v36, %v6533_v25  ;;  %v1564_v36 = vsel %vm1488_vm4, %v1481_v19, 0.0  ;;  %v6569_v49 = vadd.f32 %v790_v11, %v577_v45  ;;  %v1210_v27 = vcombine.high %v6386_v0, %v6386_v0 }
 0x263   : > { %8539 = vst [vmem:[#allocation34_spill] sm:$0xff] %v6548_v10  ;;  %v1328_v28 = vadd.f32 %v1296_v13, %v6548_v10  ;;  %v6576_v13 = vpop.permute.xlu0 %471  ;;  %v1458_v57 = vmul.f32 %v6405_v6, %v1422_v63  ;;  %v791_v37 = vmul.f32 %v6359_v4, %v6327_v47  ;;  %v591_v45 = vmul.f32 %v6357_v3, %v6322_v42 }
 0x264   : > { %1553 = vadd.xlane.f32.xlu0 %v1552_v7  ;;  %1550 = vadd.xlane.f32.xlu1 %v1549_v40  ;;  %v6550_v7 = vpop.permute.xlu1 %677  ;;  %v1391_v40 = vmul.f32 0.2, %v1327_v24  ;;  %vm1359_vm15 = vcmp.gt.f32.partialorder %v1327_v24, 0.0  ;;  %8541 = vst [vmem:[#allocation36_spill] sm:$0xff] %v6569_v49  ;;  %v804_v11 = vmul.f32 %v6359_v4, %v6345_v60  ;;  %v1179_v19 = vcombine.high %v6423_v20, %v6423_v20 }
 0x265   : > { %v1392_v16 = vmul.f32 0.2, %v1328_v28  ;;  %vm1360_vm0 = vcmp.gt.f32.partialorder %v1328_v28, 0.0  ;;  %v1657_v63 = vsel %vm947_vm2, %v1480_v14, 0.0  ;;  %v1495_v47 = vsel %vm1488_vm4, %v1458_v57, 0.0 }
 0x266   : > { %v1423_v0 = vsel %vm1359_vm15, %v1327_v24, %v1391_v40  ;;  %v1301_v60 = vadd.f32 %v1231_v22, %v6331_v51 }
 0x267   : > { %v1459_v24 = vmul.f32 %v6405_v6, %v1423_v0  ;;  %v549_v20 = vpop.permute.xlu0 %548  ;;  %v805_v0 = vmul.f32 %v6359_v4, %v6343_v59 }
 0x268   : > { %1649 = vadd.xlane.f32.xlu0 %v1648_v32  ;;  %1646 = vadd.xlane.f32.xlu1 %v1645_v61  ;;  %v6565_v32 = vadd.f32 %v787_v39, %v574_v56  ;;  %v1561_v61 = vsel %vm1488_vm4, %v1480_v14, 0.0  ;;  %v6574_v25 = vpop.permute.xlu1 %754  ;;  %v1300_v56 = vadd.f32 %v1231_v22, %v6335_v55  ;;  %v592_v14 = vmul.f32 %v6357_v3, %v6320_v41 }
 0x269   : > { %v1594_v59 = vsel %vm947_vm2, %v1459_v24, 0.0 }
 0x26a   : > { %8540 = vst [vmem:[#allocation35_spill] sm:$0xff] %v6565_v32  ;;  %v1329_v39 = vadd.f32 %v1297_v38, %v6565_v32  ;;  %v1332_v40 = vadd.f32 %v1300_v56, %v6569_v49  ;;  %v6595_v38 = vadd.f32 %v791_v37, %v578_v48  ;;  %v6607_v48 = vadd.f32 %v804_v11, %v591_v45 }
 0x26b   : > { %v1498_v56 = vsel %vm1488_vm4, %v1459_v24, 0.0  ;;  %v808_v45 = vmul.f32 %v6359_v4, %v6552_v5 }
 0x26c   : > { %1565 = vadd.xlane.f32.xlu0 %v1564_v36  ;;  %1562 = vadd.xlane.f32.xlu1 %v1561_v61  ;;  %v1259_v36 = vrot.slane %v1210_v27, %v6181_v2  ;;  %v1424_v61 = vsel %vm1360_vm0, %v1328_v28, %v1392_v16  ;;  %8542 = vst [vmem:[#allocation37_spill] sm:$0xff] %v6595_v38  ;;  %v1393_v42 = vmul.f32 0.2, %v1329_v39  ;;  %vm1361_vm1 = vcmp.gt.f32.partialorder %v1329_v39, 0.0 }
 0x26d   : > { %v6603_v27 = vrot.slane %v1179_v19, %v6325_v46  ;;  %v1591_v28 = vsel %vm947_vm2, %v1458_v57, 0.0  ;;  %v1460_v16 = vmul.f32 %v6405_v6, %v1424_v61  ;;  %8543 = vst [vmem:[#allocation38_spill] sm:$0xff] %v6607_v48  ;;  %v1396_v22 = vmul.f32 0.2, %v1332_v40  ;;  %v6621_v61 = vpop.permute.xlu0 %684 }
 0x26e   : > { %v1314_v37 = vadd.f32 %v1259_v36, %v6335_v55  ;;  %vm1364_vm3 = vcmp.gt.f32.partialorder %v1332_v40, 0.0  ;;  %v1425_v41 = vsel %vm1361_vm1, %v1329_v39, %v1393_v42  ;;  %v1333_v19 = vadd.f32 %v1301_v60, %v6595_v38 }
 0x26f   : > { %v595_v57 = vmul.f32 %v6357_v3, %v6497_v44  ;;  %v1267_v11 = vrot.slane %v6603_v27, %v6181_v2  ;;  %v1428_v39 = vsel %vm1364_vm3, %v1332_v40, %v1396_v22  ;;  %v1461_v42 = vmul.f32 %v6405_v6, %v1425_v41 }
 0x270   : > { %1661 = vadd.xlane.f32.xlu0 %v1660_v17  ;;  %1658 = vadd.xlane.f32.xlu1 %v1657_v63  ;;  %v6598_v17 = vpop.permute.xlu1 %475  ;;  %v1501_v63 = vsel %vm1488_vm4, %v1460_v16, 0.0  ;;  %v1346_v60 = vadd.f32 %v1314_v37, %v6607_v48  ;;  %v6626_v44 = vadd.f32 %v805_v0, %v592_v14  ;;  %v1397_v5 = vmul.f32 0.2, %v1333_v19 }
 0x271   : > { %vm1365_vm5 = vcmp.gt.f32.partialorder %v1333_v19, 0.0  ;;  %v1597_v24 = vsel %vm947_vm2, %v1460_v16, 0.0  ;;  %v1464_v40 = vmul.f32 %v6405_v6, %v1428_v39  ;;  %v6635_v22 = vadd.f32 %v808_v45, %v595_v57  ;;  %v762_v16 = vpop.permute.xlu0 %761 }
 0x272   : > { %8544 = vst [vmem:[#allocation39_spill] sm:$0xff] %v6626_v44  ;;  %v1504_v14 = vsel %vm1488_vm4, %v1461_v42, 0.0  ;;  %v1410_v37 = vmul.f32 0.2, %v1346_v60  ;;  %v1318_v0 = vadd.f32 %v1267_v11, %v6335_v55  ;;  %vm1378_vm6 = vcmp.gt.f32.partialorder %v1346_v60, 0.0 }
 0x273   : > { %8545 = vst [vmem:[#allocation40_spill] sm:$0xff] %v6635_v22  ;;  %v597_v57 = vmul.f32 %v6357_v3, %v549_v20  ;;  %v1513_v39 = vsel %vm1488_vm4, %v1464_v40, 0.0  ;;  %v1319_v20 = vadd.f32 %v1267_v11, %v6331_v51 }
 0x274   : > { %1496 = vadd.xlane.f32.xlu0 %v1495_v47  ;;  %1592 = vadd.xlane.f32.xlu1 %v1591_v28  ;;  %v553_v47 = vpop.permute.xlu1 %552  ;;  %v1315_v28 = vadd.f32 %v1259_v36, %v6331_v51  ;;  %v809_v36 = vmul.f32 %v6359_v4, %v6574_v25  ;;  %v1442_v25 = vsel %vm1378_vm6, %v1346_v60, %v1410_v37 }
 0x278   : > { %1499 = vadd.xlane.f32.xlu0 %v1498_v56  ;;  %1502 = vadd.xlane.f32.xlu1 %v1501_v63  ;;  %v596_v56 = vmul.f32 %v6357_v3, %v6521_v12  ;;  %v1209_v63 = vcombine.high %v6447_v58, %v6447_v58  ;;  %v1429_v12 = vsel %vm1365_vm5, %v1333_v19, %v1397_v5  ;;  %v6642_v41 = vpop.permute.xlu1 %688 }
 0x279   : > { %v1347_v58 = vadd.f32 %v1315_v28, %v6626_v44  ;;  %v1350_v19 = vadd.f32 %v1318_v0, %v6635_v22 }
 0x27a   : > { %v1271_v45 = vrot.slane %v1209_v63, %v6181_v2  ;;  %v6651_v5 = vadd.f32 %v809_v36, %v596_v56  ;;  %v598_v63 = vmul.f32 %v6357_v3, %v553_v47 }
 0x27b   : > { %v1411_v28 = vmul.f32 0.2, %v1347_v58  ;;  %vm1379_vm7 = vcmp.gt.f32.partialorder %v1347_v58, 0.0  ;;  %v1414_v36 = vmul.f32 0.2, %v1350_v19  ;;  %vm1382_vm8 = vcmp.gt.f32.partialorder %v1350_v19, 0.0 }
 0x27c   : > { %1595 = vadd.xlane.f32.xlu0 %v1594_v59  ;;  %1598 = vadd.xlane.f32.xlu1 %v1597_v24  ;;  %v810_v59 = vmul.f32 %v6359_v4, %v762_v16  ;;  %v1600_v24 = vsel %vm947_vm2, %v1461_v42, 0.0  ;;  %8546 = vst [vmem:[#allocation41_spill] sm:$0xff] %v6651_v5  ;;  %v1161_v16 = vcombine.high %v6481_v35, %v6481_v35  ;;  %v766_v60 = vpop.permute.xlu1 %765 }
 0x27d   : > { %v1478_v42 = vmul.f32 %v6405_v6, %v1442_v25  ;;  %v1320_v37 = vadd.f32 %v1271_v45, %v6335_v55  ;;  %v811_v11 = vmul.f32 %v6359_v4, %v766_v60  ;;  %v1443_v47 = vsel %vm1379_vm7, %v1347_v58, %v1411_v28 }
 0x27e   : > { %v6660_v0 = vadd.f32 %v810_v59, %v597_v57  ;;  %v1351_v35 = vadd.f32 %v1319_v20, %v6651_v5  ;;  %v1446_v25 = vsel %vm1382_vm8, %v1350_v19, %v1414_v36  ;;  %v1321_v60 = vadd.f32 %v1271_v45, %v6331_v51 }
 0x27f   : > { %v6673_v58 = vadd.f32 %v811_v11, %v598_v63  ;;  %v788_v20 = vmul.f32 %v6359_v4, %v6310_v34  ;;  %v1482_v19 = vmul.f32 %v6405_v6, %v1446_v25  ;;  %v576_v34 = vmul.f32 %v6357_v3, %v6300_v29 }
 0x280   : > { %1505 = vadd.xlane.f32.xlu0 %v1504_v14  ;;  %1514 = vadd.xlane.f32.xlu1 %v1513_v39  ;;  %v1465_v14 = vmul.f32 %v6405_v6, %v1429_v12  ;;  %v1609_v39 = vsel %vm947_vm2, %v1464_v40, 0.0  ;;  %8547 = vst [vmem:[#allocation42_spill] sm:$0xff] %v6660_v0  ;;  %v1130_v40 = vcombine.high %v6517_v1, %v6517_v1  ;;  %v1415_v28 = vmul.f32 0.2, %v1351_v35 }
 0x281   : > { %v1227_v12 = vrot.slane %v1161_v16, %v6181_v2  ;;  %v1352_v57 = vadd.f32 %v1320_v37, %v6660_v0  ;;  %8548 = vst [vmem:[#allocation43_spill] sm:$0xff] %v6673_v58  ;;  %v575_v1 = vmul.f32 %v6357_v3, %v6302_v30  ;;  %vm1383_vm9 = vcmp.gt.f32.partialorder %v1351_v35, 0.0  ;;  %v8560_v0 = vld [vmem:[#allocation15_spill] sm:$0xff] }
 0x282   : > { %v1516_v56 = vsel %vm1488_vm4, %v1465_v14, 0.0  ;;  %v1612_v59 = vsel %vm947_vm2, %v1465_v14, 0.0  ;;  %v6680_v16 = vrot.slane %v1130_v40, %v6325_v46  ;;  %v1651_v14 = vsel %vm947_vm2, %v1478_v42, 0.0 }
 0x283   : > { %v1416_v63 = vmul.f32 0.2, %v1352_v57  ;;  %v1298_v37 = vadd.f32 %v1227_v12, %v6335_v55  ;;  %vm1384_vm10 = vcmp.gt.f32.partialorder %v1352_v57, 0.0  ;;  %v1447_v30 = vsel %vm1383_vm9, %v1351_v35, %v1415_v28 }
 0x284   : > { %1601 = vadd.xlane.f32.xlu0 %v1600_v24  ;;  %1610 = vadd.xlane.f32.xlu1 %v1609_v39  ;;  %v1555_v24 = vsel %vm1488_vm4, %v1478_v42, 0.0  ;;  %v1479_v39 = vmul.f32 %v6405_v6, %v1443_v47  ;;  %v789_v36 = vmul.f32 %v6359_v4, %v6308_v33  ;;  %v6691_v42 = vadd.f32 %v788_v20, %v575_v1 }
 0x285   : > { %v579_v11 = vmul.f32 %v6357_v3, %v6372_v53  ;;  %v792_v47 = vmul.f32 %v6359_v4, %v6428_v9  ;;  %v1235_v40 = vrot.slane %v6680_v16, %v6181_v2  ;;  %v1448_v29 = vsel %vm1384_vm10, %v1352_v57, %v1416_v63  ;;  %v560_v63 = vpop.permute.xlu0 %559 }
 0x286   : > { %v1558_v45 = vsel %vm1488_vm4, %v1479_v39, 0.0  ;;  %8549 = vst [vmem:[#allocation44_spill] sm:$0xff] %v6691_v42  ;;  %v1654_v35 = vsel %vm947_vm2, %v1479_v39, 0.0  ;;  %v1330_v33 = vadd.f32 %v1298_v37, %v6691_v42  ;;  %v1299_v53 = vadd.f32 %v1227_v12, %v6331_v51 }
 0x287   : > { %v580_v9 = vmul.f32 %v6357_v3, %v6370_v50  ;;  %v1160_v28 = vcombine.high %v6537_v62, %v6537_v62  ;;  %v1663_v39 = vsel %vm947_vm2, %v1482_v19, 0.0  ;;  %v1484_v57 = vmul.f32 %v6405_v6, %v1448_v29 }
 0x288   : > { %1517 = vadd.xlane.f32.xlu0 %v1516_v56  ;;  %1556 = vadd.xlane.f32.xlu1 %v1555_v24  ;;  %v1353_v56 = vadd.f32 %v1321_v60, %v6673_v58  ;;  %v1567_v24 = vsel %vm1488_vm4, %v1482_v19, 0.0  ;;  %v6704_v60 = vadd.f32 %v789_v36, %v576_v34  ;;  %v6712_v1 = vadd.f32 %v792_v47, %v579_v11 }
 0x289   : > { %v1302_v12 = vadd.f32 %v1235_v40, %v6335_v55  ;;  %vm1362_vm12 = vcmp.gt.f32.partialorder %v1330_v33, 0.0  ;;  %v581_v19 = vmul.f32 %v6357_v3, %v6473_v8  ;;  %v794_v37 = vmul.f32 %v6359_v4, %v6523_v18 }
 0x28a   : > { %v1417_v25 = vmul.f32 0.2, %v1353_v56  ;;  %8550 = vst [vmem:[#allocation45_spill] sm:$0xff] %v6704_v60  ;;  %vm1385_vm11 = vcmp.gt.f32.partialorder %v1353_v56, 0.0  ;;  %8551 = vst [vmem:[#allocation46_spill] sm:$0xff] %v6712_v1  ;;  %v1331_v62 = vadd.f32 %v1299_v53, %v6704_v60  ;;  %v1573_v34 = vsel %vm1488_vm4, %v1484_v57, 0.0  ;;  %v773_v53 = vpop.permute.xlu0 %772 }
 0x28b   : > { %v1303_v8 = vadd.f32 %v1235_v40, %v6331_v51  ;;  %v582_v18 = vmul.f32 %v6357_v3, %v6495_v15  ;;  %v1669_v29 = vsel %vm947_vm2, %v1484_v57, 0.0  ;;  %v795_v15 = vmul.f32 %v6359_v4, %v6550_v7 }
 0x28c   : > { %1613 = vadd.xlane.f32.xlu0 %v1612_v59  ;;  %1652 = vadd.xlane.f32.xlu1 %v1651_v14  ;;  %v1483_v59 = vmul.f32 %v6405_v6, %v1447_v30  ;;  %v1394_v14 = vmul.f32 0.2, %v1330_v33  ;;  %v1449_v50 = vsel %vm1385_vm11, %v1353_v56, %v1417_v25  ;;  %v1239_v30 = vrot.slane %v1160_v28, %v6181_v2  ;;  %v564_v25 = vpop.permute.xlu1 %563 }
 0x28d   : > { %v1485_v11 = vmul.f32 %v6405_v6, %v1449_v50  ;;  %v1334_v56 = vadd.f32 %v1302_v12, %v6712_v1  ;;  %vm1363_vm13 = vcmp.gt.f32.partialorder %v1331_v62, 0.0  ;;  %v599_v57 = vmul.f32 %v6357_v3, %v560_v63 }
 0x28e   : > { %v1570_v20 = vsel %vm1488_vm4, %v1483_v59, 0.0  ;;  %v1666_v36 = vsel %vm947_vm2, %v1483_v59, 0.0  ;;  %v1304_v40 = vadd.f32 %v1239_v30, %v6335_v55  ;;  %v812_v12 = vmul.f32 %v6359_v4, %v773_v53 }
 0x28f   : > { %v1398_v28 = vmul.f32 0.2, %v1334_v56  ;;  %vm1366_vm14 = vcmp.gt.f32.partialorder %v1334_v56, 0.0  ;;  %v1672_v50 = vsel %vm947_vm2, %v1485_v11, 0.0  ;;  %v8559_v58 = vlaneseq }
 0x290   : > { %1559 = vadd.xlane.f32.xlu0 %v1558_v45  ;;  %1568 = vadd.xlane.f32.xlu1 %v1567_v24  ;;  %v793_v45 = vmul.f32 %v6359_v4, %v6426_v26  ;;  %v1426_v26 = vsel %vm1362_vm12, %v1330_v33, %v1394_v14  ;;  %v1395_v24 = vmul.f32 0.2, %v1331_v62  ;;  %v6737_v33 = vadd.f32 %v794_v37, %v581_v19 }
 0x291   : > { %v1462_v59 = vmul.f32 %v6405_v6, %v1426_v26  ;;  %v1430_v7 = vsel %vm1366_vm14, %v1334_v56, %v1398_v28  ;;  %v6753_v37 = vadd.f32 %v795_v15, %v582_v18  ;;  %v777_v26 = vpop.permute.xlu1 %776  ;;  %v6761_v56 = vadd.f32 %v812_v12, %v599_v57 }
 0x292   : > { %v6728_v47 = vadd.f32 %v793_v45, %v580_v9  ;;  %8553 = vst [vmem:[#allocation48_spill] sm:$0xff] %v6737_v33  ;;  %v1576_v9 = vsel %vm1488_vm4, %v1485_v11, 0.0  ;;  %vm1758_vm8 = vcmask 130112   ;;  %vm1895_vm9 = vcmask 1041409  }
 0x293   : > { %v1507_v45 = vsel %vm1488_vm4, %v1462_v59, 0.0  ;;  %8554 = vst [vmem:[#allocation49_spill] sm:$0xff] %v6753_v37  ;;  %8555 = vst [vmem:[#allocation50_spill] sm:$0xff] %v6761_v56  ;;  %vm1897_vm10 = vcmask 1042434   ;;  %vm1899_vm11 = vcmask 1043459   ;;  %vm1901_vm12 = vcmask 1044484  }
 0x294   : > { %1655 = vadd.xlane.f32.xlu0 %v1654_v35  ;;  %1664 = vadd.xlane.f32.xlu1 %v1663_v39  ;;  %8552 = vst [vmem:[#allocation47_spill] sm:$0xff] %v6728_v47  ;;  %v1211_v35 = vcombine.high %v6603_v27, %v6603_v27  ;;  %v1427_v27 = vsel %vm1363_vm13, %v1331_v62, %v1395_v24  ;;  %v1603_v24 = vsel %vm947_vm2, %v1462_v59, 0.0  ;;  %vm1903_vm13 = vcmask 1045509  }
 0x295   : > { %v1335_v39 = vadd.f32 %v1303_v8, %v6728_v47  ;;  %v1463_v19 = vmul.f32 %v6405_v6, %v1427_v27  ;;  %v1336_v62 = vadd.f32 %v1304_v40, %v6737_v33  ;;  %v1466_v8 = vmul.f32 %v6405_v6, %v1430_v7 }
 0x296   : > { %v1275_v14 = vrot.slane %v1211_v35, %v6181_v2  ;;  %v584_v59 = vmul.f32 %v6357_v3, %v6598_v17  ;;  %v1748_v33 = vand.u32 127, %v8559_v58  ;;  %vm1905_vm14 = vcmask 1046534  }
 0x297   : > { %v1399_v63 = vmul.f32 0.2, %v1335_v39  ;;  %vm1367_vm15 = vcmp.gt.f32.partialorder %v1335_v39, 0.0  ;;  %v1400_v35 = vmul.f32 0.2, %v1336_v62  ;;  %vm1368_vm0 = vcmp.gt.f32.partialorder %v1336_v62, 0.0 }
 0x298   : > { %1571 = vadd.xlane.f32.xlu0 %v1570_v20  ;;  %1574 = vadd.xlane.f32.xlu1 %v1573_v34  ;;  %v1162_v20 = vcombine.high %v6680_v16, %v6680_v16  ;;  %v1305_v16 = vadd.f32 %v1239_v30, %v6331_v51  ;;  %v583_v34 = vmul.f32 %v6357_v3, %v6576_v13  ;;  %v1510_v13 = vsel %vm1488_vm4, %v1463_v19, 0.0 }
 0x299   : > { %v1322_v11 = vadd.f32 %v1275_v14, %v6335_v55  ;;  %v600_v30 = vmul.f32 %v6357_v3, %v564_v25  ;;  %v1519_v40 = vsel %vm1488_vm4, %v1466_v8, 0.0  ;;  %v1606_v15 = vsel %vm947_vm2, %v1463_v19, 0.0 }
 0x29a   : > { %v1243_v18 = vrot.slane %v1162_v20, %v6181_v2  ;;  %v1337_v53 = vadd.f32 %v1305_v16, %v6753_v37  ;;  %v1432_v27 = vsel %vm1368_vm0, %v1336_v62, %v1400_v35  ;;  %v1323_v20 = vadd.f32 %v1275_v14, %v6331_v51 }
 0x29b   : > { %v1354_v25 = vadd.f32 %v1322_v11, %v6761_v56  ;;  %v1615_v17 = vsel %vm947_vm2, %v1466_v8, 0.0  ;;  %v1753_v44 = vadd.s32 4294967288, %v1748_v33  ;;  %v6899_v21 = vsub.s32 %v1748_v33, %v8560_v0 }
 0x29c   : > { %1667 = vadd.xlane.f32.xlu0 %v1666_v36  ;;  %1670 = vadd.xlane.f32.xlu1 %v1669_v29  ;;  %v796_v36 = vmul.f32 %v6359_v4, %v6621_v61  ;;  %v813_v61 = vmul.f32 %v6359_v4, %v777_v26  ;;  %v1431_v29 = vsel %vm1367_vm15, %v1335_v39, %v1399_v63  ;;  %vm1369_vm1 = vcmp.gt.f32.partialorder %v1337_v53, 0.0 }
 0x29d   : > { %v1467_v39 = vmul.f32 %v6405_v6, %v1431_v29  ;;  %v1306_v57 = vadd.f32 %v1243_v18, %v6335_v55  ;;  %vm1386_vm3 = vcmp.gt.f32.partialorder %v1354_v25, 0.0  ;;  %v1307_v62 = vadd.f32 %v1243_v18, %v6331_v51 }
 0x29e   : > { %v6774_v28 = vadd.f32 %v796_v36, %v583_v34  ;;  %v6782_v3 = vadd.f32 %v813_v61, %v600_v30  ;;  %v6893_v32 = vsub.s32 %v1753_v44, %v8560_v0  ;;  %vm1907_vm15 = vcmask 1047559  }
 0x29f   : > { %v1618_v16 = vsel %vm947_vm2, %v1467_v39, 0.0 }
 0x2a0   : > { %1577 = vadd.xlane.f32.xlu0 %v1576_v9  ;;  %1508 = vadd.xlane.f32.xlu1 %v1507_v45  ;;  %v797_v9 = vmul.f32 %v6359_v4, %v6642_v41  ;;  %8556 = vst [vmem:[#allocation51_spill] sm:$0xff] %v6774_v28  ;;  %8557 = vst [vmem:[#allocation52_spill] sm:$0xff] %v6782_v3  ;;  %v1401_v4 = vmul.f32 0.2, %v1337_v53  ;;  %v1468_v41 = vmul.f32 %v6405_v6, %v1432_v27 }
 0x2a1   : > { %v1522_v45 = vsel %vm1488_vm4, %v1467_v39, 0.0  ;;  %v1338_v7 = vadd.f32 %v1306_v57, %v6774_v28  ;;  %v1355_v19 = vadd.f32 %v1323_v20, %v6782_v3 }
 0x2a2   : > { %v6786_v12 = vadd.f32 %v797_v9, %v584_v59  ;;  %v1433_v14 = vsel %vm1369_vm1, %v1337_v53, %v1401_v4  ;;  %v1525_v63 = vsel %vm1488_vm4, %v1468_v41, 0.0  ;;  %v1621_v8 = vsel %vm947_vm2, %v1468_v41, 0.0 }
 0x2a3   : > { %v1469_v36 = vmul.f32 %v6405_v6, %v1433_v14  ;;  %v1402_v26 = vmul.f32 0.2, %v1338_v7  ;;  %vm1370_vm5 = vcmp.gt.f32.partialorder %v1338_v7, 0.0  ;;  %v1419_v11 = vmul.f32 0.2, %v1355_v19 }
 0x2a4   : > { %1673 = vadd.xlane.f32.xlu0 %v1672_v50  ;;  %1604 = vadd.xlane.f32.xlu1 %v1603_v24  ;;  %8558 = vst [vmem:[#allocation53_spill] sm:$0xff] %v6786_v12  ;;  %v1418_v50 = vmul.f32 0.2, %v1354_v25  ;;  %v1339_v24 = vadd.f32 %v1307_v62, %v6786_v12  ;;  %vm1387_vm6 = vcmp.gt.f32.partialorder %v1355_v19, 0.0 }
 0x2a5   : > { %v1528_v18 = vsel %vm1488_vm4, %v1469_v36, 0.0  ;;  %v1451_v35 = vsel %vm1387_vm6, %v1355_v19, %v1419_v11  ;;  %v1624_v59 = vsel %vm947_vm2, %v1469_v36, 0.0 }
 0x2a6   : > { %v1450_v34 = vsel %vm1386_vm3, %v1354_v25, %v1418_v50  ;;  %v1403_v61 = vmul.f32 0.2, %v1339_v24  ;;  %vm1371_vm7 = vcmp.gt.f32.partialorder %v1339_v24, 0.0  ;;  %v1487_v9 = vmul.f32 %v6405_v6, %v1451_v35 }
 0x2a7   : > { %v1486_v30 = vmul.f32 %v6405_v6, %v1450_v34  ;;  %vm1920_vm3 = vcmask 130048  }
 0x2a8   : > { %1511 = vadd.xlane.f32.xlu0 %v1510_v13  ;;  %1520 = vadd.xlane.f32.xlu1 %v1519_v40  ;;  %v1434_v13 = vsel %vm1370_vm5, %v1338_v7, %v1402_v26  ;;  %v1435_v25 = vsel %vm1371_vm7, %v1339_v24, %v1403_v61 }
 0x2a9   : > { %v1579_v29 = vsel %vm1488_vm4, %v1486_v30, 0.0  ;;  %v1470_v53 = vmul.f32 %v6405_v6, %v1434_v13  ;;  %v1471_v27 = vmul.f32 %v6405_v6, %v1435_v25  ;;  %v1675_v20 = vsel %vm947_vm2, %v1486_v30, 0.0 }
 0x2ab   : > { %v1531_v40 = vsel %vm1488_vm4, %v1470_v53, 0.0  ;;  %v1627_v39 = vsel %vm947_vm2, %v1470_v53, 0.0  ;;  %v1534_v57 = vsel %vm1488_vm4, %v1471_v27, 0.0  ;;  %v1630_v4 = vsel %vm947_vm2, %v1471_v27, 0.0 }
 0x2ac   : > { %1607 = vadd.xlane.f32.xlu0 %v1606_v15  ;;  %1616 = vadd.xlane.f32.xlu1 %v1615_v17  ;;  %v1582_v15 = vsel %vm1488_vm4, %v1487_v9, 0.0  ;;  %v1678_v17 = vsel %vm947_vm2, %v1487_v9, 0.0 }
 0x2b0   : > { %1523 = vadd.xlane.f32.xlu0 %v1522_v45  ;;  %1526 = vadd.xlane.f32.xlu1 %v1525_v63 }
 0x2b4   : > { %1619 = vadd.xlane.f32.xlu0 %v1618_v16  ;;  %1622 = vadd.xlane.f32.xlu1 %v1621_v8 }
 0x2b8   : > { %1529 = vadd.xlane.f32.xlu0 %v1528_v18  ;;  %1580 = vadd.xlane.f32.xlu1 %v1579_v29 }
 0x2bc   : > { %1625 = vadd.xlane.f32.xlu0 %v1624_v59  ;;  %1532 = vadd.xlane.f32.xlu1 %v1531_v40 }
 0x2c0   : > { %1583 = vadd.xlane.f32.xlu0 %v1582_v15  ;;  %1628 = vadd.xlane.f32.xlu1 %v1627_v39 }
 0x2c4   : > { %1535 = vadd.xlane.f32.xlu0 %v1534_v57  ;;  %1676 = vadd.xlane.f32.xlu1 %v1675_v20 }
 0x2c8   : > { %1631 = vadd.xlane.f32.xlu0 %v1630_v4 }
 0x2cc   : > { %1679 = vadd.xlane.f32.xlu0 %v1678_v17 }
 0x2d9   : > { %v1542_v41 = vpop.xlane.xlu0 %1541  ;;  %v6811_v45 = vpop.xlane.xlu1 %1538 }
 0x2dd   : > { %v6813_v6 = vpop.xlane.xlu0 %1637  ;;  %v6815_v50 = vpop.xlane.xlu1 %1634 }
 0x2de   : > { %v1698_v22 = vsub.f32 %v1542_v41, %v6813_v6  ;;  %v1697_v58 = vsub.f32 %v6811_v45, %v6815_v50  ;;  %v1830_v33 = vrot.slane %v6813_v6, %v6893_v32 }
 0x2e0   : > { %v2141_v45 = vrot.slane %v1698_v22, %v6893_v32 }
 0x2e1   : > { %v6817_v7 = vpop.xlane.xlu0 %1490  ;;  %v6819_v19 = vpop.xlane.xlu1 %1493 }
 0x2e5   : > { %v6821_v14 = vpop.xlane.xlu0 %1589  ;;  %v6823_v62 = vpop.xlane.xlu1 %1586 }
 0x2e6   : > { %v1681_v41 = vsub.f32 %v6817_v7, %v6823_v62  ;;  %v1682_v0 = vsub.f32 %v6819_v19, %v6821_v14  ;;  %v2137_v7 = vrot.slane %v1697_v58, %v6899_v21 }
 0x2e8   : > { %v2065_v58 = vrot.slane %v1681_v41, %v6899_v21 }
 0x2e9   : > { %v1548_v63 = vpop.xlane.xlu0 %1547  ;;  %v1545_v16 = vpop.xlane.xlu1 %1544 }
 0x2ed   : > { %v6825_v34 = vpop.xlane.xlu0 %1643  ;;  %v6827_v36 = vpop.xlane.xlu1 %1640 }
 0x2ee   : > { %v1699_v49 = vsub.f32 %v1545_v16, %v6827_v36  ;;  %v1700_v10 = vsub.f32 %v1548_v63, %v6825_v34  ;;  %v1835_v63 = vrot.slane %v6827_v36, %v6899_v21  ;;  %v1839_v16 = vrot.slane %v6825_v34, %v6893_v32 }
 0x2f0   : > { %v2146_v19 = vrot.slane %v1699_v49, %v6899_v21  ;;  %v2150_v52 = vrot.slane %v1700_v10, %v6893_v32  ;;  %v1757_v10 = vrot.slane %v6821_v14, %v6893_v32  ;;  %v2069_v49 = vrot.slane %v1682_v0, %v6893_v32 }
 0x2f1   : > { %v1554_v26 = vpop.xlane.xlu0 %1553  ;;  %v1551_v11 = vpop.xlane.xlu1 %1550 }
 0x2f5   : > { %v6829_v24 = vpop.xlane.xlu0 %1649  ;;  %v6831_v8 = vpop.xlane.xlu1 %1646 }
 0x2f6   : > { %v1701_v43 = vsub.f32 %v1551_v11, %v6831_v8  ;;  %v1702_v44 = vsub.f32 %v1554_v26, %v6829_v24  ;;  %v1826_v26 = vrot.slane %v6815_v50, %v6899_v21  ;;  %v1844_v22 = vrot.slane %v6831_v8, %v6899_v21 }
 0x2f7   : > { %v1848_v34 = vrot.slane %v6829_v24, %v6893_v32  ;;  %v1752_v50 = vrot.slane %v6823_v62, %v6899_v21  ;;  %v1840_v8 = vsel %vm1758_vm8, %v1839_v16, %v1835_v63  ;;  %v2151_v24 = vsel %vm1758_vm8, %v2150_v52, %v2146_v19 }
 0x2f8   : > { %v2155_v36 = vrot.slane %v1701_v43, %v6899_v21  ;;  %v2159_v23 = vrot.slane %v1702_v44, %v6893_v32  ;;  %v1831_v43 = vsel %vm1758_vm8, %v1830_v33, %v1826_v26  ;;  %v2142_v62 = vsel %vm1758_vm8, %v2141_v45, %v2137_v7 }
 0x2f9   : > { %v6833_v30 = vpop.xlane.xlu0 %1565  ;;  %v6835_v18 = vpop.xlane.xlu1 %1562  ;;  %v1849_v41 = vsel %vm1758_vm8, %v1848_v34, %v1844_v22  ;;  %v1759_v63 = vsel %vm1758_vm8, %v1757_v10, %v1752_v50  ;;  %v2070_v16 = vsel %vm1758_vm8, %v2069_v49, %v2065_v58  ;;  %v1909_v33 = vsel %vm1895_vm9, %v1840_v8, %v1831_v43 }
 0x2fa   : > { %v2160_v14 = vsel %vm1758_vm8, %v2159_v23, %v2155_v36  ;;  %v2213_v26 = vsel %vm1895_vm9, %v2151_v24, %v2142_v62  ;;  %v1910_v19 = vsel %vm1897_vm10, %v1849_v41, %v1909_v33 }
 0x2fb   : > { %v2214_v22 = vsel %vm1897_vm10, %v2160_v14, %v2213_v26 }
 0x2fd   : > { %v6837_v13 = vpop.xlane.xlu0 %1661  ;;  %v6839_v35 = vpop.xlane.xlu1 %1658 }
 0x2fe   : > { %v1706_v0 = vsub.f32 %v6833_v30, %v6837_v13  ;;  %v1705_v45 = vsub.f32 %v6835_v18, %v6839_v35 }
 0x300   : > { %v2177_v34 = vrot.slane %v1706_v0, %v6893_v32 }
 0x301   : > { %v6841_v61 = vpop.xlane.xlu0 %1496  ;;  %v6843_v29 = vpop.xlane.xlu1 %1592 }
 0x302   : > { %v1683_v23 = vsub.f32 %v6841_v61, %v6843_v29  ;;  %v1862_v61 = vrot.slane %v6839_v35, %v6899_v21  ;;  %v1763_v58 = vrot.slane %v6843_v29, %v6899_v21  ;;  %v2173_v35 = vrot.slane %v1705_v45, %v6899_v21 }
 0x305   : > { %v6845_v53 = vpop.xlane.xlu0 %1499  ;;  %v6847_v59 = vpop.xlane.xlu1 %1502 }
 0x309   : > { %v6849_v9 = vpop.xlane.xlu0 %1595  ;;  %v6851_v25 = vpop.xlane.xlu1 %1598 }
 0x30a   : > { %v1684_v52 = vsub.f32 %v6845_v53, %v6849_v9  ;;  %v1767_v53 = vrot.slane %v6849_v9, %v6893_v32  ;;  %v1685_v50 = vsub.f32 %v6847_v59, %v6851_v25  ;;  %v1772_v29 = vrot.slane %v6851_v25, %v6899_v21 }
 0x30c   : > { %v2078_v9 = vrot.slane %v1684_v52, %v6893_v32  ;;  %v2083_v41 = vrot.slane %v1685_v50, %v6899_v21  ;;  %v2178_v52 = vsel %vm1758_vm8, %v2177_v34, %v2173_v35 }
 0x30d   : > { %v6853_v40 = vpop.xlane.xlu0 %1505  ;;  %v6855_v15 = vpop.xlane.xlu1 %1514 }
 0x311   : > { %v6857_v27 = vpop.xlane.xlu0 %1601  ;;  %v6859_v39 = vpop.xlane.xlu1 %1610 }
 0x312   : > { %v1686_v30 = vsub.f32 %v6853_v40, %v6857_v27  ;;  %v1866_v40 = vrot.slane %v6837_v13, %v6893_v32  ;;  %v2074_v13 = vrot.slane %v1683_v23, %v6899_v21 }
 0x314   : > { %v2087_v49 = vrot.slane %v1686_v30, %v6893_v32  ;;  %v1867_v62 = vsel %vm1758_vm8, %v1866_v40, %v1862_v61  ;;  %v2079_v25 = vsel %vm1758_vm8, %v2078_v9, %v2074_v13  ;;  %v1790_v61 = vrot.slane %v6859_v39, %v6899_v21 }
 0x315   : > { %v6861_v57 = vpop.xlane.xlu0 %1517  ;;  %v6863_v20 = vpop.xlane.xlu1 %1556 }
 0x316   : > { %v2088_v45 = vsel %vm1758_vm8, %v2087_v49, %v2083_v41 }
 0x319   : > { %v6865_v4 = vpop.xlane.xlu0 %1613  ;;  %v6867_v17 = vpop.xlane.xlu1 %1652 }
 0x31a   : > { %v1703_v10 = vsub.f32 %v6863_v20, %v6867_v17  ;;  %v1690_v20 = vsub.f32 %v6861_v57, %v6865_v4  ;;  %v1853_v14 = vrot.slane %v6867_v17, %v6899_v21  ;;  %v1794_v17 = vrot.slane %v6865_v4, %v6893_v32 }
 0x31c   : > { %v2164_v57 = vrot.slane %v1703_v10, %v6899_v21  ;;  %v2105_v30 = vrot.slane %v1690_v20, %v6893_v32  ;;  %v7075_v20 = vld [vmem:[%s7051_s17] sm:$0xff] }
 0x31d   : > { %v6869_v12 = vpop.xlane.xlu0 %1559  ;;  %v6871_v3 = vpop.xlane.xlu1 %1568  ;;  %vm1713_vm0 = vcmp.gt.f32.partialorder %v7075_v20, 0.0 }
 0x321   : > { %v6873_v37 = vpop.xlane.xlu0 %1655  ;;  %v6875_v47 = vpop.xlane.xlu1 %1664 }
 0x322   : > { %v1704_v36 = vsub.f32 %v6869_v12, %v6873_v37  ;;  %v1776_v12 = vrot.slane %v6857_v27, %v6893_v32  ;;  %v1857_v59 = vrot.slane %v6873_v37, %v6893_v32  ;;  %v1768_v27 = vsel %vm1758_vm8, %v1767_v53, %v1763_v58 }
 0x323   : > { %v1689_v37 = vsub.f32 %v6855_v15, %v6859_v39  ;;  %v1896_v26 = vsel %vm1895_vm9, %v1768_v27, %v1759_v63  ;;  %v2206_v63 = vsel %vm1895_vm9, %v2079_v25, %v2070_v16  ;;  %v1707_v50 = vsub.f32 %v6871_v3, %v6875_v47 }
 0x324   : > { %v2168_v43 = vrot.slane %v1704_v36, %v6893_v32  ;;  %v1777_v0 = vsel %vm1758_vm8, %v1776_v12, %v1772_v29  ;;  %v1858_v15 = vsel %vm1758_vm8, %v1857_v59, %v1853_v14  ;;  %v2207_v4 = vsel %vm1897_vm10, %v2088_v45, %v2206_v63 }
 0x325   : > { %v6877_v60 = vpop.xlane.xlu0 %1571  ;;  %v6879_v28 = vpop.xlane.xlu1 %1574  ;;  %v2101_v40 = vrot.slane %v1689_v37, %v6899_v21  ;;  %v1898_v34 = vsel %vm1897_vm10, %v1777_v0, %v1896_v26  ;;  %v1911_v58 = vsel %vm1899_vm11, %v1858_v15, %v1910_v19  ;;  %v1795_v3 = vsel %vm1758_vm8, %v1794_v17, %v1790_v61 }
 0x326   : > { %v2169_v53 = vsel %vm1758_vm8, %v2168_v43, %v2164_v57  ;;  %v1912_v49 = vsel %vm1901_vm12, %v1867_v62, %v1911_v58  ;;  %v2182_v59 = vrot.slane %v1707_v50, %v6899_v21 }
 0x327   : > { %v2215_v9 = vsel %vm1899_vm11, %v2169_v53, %v2214_v22  ;;  %v2106_v19 = vsel %vm1758_vm8, %v2105_v30, %v2101_v40 }
 0x328   : > { %v7072_v27 = vsel %vm1901_vm12, %v2178_v52, %v2215_v9 }
 0x329   : > { %v6881_v56 = vpop.xlane.xlu0 %1667  ;;  %v6884_v5 = vpop.xlane.xlu1 %1670 }
 0x32a   : > { %v1708_v16 = vsub.f32 %v6877_v60, %v6881_v56  ;;  %v1875_v39 = vrot.slane %v6881_v56, %v6893_v32  ;;  %v1880_v37 = vrot.slane %v6884_v5, %v6899_v21 }
 0x32c   : > { %v2186_v43 = vrot.slane %v1708_v16, %v6893_v32 }
 0x32d   : > { %v6886_v1 = vpop.xlane.xlu0 %1577  ;;  %v6888_v42 = vpop.xlane.xlu1 %1508 }
 0x331   : > { %v6890_v38 = vpop.xlane.xlu0 %1673  ;;  %v6896_v48 = vpop.xlane.xlu1 %1604 }
 0x332   : > { %v1781_v29 = vrot.slane %v6896_v48, %v6899_v21  ;;  %v1884_v14 = vrot.slane %v6890_v38, %v6893_v32 }
 0x335   : > { %v6905_v31 = vpop.xlane.xlu0 %1511  ;;  %v6920_v11 = vpop.xlane.xlu1 %1520 }
 0x339   : > { %v6927_v6 = vpop.xlane.xlu0 %1607  ;;  %v6942_v54 = vpop.xlane.xlu1 %1616 }
 0x33a   : > { %v1688_v33 = vsub.f32 %v6905_v31, %v6927_v6  ;;  %v1687_v31 = vsub.f32 %v6888_v42, %v6896_v48  ;;  %v1785_v56 = vrot.slane %v6927_v6, %v6893_v32  ;;  %v1691_v35 = vsub.f32 %v6920_v11, %v6942_v54 }
 0x33b   : > { %v1709_v48 = vsub.f32 %v6879_v28, %v6884_v5  ;;  %v1710_v28 = vsub.f32 %v6886_v1, %v6890_v38  ;;  %v1799_v5 = vrot.slane %v6942_v54, %v6899_v21  ;;  %v2187_v38 = vsel %vm1758_vm8, %v2186_v43, %v2182_v59 }
 0x33c   : > { %v2096_v42 = vrot.slane %v1688_v33, %v6893_v32  ;;  %v2092_v60 = vrot.slane %v1687_v31, %v6899_v21  ;;  %v1786_v25 = vsel %vm1758_vm8, %v1785_v56, %v1781_v29  ;;  %v2110_v57 = vrot.slane %v1691_v35, %v6899_v21 }
 0x33d   : > { %v6946_v44 = vpop.xlane.xlu0 %1523  ;;  %v6965_v7 = vpop.xlane.xlu1 %1526  ;;  %v1885_v54 = vsel %vm1758_vm8, %v1884_v14, %v1880_v37 }
 0x33e   : > { %v2097_v6 = vsel %vm1758_vm8, %v2096_v42, %v2092_v60 }
 0x341   : > { %v6973_v18 = vpop.xlane.xlu0 %1619  ;;  %v6994_v8 = vpop.xlane.xlu1 %1622 }
 0x342   : > { %v1692_v12 = vsub.f32 %v6946_v44, %v6973_v18  ;;  %v1871_v44 = vrot.slane %v6875_v47, %v6899_v21  ;;  %v7078_v47 = vld [vmem:[%s7051_s17 + $0x8] sm:$0xff]  ;;  %v1803_v33 = vrot.slane %v6973_v18, %v6893_v32  ;;  %v1900_v18 = vsel %vm1899_vm11, %v1786_v25, %v1898_v34 }
 0x343   : > { %vm1714_vm1 = vcmp.gt.f32.partialorder %v7078_v47, 0.0  ;;  %v1808_v1 = vrot.slane %v6994_v8, %v6899_v21  ;;  %v1902_v42 = vsel %vm1901_vm12, %v1795_v3, %v1900_v18 }
 0x344   : > { %v1876_v11 = vsel %vm1758_vm8, %v1875_v39, %v1871_v44  ;;  %v2114_v62 = vrot.slane %v1692_v12, %v6893_v32  ;;  %v1804_v63 = vsel %vm1758_vm8, %v1803_v33, %v1799_v5  ;;  %v2191_v12 = vrot.slane %v1709_v48, %v6899_v21 }
 0x345   : > { %v7002_v24 = vpop.xlane.xlu0 %1529  ;;  %v7019_v23 = vpop.xlane.xlu1 %1580  ;;  %v1913_v45 = vsel %vm1903_vm13, %v1876_v11, %v1912_v49  ;;  %v1904_v56 = vsel %vm1903_vm13, %v1804_v63, %v1902_v42 }
 0x346   : > { %v2115_v17 = vsel %vm1758_vm8, %v2114_v62, %v2110_v57  ;;  %v1914_v49 = vsel %vm1905_vm14, %v1885_v54, %v1913_v45 }
 0x349   : > { %v7027_v36 = vpop.xlane.xlu0 %1625  ;;  %v1533_v10 = vpop.xlane.xlu1 %1532 }
 0x34a   : > { %v1694_v13 = vsub.f32 %v7002_v24, %v7027_v36  ;;  %v1693_v24 = vsub.f32 %v6965_v7, %v6994_v8  ;;  %v2208_v7 = vsel %vm1899_vm11, %v2097_v6, %v2207_v4  ;;  %v1812_v26 = vrot.slane %v7027_v36, %v6893_v32 }
 0x34b   : > { %v2209_v36 = vsel %vm1901_vm12, %v2106_v19, %v2208_v7  ;;  %v2195_v4 = vrot.slane %v1710_v28, %v6893_v32  ;;  %v5642_v28 = vpack.i.bf16 %v6331_v51, %v6335_v55 }
 0x34c   : > { %v2123_v52 = vrot.slane %v1694_v13, %v6893_v32  ;;  %v2119_v15 = vrot.slane %v1693_v24, %v6899_v21  ;;  %v1813_v50 = vsel %vm1758_vm8, %v1812_v26, %v1808_v1  ;;  %v2210_v58 = vsel %vm1903_vm13, %v2115_v17, %v2209_v36 }
 0x34d   : > { %v7058_v22 = vpop.xlane.xlu0 %1583  ;;  %v1629_v41 = vpop.xlane.xlu1 %1628  ;;  %v2196_v59 = vsel %vm1758_vm8, %v2195_v4, %v2191_v12  ;;  %v1906_v29 = vsel %vm1905_vm14, %v1813_v50, %v1904_v56  ;;  %v8561_v4 = vld [vmem:[#allocation18_spill] sm:$0xff]  ;;  %v8562_v12 = vld [vmem:[#allocation20_spill] sm:$0xff] }
 0x34e   : > { %v1695_v30 = vsub.f32 %v1533_v10, %v1629_v41  ;;  %v2124_v34 = vsel %vm1758_vm8, %v2123_v52, %v2119_v15  ;;  %v1817_v8 = vrot.slane %v1629_v41, %v6899_v21  ;;  %v2217_v41 = vsel %vm1903_vm13, %v2187_v38, %v7072_v27 }
 0x34f   : > { %v2211_v60 = vsel %vm1905_vm14, %v2124_v34, %v2210_v58  ;;  %v2218_v25 = vsel %vm1905_vm14, %v2196_v59, %v2217_v41 }
 0x350   : > { %v2128_v9 = vrot.slane %v1695_v30, %v6899_v21 }
 0x351   : > { %v1536_v0 = vpop.xlane.xlu0 %1535  ;;  %v1677_v53 = vpop.xlane.xlu1 %1676 }
 0x352   : > { %v1711_v16 = vsub.f32 %v7019_v23, %v1677_v53  ;;  %v1889_v10 = vrot.slane %v1677_v53, %v6899_v21 }
 0x354   : > { %v2200_v6 = vrot.slane %v1711_v16, %v6899_v21 }
 0x355   : > { %v1632_v31 = vpop.xlane.xlu0 %1631 }
 0x356   : > { %v1696_v61 = vsub.f32 %v1536_v0, %v1632_v31  ;;  %v1821_v40 = vrot.slane %v1632_v31, %v6893_v32 }
 0x358   : > { %v2132_v39 = vrot.slane %v1696_v61, %v6893_v32  ;;  %v1822_v13 = vsel %vm1758_vm8, %v1821_v40, %v1817_v8 }
 0x359   : > { %v1680_v19 = vpop.xlane.xlu0 %1679  ;;  %v1908_v48 = vsel %vm1907_vm15, %v1822_v13, %v1906_v29 }
 0x35a   : > { %v1712_v44 = vsub.f32 %v7058_v22, %v1680_v19  ;;  %v1893_v3 = vrot.slane %v1680_v19, %v6893_v32  ;;  %v2133_v35 = vsel %vm1758_vm8, %v2132_v39, %v2128_v9  ;;  %v1918_v27 = vsel %vm1713_vm0, %v1908_v48, -1e+30  ;;  %v8564_v19 = vld [vmem:[#allocation19_spill] sm:$0xff] }
 0x35b   : > { %v2212_v23 = vsel %vm1907_vm15, %v2133_v35, %v2211_v60  ;;  %v1921_v52 = vsel %vm1920_vm3, %v1918_v27, -inf }
 0x35c   : > { %v2204_v11 = vrot.slane %v1712_v44, %v6893_v32  ;;  %v2222_v22 = vsel %vm1713_vm0, %v2212_v23, -1e+30  ;;  %v1894_v43 = vsel %vm1758_vm8, %v1893_v3, %v1889_v10  ;;  %v8563_v10 = vld [vmem:[#allocation17_spill] sm:$0xff] }
 0x35d   : > { %v2224_v24 = vsel %vm1920_vm3, %v2222_v22, -inf  ;;  %v1915_v62 = vsel %vm1907_vm15, %v1894_v43, %v1914_v49 }
 0x35e   : > { %2225 = vmax.xlane.f32.xlu0 %v2224_v24  ;;  %v1919_v37 = vsel %vm1714_vm1, %v1915_v62, -1e+30  ;;  %v2205_v14 = vsel %vm1758_vm8, %v2204_v11, %v2200_v6 }
 0x35f   : > { %v1924_v0 = vsel %vm1920_vm3, %v1919_v37, -inf  ;;  %v2219_v57 = vsel %vm1907_vm15, %v2205_v14, %v2218_v25  ;;  %v5285_v14 = vld [vmem:[#allocation8 + $0x3] ss:$0 sm:$0xff] }
 0x360   : > { %1925 = vmax.xlane.f32.xlu1 %v1924_v0  ;;  %v2223_v7 = vsel %vm1714_vm1, %v2219_v57, -1e+30 }
 0x361   : > { %v2227_v33 = vsel %vm1920_vm3, %v2223_v7, -inf }
 0x362   : > { %2228 = vmax.xlane.f32.xlu0 %v2227_v33 }
 0x364   : > { %1922 = vmax.xlane.f32.xlu1 %v1921_v52 }
 0x375   : > { %5643 = vrot.lane.b32.xlu1 %v5642_v28, %s5914_s9 }
 0x3eb   : > { %v2226_v5 = vpop.xlane.xlu0 %2225 }
 0x3ec   : > { %v2230_v26 = vsub.f32 %v2222_v22, %v2226_v5 }
 0x3ed   : > { %v1926_v45 = vpop.xlane.xlu1 %1925 }
 0x3ee   : > { %v2232_v18 = vmul.f32 1.442695, %v2230_v26  ;;  %v1928_v15 = vsub.f32 %v1919_v37, %v1926_v45 }
 0x3ef   : > { %v2229_v17 = vpop.xlane.xlu0 %2228 }
 0x3f0   : > { %5657 = vpow2.f32 %v2232_v18  ;;  %v1931_v30 = vmul.f32 1.442695, %v1928_v15  ;;  %v2231_v38 = vsub.f32 %v2223_v7, %v2229_v17  ;;  %v5705_v18 = vld [vmem:[#allocation8 + $0x1] ss:$0 sm:$0xff]  ;;  %v5706_v17 = vld [vmem:[#allocation8 + $0x2] ss:$0 sm:$0xff] }
 0x3f1   : > { %v1923_v54 = vpop.xlane.xlu1 %1922 }
 0x3f2   : > { %5659 = vpow2.f32 %v1931_v30  ;;  %v2234_v1 = vmul.f32 1.442695, %v2231_v38  ;;  %v1927_v53 = vsub.f32 %v1918_v27, %v1923_v54 }
 0x3f4   : > { %5661 = vpow2.f32 %v2234_v1  ;;  %v1929_v31 = vmul.f32 1.442695, %v1927_v53 }
 0x3f5   : > { %v5644_v36 = vpop.permute.xlu1 %5643 }
 0x3f6   : > { %5663 = vpow2.f32 %v1929_v31  ;;  %v5646_v51 = vunpack.i.h.bf16 %v5644_v36  ;;  %v5645_v55 = vunpack.i.l.bf16 %v5644_v36 }
 0x3f8   : > { %v5507_v63 = vpack.c.bf16 %v5646_v51, %v5645_v55 }
 0x3fa   : > { %v5658_v61 = vpop.eup %5657  ;;  %5508 = vmatprep.subr.bf16.mxu0 %v5507_v63 }
 0x3fb   : > { %5510 = vmatpush3.bf16.msra.mxu0 %v5507_v63  ;;  %v2236_v40 = vmul.f32 %v5658_v61, %v7075_v20 }
 0x3fc   : > { %v5660_v34 = vpop.eup %5659  ;;  %5520 = vmatprep.subr.bf16.mxu0 %v8561_v4 }
 0x3fd   : > { %5412 = vmatprep.mubr.msk.f32.mxu0 %vm1920_vm3, %v2236_v40  ;;  %v1934_v50 = vmul.f32 %v5660_v34, %v7078_v47  ;;  %v2238_v60 = vsel %vm1920_vm3, %v2236_v40, 0.0 }
 0x3fe   : > { %v5662_v58 = vpop.eup %5661 }
 0x3ff   : > { %v1938_v42 = vsel %vm1920_vm3, %v1934_v50, 0.0  ;;  %v2237_v8 = vmul.f32 %v5662_v58, %v7078_v47 }
 0x400   : > { %v5664_v9 = vpop.eup %5663  ;;  %1939 = vadd.xlane.f32.xlu0 %v1938_v42 }
 0x401   : > { %5413 = vmatmul.mubr.msk.f32.vlgmr.msra.gmra.mrb[4].mxu0 %vm1920_vm3, %v2237_v8  ;;  %v1933_v16 = vmul.f32 %v5664_v9, %v7075_v20  ;;  %v2241_v56 = vsel %vm1920_vm3, %v2237_v8, 0.0 }
 0x402   : > { %5522 = vmatpush3.bf16.msra.mxu0 %v8561_v4 }
 0x403   : > { %5405 = vmatprep.mubr.msk.f32.mxu1 %vm1920_vm3, %v1933_v16  ;;  %v1935_v39 = vsel %vm1920_vm3, %v1933_v16, 0.0  ;;  %5524 = vmatprep.subr.bf16.mxu0 %v8562_v12 }
 0x404   : > { %5406 = vmatmul.mubr.msk.f32.vlgmr.msra.gmra.mrb[2].mxu1 %vm1920_vm3, %v1934_v50  ;;  %1936 = vadd.xlane.f32.xlu0 %v1935_v39 }
 0x405   : > { %5514 = vmatpush3.bf16.msra.mxu1 %v8563_v10 }
 0x406   : > { %5516 = vmatprep.subr.bf16.mxu1 %v8564_v19  ;;  %5526 = vmatpush3.bf16.msra.mxu0 %v8562_v12 }
 0x408   : > { %2239 = vadd.xlane.f32.xlu0 %v2238_v60 }
 0x409   : > { %5518 = vmatpush3.bf16.msra.mxu1 %v8564_v19 }
 0x40c   : > { %2242 = vadd.xlane.f32.xlu0 %v2241_v56 }
 0x48d   : > { %v1940_v44 = vpop.xlane.xlu0 %1939 }
 0x48e   : > { %5665 = vrcp.f32 %v1940_v44 }
 0x491   : > { %v1937_v3 = vpop.xlane.xlu0 %1936 }
 0x492   : > { %5667 = vrcp.f32 %v1937_v3 }
 0x495   : > { %v2240_v35 = vpop.xlane.xlu0 %2239 }
 0x498   : > { %v5666_v49 = vpop.eup %5665 }
 0x499   : > { %v2243_v13 = vpop.xlane.xlu0 %2242 }
 0x49a   : > { %5669 = vrcp.f32 %v2243_v13 }
 0x49b   : > { %5671 = vrcp.f32 %v2240_v35 }
 0x49c   : > { %v5668_v29 = vpop.eup %5667 }
 0x4a4   : > { %v5670_v6 = vpop.eup %5669 }
 0x4a5   : > { %v5672_v22 = vpop.eup %5671 }
 0x4d4   : > { %v5414_v23 = vpop.f32.mrb[4].mxu0 }
 0x4d5   : > { %v2324_v59 = vpop.f32.mrb[5].mxu0  ;;  %v2338_v43 = vmul.f32 %v5670_v6, %v5414_v23 }
 0x4d6   : > { %v2337_v41 = vmul.f32 %v5672_v22, %v2324_v59 }
 0x4d7   : > { %v5407_v11 = vpop.f32.mrb[2].mxu1 }
 0x4d8   : > { %v2027_v24 = vmul.f32 %v5666_v49, %v5407_v11  ;;  %v2013_v62 = vpop.f32.mrb[3].mxu1 }
 0x4d9   : > { %v2026_v48 = vmul.f32 %v5668_v29, %v2013_v62 }
 0x4da   : > { %v2340_v37 = vadd.f32 %v2338_v43, %v2027_v24  ;;  %v8567_v24 = vld [vmem:[#allocation22_spill] sm:$0xff] }
 0x4db   : > { %v2339_v25 = vadd.f32 %v2337_v41, %v2026_v48  ;;  %v8568_v48 = vld [vmem:[#allocation24_spill] sm:$0xff] }
 0x4dc   : > { %v2342_v0 = vmul.f32 0.5, %v2340_v37 }
 0x4dd   : > { %v2341_v57 = vmul.f32 0.5, %v2339_v25 }
 0x4de   : > { %v2348_v7 = vadd.f32 %v5285_v14, %v2342_v0 }
 0x4df   : > { %v2347_v27 = vadd.f32 %v5285_v14, %v2341_v57  ;;  %v8569_v57 = vld [vmem:[#allocation25_spill] sm:$0xff] }
 0x4e0   : > { %v2352_v33 = vmul.f32 0.01, %v2348_v7  ;;  %vm2350_vm6 = vcmp.gt.f32.partialorder %v2348_v7, 0.0 }
 0x4e1   : > { %vm2349_vm5 = vcmp.gt.f32.partialorder %v2347_v27, 0.0  ;;  %v2351_v52 = vmul.f32 0.01, %v2347_v27 }
 0x4e2   : > { %v2354_v5 = vsel %vm2350_vm6, %v2348_v7, %v2352_v33 }
 0x4e3   : > { %v2353_v28 = vsel %vm2349_vm5, %v2347_v27, %v2351_v52  ;;  %v8570_v27 = vld [vmem:[#allocation23_spill] sm:$0xff] }
 0x4e4   : > { %5423 = vmatprep.mubr.msk.f32.mxu1 %vm947_vm2, %v2353_v28  ;;  %5434 = vmatprep.mubr.msk.f32.mxu0 %vm947_vm2, %v2353_v28 }
 0x4e5   : > { %5424 = vmatmul.mubr.msk.f32.vlgmr.msra.gmra.mrb[4].mxu1 %vm947_vm2, %v2354_v5  ;;  %5435 = vmatmul.mubr.msk.f32.vlgmr.msra.gmra.mrb[6].mxu0 %vm947_vm2, %v2354_v5 }
 0x5b8   : > { %v5425_v26 = vpop.f32.mrb[4].mxu1  ;;  %v5436_v45 = vpop.f32.mrb[6].mxu0 }
 0x5b9   : > { %v7185_v15 = vadd.f32 %v5705_v18, %v5425_v26  ;;  %v2508_v30 = vadd.f32 %v5706_v17, %v5436_v45  ;;  %v2427_v38 = vpop.f32.mrb[5].mxu1  ;;  %v2502_v54 = vpop.f32.mrb[7].mxu0  ;;  %v7251_v45 = vld [vmem:[#allocation8 + $0x4] ss:$0 sm:$0xff] }
 0x5ba   : > { %v7187_v1 = vadd.f32 %v5705_v18, %v2427_v38  ;;  %v2503_v53 = vadd.f32 %v5706_v17, %v2502_v54  ;;  %v8571_v38 = vld [vmem:[#allocation27_spill] sm:$0xff] }
 0x5bb   : > { %8565 = vst [vmem:[#allocation15_spill] sm:$0xff] %v7185_v15  ;;  %v2569_v31 = vrot.slane %v2508_v30, %v6325_v46  ;;  %v2562_v60 = vcombine.high %v2508_v30, %v2508_v30 }
 0x5bc   : > { %8566 = vst [vmem:[#allocation54_spill] sm:$0xff] %v7187_v1  ;;  %v2513_v36 = vcombine.high %v2503_v53, %v2503_v53  ;;  %v2520_v51 = vrot.slane %v2503_v53, %v6325_v46  ;;  %v5527_v55 = vpack.c.bf16 %v7185_v15, %v7187_v1 }
 0x5bd   : > { %v2585_v63 = vrot.slane %v2569_v31, %v6325_v46  ;;  %v2577_v34 = vcombine.high %v2569_v31, %v2569_v31  ;;  %v2576_v11 = vrot.slane %v2562_v60, %v6325_v46  ;;  %v8572_v60 = vld [vmem:[#allocation26_spill] sm:$0xff] }
 0x5be   : > { %v7195_v61 = vrot.slane %v2513_v36, %v6325_v46  ;;  %v2528_v40 = vcombine.high %v2520_v51, %v2520_v51  ;;  %5528 = vmatprep.subr.bf16.mxu1 %v5527_v55  ;;  %v2536_v50 = vrot.slane %v2520_v51, %v6325_v46 }
 0x5bf   : > { %5530 = vmatpush3.bf16.msra.mxu1 %v5527_v55  ;;  %v2646_v58 = vrot.slane %v2585_v63, %v6181_v2  ;;  %v7208_v9 = vrot.slane %v2577_v34, %v6325_v46  ;;  %v2607_v16 = vcombine.high %v2585_v63, %v2585_v63  ;;  %v7249_v52 = vrot.slane %v2576_v11, %v6325_v46 }
 0x5c0   : > { %5536 = vmatprep.subr.bf16.mxu1 %v8563_v10  ;;  %v7202_v42 = vrot.slane %v7195_v61, %v6325_v46  ;;  %v7205_v8 = vrot.slane %v2528_v40, %v6325_v46  ;;  %v2558_v39 = vcombine.high %v2536_v50, %v2536_v50  ;;  %v2614_v44 = vrot.slane %v2536_v50, %v6181_v2 }
 0x5c1   : > { %v2708_v56 = vadd.f32 %v2646_v58, %v7185_v15  ;;  %v2650_v23 = vrot.slane %v7208_v9, %v6181_v2  ;;  %v2654_v49 = vrot.slane %v2607_v16, %v6181_v2  ;;  %v2707_v41 = vadd.f32 %v2646_v58, %v7187_v1 }
 0x5c2   : > { %v7214_v3 = vrot.slane %v7205_v8, %v6181_v2  ;;  %v7217_v35 = vrot.slane %v2558_v39, %v6181_v2  ;;  %v7221_v13 = vrot.slane %v7202_v42, %v6181_v2  ;;  %v2691_v59 = vadd.f32 %v2614_v44, %v7187_v1 }
 0x5c3   : > { %v2692_v29 = vadd.f32 %v2614_v44, %v7185_v15  ;;  %v2740_v62 = vadd.f32 %v2708_v56, %v8567_v24  ;;  %v2709_v14 = vadd.f32 %v2650_v23, %v7187_v1  ;;  %v2711_v25 = vadd.f32 %v2654_v49, %v7187_v1 }
 0x5c4   : > { %v7230_v6 = vadd.f32 %v7214_v3, %v7187_v1  ;;  %v7235_v22 = vadd.f32 %v7217_v35, %v7187_v1  ;;  %v7239_v43 = vadd.f32 %v7221_v13, %v7187_v1  ;;  %v2739_v7 = vadd.f32 %v2707_v41, %v8569_v57 }
 0x5c5   : > { %v2724_v37 = vadd.f32 %v2692_v29, %v8568_v48  ;;  %vm2772_vm7 = vcmp.gt.f32.partialorder %v2740_v62, 0.0  ;;  %v2804_v0 = vmul.f32 0.2, %v2740_v62  ;;  %v2723_v33 = vadd.f32 %v2691_v59, %v8570_v27 }
 0x5c6   : > { %vm2771_vm5 = vcmp.gt.f32.partialorder %v2739_v7, 0.0  ;;  %v2803_v5 = vmul.f32 0.2, %v2739_v7  ;;  %v2741_v54 = vadd.f32 %v2709_v14, %v8571_v38  ;;  %v2662_v53 = vrot.slane %v7249_v52, %v6181_v2 }
 0x5c7   : > { %v2836_v28 = vsel %vm2772_vm7, %v2740_v62, %v2804_v0  ;;  %v2788_v26 = vmul.f32 0.2, %v2724_v37  ;;  %vm2756_vm6 = vcmp.gt.f32.partialorder %v2724_v37, 0.0  ;;  %v2787_v30 = vmul.f32 0.2, %v2723_v33  ;;  %v8573_v62 = vld [vmem:[#allocation29_spill] sm:$0xff] }
 0x5c8   : > { %v2868_v18 = vmul.f32 %v7251_v45, %v2836_v28  ;;  %v2835_v17 = vsel %vm2771_vm5, %v2739_v7, %v2803_v5  ;;  %vm2755_vm7 = vcmp.gt.f32.partialorder %v2723_v33, 0.0  ;;  %v2710_v51 = vadd.f32 %v2650_v23, %v7185_v15 }
 0x5c9   : > { %v2867_v36 = vmul.f32 %v7251_v45, %v2835_v17  ;;  %v2820_v55 = vsel %vm2756_vm6, %v2724_v37, %v2788_v26  ;;  %v2578_v40 = vcombine.high %v2576_v11, %v2576_v11  ;;  %v2819_v34 = vsel %vm2755_vm7, %v2723_v33, %v2787_v30 }
 0x5ca   : > { %v2934_v31 = vsel %vm1488_vm4, %v2868_v18, 0.0  ;;  %v2805_v50 = vmul.f32 0.2, %v2741_v54  ;;  %v3030_v58 = vsel %vm947_vm2, %v2868_v18, 0.0  ;;  %v2852_v16 = vmul.f32 %v7251_v45, %v2820_v55  ;;  %v8574_v18 = vld [vmem:[#allocation28_spill] sm:$0xff] }
 0x5cb   : > { %2935 = vadd.xlane.f32.xlu0 %v2934_v31  ;;  %v2931_v63 = vsel %vm1488_vm4, %v2867_v36, 0.0  ;;  %vm2773_vm5 = vcmp.gt.f32.partialorder %v2741_v54, 0.0  ;;  %v2715_v39 = vadd.f32 %v2662_v53, %v7187_v1  ;;  %v2742_v56 = vadd.f32 %v2710_v51, %v8572_v60  ;;  %v8575_v51 = vld [vmem:[#allocation31_spill] sm:$0xff] }
 0x5cc   : > { %2932 = vadd.xlane.f32.xlu1 %v2931_v63  ;;  %v3027_v44 = vsel %vm947_vm2, %v2867_v36, 0.0  ;;  %v2851_v23 = vmul.f32 %v7251_v45, %v2819_v34  ;;  %v7268_v59 = vrot.slane %v2578_v40, %v6325_v46  ;;  %v2609_v29 = vcombine.high %v7208_v9, %v7208_v9 }
 0x5cd   : > { %v2837_v11 = vsel %vm2773_vm5, %v2741_v54, %v2805_v50  ;;  %v2743_v41 = vadd.f32 %v2711_v25, %v8573_v62  ;;  %v2886_v37 = vsel %vm1488_vm4, %v2852_v16, 0.0  ;;  %v2712_v14 = vadd.f32 %v2654_v49, %v7185_v15 }
 0x5ce   : > { %v2806_v0 = vmul.f32 0.2, %v2742_v56  ;;  %v2883_v7 = vsel %vm1488_vm4, %v2851_v23, 0.0  ;;  %v2869_v33 = vmul.f32 %v7251_v45, %v2837_v11  ;;  %vm2774_vm6 = vcmp.gt.f32.partialorder %v2742_v56, 0.0 }
 0x5cf   : > { %3031 = vadd.xlane.f32.xlu0 %v3030_v58  ;;  %v7278_v28 = vrot.slane %v2609_v29, %v6181_v2  ;;  %v7282_v9 = vrot.slane %v7268_v59, %v6181_v2  ;;  %v2807_v25 = vmul.f32 0.2, %v2743_v41  ;;  %v2979_v5 = vsel %vm947_vm2, %v2851_v23, 0.0 }
 0x5d0   : > { %3028 = vadd.xlane.f32.xlu1 %v3027_v44  ;;  %vm2775_vm7 = vcmp.gt.f32.partialorder %v2743_v41, 0.0  ;;  %v2608_v49 = vcombine.high %v7249_v52, %v7249_v52  ;;  %v2838_v26 = vsel %vm2774_vm6, %v2742_v56, %v2806_v0  ;;  %v2744_v17 = vadd.f32 %v2712_v14, %v8574_v18 }
 0x5d1   : > { %v2529_v30 = vcombine.high %v7195_v61, %v7195_v61  ;;  %v2560_v54 = vcombine.high %v7205_v8, %v7205_v8  ;;  %v2937_v31 = vsel %vm1488_vm4, %v2869_v33, 0.0  ;;  %v2839_v36 = vsel %vm2775_vm7, %v2743_v41, %v2807_v25  ;;  %v8577_v25 = vld [vmem:[#allocation34_spill] sm:$0xff] }
 0x5d2   : > { %v2747_v55 = vadd.f32 %v2715_v39, %v8575_v51  ;;  %v7296_v63 = vadd.f32 %v7278_v28, %v7187_v1  ;;  %v7300_v52 = vadd.f32 %v7282_v9, %v7187_v1  ;;  %v2982_v40 = vsel %vm947_vm2, %v2852_v16, 0.0 }
 0x5d3   : > { %2887 = vadd.xlane.f32.xlu0 %v2886_v37  ;;  %v2870_v61 = vmul.f32 %v7251_v45, %v2838_v26  ;;  %v7305_v8 = vrot.slane %v2608_v49, %v6181_v2  ;;  %v2716_v34 = vadd.f32 %v2662_v53, %v7185_v15  ;;  %v2808_v50 = vmul.f32 0.2, %v2744_v17  ;;  %v8576_v53 = vld [vmem:[#allocation30_spill] sm:$0xff] }
 0x5d4   : > { %2884 = vadd.xlane.f32.xlu1 %v2883_v7  ;;  %v7309_v58 = vrot.slane %v2560_v54, %v6181_v2  ;;  %v3033_v39 = vsel %vm947_vm2, %v2869_v33, 0.0  ;;  %v2871_v56 = vmul.f32 %v7251_v45, %v2839_v36  ;;  %vm2776_vm5 = vcmp.gt.f32.partialorder %v2744_v17, 0.0 }
 0x5d5   : > { %v2557_v44 = vrot.slane %v2529_v30, %v6325_v46  ;;  %v2811_v16 = vmul.f32 0.2, %v2747_v55  ;;  %v2940_v23 = vsel %vm1488_vm4, %v2870_v61, 0.0  ;;  %vm2779_vm6 = vcmp.gt.f32.partialorder %v2747_v55, 0.0 }
 0x5d6   : > { %v2840_v29 = vsel %vm2776_vm5, %v2744_v17, %v2808_v50  ;;  %v2748_v11 = vadd.f32 %v2716_v34, %v8576_v53  ;;  %v7318_v41 = vadd.f32 %v7305_v8, %v7187_v1  ;;  %v2943_v37 = vsel %vm1488_vm4, %v2871_v56, 0.0 }
 0x5d7   : > { %2980 = vadd.xlane.f32.xlu0 %v2979_v5  ;;  %v7323_v14 = vadd.f32 %v7309_v58, %v7187_v1  ;;  %v2559_v0 = vcombine.high %v7202_v42, %v7202_v42  ;;  %v7328_v7 = vrot.slane %v2557_v44, %v6181_v2  ;;  %v2843_v33 = vsel %vm2779_vm6, %v2747_v55, %v2811_v16 }
 0x5d8   : > { %2938 = vadd.xlane.f32.xlu1 %v2937_v31  ;;  %v2727_v5 = vadd.f32 %v7235_v22, %v8577_v25  ;;  %v3036_v49 = vsel %vm947_vm2, %v2870_v61, 0.0  ;;  %v2872_v26 = vmul.f32 %v7251_v45, %v2840_v29  ;;  %v2812_v17 = vmul.f32 0.2, %v2748_v11  ;;  %v8578_v22 = vld [vmem:[#allocation36_spill] sm:$0xff] }
 0x5d9   : > { %v2610_v30 = vcombine.high %v7268_v59, %v7268_v59  ;;  %v3039_v54 = vsel %vm947_vm2, %v2871_v56, 0.0  ;;  %v2875_v42 = vmul.f32 %v7251_v45, %v2843_v33  ;;  %vm2780_vm7 = vcmp.gt.f32.partialorder %v2748_v11, 0.0 }
 0x5da   : > { %v7339_v31 = vrot.slane %v2559_v0, %v6181_v2  ;;  %v2791_v36 = vmul.f32 0.2, %v2727_v5  ;;  %v2731_v55 = vadd.f32 %v7239_v43, %v8578_v22  ;;  %v2561_v61 = vcombine.high %v2557_v44, %v2557_v44  ;;  %v8580_v0 = vld [vmem:[#allocation33_spill] sm:$0xff] }
 0x5db   : > { %2983 = vadd.xlane.f32.xlu0 %v2982_v40  ;;  %v7345_v40 = vadd.f32 %v7328_v7, %v7187_v1  ;;  %v2946_v59 = vsel %vm1488_vm4, %v2872_v26, 0.0  ;;  %vm2759_vm5 = vcmp.gt.f32.partialorder %v2727_v5, 0.0  ;;  %v2694_v34 = vadd.f32 %v7214_v3, %v7185_v15 }
 0x5dc   : > { %3034 = vadd.xlane.f32.xlu1 %v3033_v39  ;;  %v2844_v50 = vsel %vm2780_vm7, %v2748_v11, %v2812_v17  ;;  %v8579_v39 = vld [vmem:[#allocation32_spill] sm:$0xff]  ;;  %v2955_v16 = vsel %vm1488_vm4, %v2875_v42, 0.0  ;;  %v7354_v43 = vrot.slane %v2610_v30, %v6181_v2  ;;  %v2795_v29 = vmul.f32 0.2, %v2731_v55  ;;  %v8581_v30 = vld [vmem:[#allocation38_spill] sm:$0xff] }
 0x5dd   : > { %v2725_v56 = vadd.f32 %v7230_v6, %v8579_v39  ;;  %v7358_v44 = vadd.f32 %v7339_v31, %v7187_v1  ;;  %v3042_v3 = vsel %vm947_vm2, %v2872_v26, 0.0  ;;  %v2876_v11 = vmul.f32 %v7251_v45, %v2844_v50 }
 0x5de   : > { %vm2763_vm6 = vcmp.gt.f32.partialorder %v2731_v55, 0.0  ;;  %v2726_v33 = vadd.f32 %v2694_v34, %v8580_v0  ;;  %v7372_v26 = vadd.f32 %v7354_v43, %v7187_v1 }
 0x5df   : > { %2941 = vadd.xlane.f32.xlu0 %v2940_v23  ;;  %v2823_v23 = vsel %vm2759_vm5, %v2727_v5, %v2791_v36  ;;  %v2789_v6 = vmul.f32 0.2, %v2725_v56  ;;  %vm2757_vm7 = vcmp.gt.f32.partialorder %v2725_v56, 0.0  ;;  %v2827_v17 = vsel %vm2763_vm6, %v2731_v55, %v2795_v29 }
 0x5e0   : > { %2944 = vadd.xlane.f32.xlu1 %v2943_v37  ;;  %v7361_v37 = vrot.slane %v2561_v61, %v6181_v2  ;;  %v2855_v5 = vmul.f32 %v7251_v45, %v2823_v23  ;;  %v2958_v36 = vsel %vm1488_vm4, %v2876_v11, 0.0  ;;  %v2859_v55 = vmul.f32 %v7251_v45, %v2827_v17 }
 0x5e1   : > { %vm2758_vm5 = vcmp.gt.f32.partialorder %v2726_v33, 0.0  ;;  %v3054_v50 = vsel %vm947_vm2, %v2876_v11, 0.0 }
 0x5e2   : > { %v7377_v61 = vadd.f32 %v7361_v37, %v7187_v1  ;;  %v2991_v34 = vsel %vm947_vm2, %v2855_v5, 0.0  ;;  %v2907_v29 = vsel %vm1488_vm4, %v2859_v55, 0.0  ;;  %v3003_v11 = vsel %vm947_vm2, %v2859_v55, 0.0 }
 0x5e3   : > { %3037 = vadd.xlane.f32.xlu0 %v3036_v49  ;;  %v3051_v49 = vsel %vm947_vm2, %v2875_v42, 0.0  ;;  %v2821_v42 = vsel %vm2757_vm7, %v2725_v56, %v2789_v6  ;;  %v8582_v56 = vld [vmem:[#allocation40_spill] sm:$0xff]  ;;  %v2700_v55 = vadd.f32 %v7221_v13, %v7185_v15 }
 0x5e4   : > { %3040 = vadd.xlane.f32.xlu1 %v3039_v54  ;;  %v2745_v54 = vadd.f32 %v7296_v63, %v8581_v30  ;;  %v2749_v6 = vadd.f32 %v7300_v52, %v8582_v56 }
 0x5e6   : > { %v2809_v63 = vmul.f32 0.2, %v2745_v54  ;;  %vm2777_vm6 = vcmp.gt.f32.partialorder %v2745_v54, 0.0  ;;  %vm2781_vm7 = vcmp.gt.f32.partialorder %v2749_v6, 0.0 }
 0x5e7   : > { %2947 = vadd.xlane.f32.xlu0 %v2946_v59  ;;  %v2790_v59 = vmul.f32 0.2, %v2726_v33 }
 0x5e8   : > { %2956 = vadd.xlane.f32.xlu1 %v2955_v16  ;;  %v2853_v16 = vmul.f32 %v7251_v45, %v2821_v42 }
 0x5e9   : > { %v2822_v23 = vsel %vm2758_vm5, %v2726_v33, %v2790_v59  ;;  %v2813_v33 = vmul.f32 0.2, %v2749_v6 }
 0x5ea   : > { %v2854_v17 = vmul.f32 %v7251_v45, %v2822_v23  ;;  %v2985_v23 = vsel %vm947_vm2, %v2853_v16, 0.0 }
 0x5eb   : > { %3043 = vadd.xlane.f32.xlu0 %v3042_v3  ;;  %v2841_v3 = vsel %vm2777_vm6, %v2745_v54, %v2809_v63  ;;  %v8583_v54 = vld [vmem:[#allocation35_spill] sm:$0xff]  ;;  %v2845_v63 = vsel %vm2781_vm7, %v2749_v6, %v2813_v33 }
 0x5ec   : > { %3052 = vadd.xlane.f32.xlu1 %v3051_v49  ;;  %v2889_v49 = vsel %vm1488_vm4, %v2853_v16, 0.0  ;;  %v2873_v42 = vmul.f32 %v7251_v45, %v2841_v3  ;;  %v2892_v59 = vsel %vm1488_vm4, %v2854_v17, 0.0 }
 0x5ee   : > { %v3045_v3 = vsel %vm947_vm2, %v2873_v42, 0.0 }
 0x5ef   : > { %2959 = vadd.xlane.f32.xlu0 %v2958_v36  ;;  %v2696_v36 = vadd.f32 %v7217_v35, %v7185_v15 }
 0x5f0   : > { %2992 = vadd.xlane.f32.xlu1 %v2991_v34  ;;  %v2949_v34 = vsel %vm1488_vm4, %v2873_v42, 0.0  ;;  %v2895_v42 = vsel %vm1488_vm4, %v2855_v5, 0.0  ;;  %v8587_v5 = vld [vmem:[#allocation39_spill] sm:$0xff] }
 0x5f1   : > { %v2728_v52 = vadd.f32 %v2696_v36, %v8583_v54 }
 0x5f3   : > { %3055 = vadd.xlane.f32.xlu0 %v3054_v50  ;;  %v8584_v50 = vld [vmem:[#allocation42_spill] sm:$0xff]  ;;  %vm2760_vm5 = vcmp.gt.f32.partialorder %v2728_v52, 0.0 }
 0x5f4   : > { %2908 = vadd.xlane.f32.xlu1 %v2907_v29  ;;  %v2751_v35 = vadd.f32 %v7318_v41, %v8584_v50  ;;  %v2792_v29 = vmul.f32 0.2, %v2728_v52  ;;  %v8585_v41 = vld [vmem:[#allocation37_spill] sm:$0xff] }
 0x5f5   : > { %v2732_v33 = vadd.f32 %v2700_v55, %v8585_v41 }
 0x5f6   : > { %v2815_v36 = vmul.f32 0.2, %v2751_v35  ;;  %vm2783_vm6 = vcmp.gt.f32.partialorder %v2751_v35, 0.0  ;;  %v2824_v6 = vsel %vm2760_vm5, %v2728_v52, %v2792_v29 }
 0x5f7   : > { %2890 = vadd.xlane.f32.xlu0 %v2889_v49  ;;  %v2877_v49 = vmul.f32 %v7251_v45, %v2845_v63  ;;  %v2856_v63 = vmul.f32 %v7251_v45, %v2824_v6  ;;  %vm2764_vm7 = vcmp.gt.f32.partialorder %v2732_v33, 0.0  ;;  %v8588_v6 = vld [vmem:[#allocation46_spill] sm:$0xff] }
 0x5f8   : > { %3004 = vadd.xlane.f32.xlu1 %v3003_v11  ;;  %v2988_v11 = vsel %vm947_vm2, %v2854_v17, 0.0  ;;  %v2847_v13 = vsel %vm2783_vm6, %v2751_v35, %v2815_v36  ;;  %v2714_v17 = vadd.f32 %v7278_v28, %v7185_v15  ;;  %v2733_v28 = vadd.f32 %v7345_v40, %v8588_v6 }
 0x5f9   : > { %v2961_v16 = vsel %vm1488_vm4, %v2877_v49, 0.0  ;;  %v3057_v52 = vsel %vm947_vm2, %v2877_v49, 0.0  ;;  %v2879_v55 = vmul.f32 %v7251_v45, %v2847_v13  ;;  %v2898_v35 = vsel %vm1488_vm4, %v2856_v63, 0.0 }
 0x5fa   : > { %v2994_v49 = vsel %vm947_vm2, %v2856_v63, 0.0  ;;  %v8589_v63 = vld [vmem:[#allocation41_spill] sm:$0xff] }
 0x5fb   : > { %2893 = vadd.xlane.f32.xlu0 %v2892_v59  ;;  %v8586_v59 = vld [vmem:[#allocation44_spill] sm:$0xff]  ;;  %v2967_v36 = vsel %vm1488_vm4, %v2879_v55, 0.0 }
 0x5fc   : > { %2950 = vadd.xlane.f32.xlu1 %v2949_v34  ;;  %v2729_v34 = vadd.f32 %v7323_v14, %v8586_v59 }
 0x5fe   : > { %v2793_v29 = vmul.f32 0.2, %v2729_v34  ;;  %vm2761_vm5 = vcmp.gt.f32.partialorder %v2729_v34, 0.0 }
 0x5ff   : > { %2986 = vadd.xlane.f32.xlu0 %v2985_v23  ;;  %v2796_v23 = vmul.f32 0.2, %v2732_v33 }
 0x600   : > { %3046 = vadd.xlane.f32.xlu1 %v3045_v3  ;;  %v2746_v3 = vadd.f32 %v2714_v17, %v8587_v5  ;;  %v2797_v17 = vmul.f32 0.2, %v2733_v28 }
 0x601   : > { %v2828_v14 = vsel %vm2764_vm7, %v2732_v33, %v2796_v23  ;;  %v3063_v33 = vsel %vm947_vm2, %v2879_v55, 0.0  ;;  %vm2765_vm7 = vcmp.gt.f32.partialorder %v2733_v28, 0.0 }
 0x602   : > { %v2810_v13 = vmul.f32 0.2, %v2746_v3  ;;  %vm2778_vm6 = vcmp.gt.f32.partialorder %v2746_v3, 0.0 }
 0x603   : > { %2989 = vadd.xlane.f32.xlu0 %v2988_v11  ;;  %v2825_v11 = vsel %vm2761_vm5, %v2729_v34, %v2793_v29 }
 0x604   : > { %2962 = vadd.xlane.f32.xlu1 %v2961_v16  ;;  %v2860_v16 = vmul.f32 %v7251_v45, %v2828_v14  ;;  %v2857_v23 = vmul.f32 %v7251_v45, %v2825_v11  ;;  %v2842_v40 = vsel %vm2778_vm6, %v2746_v3, %v2810_v13  ;;  %v8590_v14 = vld [vmem:[#allocation48_spill] sm:$0xff] }
 0x606   : > { %v2910_v34 = vsel %vm1488_vm4, %v2860_v16, 0.0  ;;  %v2901_v29 = vsel %vm1488_vm4, %v2857_v23, 0.0  ;;  %v3006_v55 = vsel %vm947_vm2, %v2860_v16, 0.0  ;;  %v2997_v3 = vsel %vm947_vm2, %v2857_v23, 0.0  ;;  %v8591_v16 = vld [vmem:[#allocation43_spill] sm:$0xff] }
 0x607   : > { %2896 = vadd.xlane.f32.xlu0 %v2895_v42  ;;  %v2718_v42 = vadd.f32 %v7282_v9, %v7185_v15  ;;  %v2735_v9 = vadd.f32 %v7358_v44, %v8590_v14 }
 0x608   : > { %3058 = vadd.xlane.f32.xlu1 %v3057_v52 }
 0x609   : > { %v2750_v52 = vadd.f32 %v2718_v42, %v8589_v63  ;;  %v2799_v42 = vmul.f32 0.2, %v2735_v9  ;;  %vm2767_vm6 = vcmp.gt.f32.partialorder %v2735_v9, 0.0 }
 0x60b   : > { %2899 = vadd.xlane.f32.xlu0 %v2898_v35  ;;  %v2829_v35 = vsel %vm2765_vm7, %v2733_v28, %v2797_v17  ;;  %v2814_v11 = vmul.f32 0.2, %v2750_v52  ;;  %vm2782_vm5 = vcmp.gt.f32.partialorder %v2750_v52, 0.0 }
 0x60c   : > { %2968 = vadd.xlane.f32.xlu1 %v2967_v36  ;;  %v2874_v36 = vmul.f32 %v7251_v45, %v2842_v40  ;;  %v2861_v13 = vmul.f32 %v7251_v45, %v2829_v35  ;;  %v8592_v40 = vld [vmem:[#allocation50_spill] sm:$0xff] }
 0x60d   : > { %v2846_v44 = vsel %vm2782_vm5, %v2750_v52, %v2814_v11 }
 0x60e   : > { %v2952_v28 = vsel %vm1488_vm4, %v2874_v36, 0.0  ;;  %v2913_v17 = vsel %vm1488_vm4, %v2861_v13, 0.0  ;;  %v3048_v23 = vsel %vm947_vm2, %v2874_v36, 0.0  ;;  %v3009_v52 = vsel %vm947_vm2, %v2861_v13, 0.0 }
 0x60f   : > { %2995 = vadd.xlane.f32.xlu0 %v2994_v49  ;;  %v2720_v49 = vadd.f32 %v7305_v8, %v7185_v15  ;;  %v2753_v8 = vadd.f32 %v7372_v26, %v8592_v40 }
 0x610   : > { %3064 = vadd.xlane.f32.xlu1 %v3063_v33 }
 0x611   : > { %v2752_v33 = vadd.f32 %v2720_v49, %v8591_v16  ;;  %v2817_v49 = vmul.f32 0.2, %v2753_v8  ;;  %vm2785_vm5 = vcmp.gt.f32.partialorder %v2753_v8, 0.0 }
 0x613   : > { %2911 = vadd.xlane.f32.xlu0 %v2910_v34  ;;  %v2831_v34 = vsel %vm2767_vm6, %v2735_v9, %v2799_v42  ;;  %v2816_v35 = vmul.f32 0.2, %v2752_v33  ;;  %vm2784_vm7 = vcmp.gt.f32.partialorder %v2752_v33, 0.0  ;;  %v8593_v9 = vld [vmem:[#allocation51_spill] sm:$0xff]  ;;  %v8594_v42 = vld [vmem:[#allocation45_spill] sm:$0xff] }
 0x614   : > { %2902 = vadd.xlane.f32.xlu1 %v2901_v29  ;;  %v2878_v29 = vmul.f32 %v7251_v45, %v2846_v44  ;;  %v2863_v11 = vmul.f32 %v7251_v45, %v2831_v34 }
 0x615   : > { %v2848_v36 = vsel %vm2784_vm7, %v2752_v33, %v2816_v35 }
 0x616   : > { %v2964_v26 = vsel %vm1488_vm4, %v2878_v29, 0.0  ;;  %v2919_v44 = vsel %vm1488_vm4, %v2863_v11, 0.0  ;;  %v2880_v34 = vmul.f32 %v7251_v45, %v2848_v36 }
 0x617   : > { %3007 = vadd.xlane.f32.xlu0 %v3006_v55  ;;  %v2698_v55 = vadd.f32 %v7309_v58, %v7185_v15  ;;  %v2849_v58 = vsel %vm2785_vm5, %v2753_v8, %v2817_v49 }
 0x618   : > { %2998 = vadd.xlane.f32.xlu1 %v2997_v3  ;;  %v2737_v3 = vadd.f32 %v7377_v61, %v8593_v9  ;;  %v2702_v61 = vadd.f32 %v7328_v7, %v7185_v15  ;;  %v2881_v33 = vmul.f32 %v7251_v45, %v2849_v58  ;;  %v2970_v8 = vsel %vm1488_vm4, %v2880_v34, 0.0 }
 0x619   : > { %v3066_v7 = vsel %vm947_vm2, %v2880_v34, 0.0 }
 0x61a   : > { %v2801_v13 = vmul.f32 0.2, %v2737_v3  ;;  %vm2769_vm6 = vcmp.gt.f32.partialorder %v2737_v3, 0.0 }
 0x61b   : > { %2953 = vadd.xlane.f32.xlu0 %v2952_v28  ;;  %v2730_v28 = vadd.f32 %v2698_v55, %v8594_v42 }
 0x61c   : > { %2914 = vadd.xlane.f32.xlu1 %v2913_v17  ;;  %v3060_v17 = vsel %vm947_vm2, %v2878_v29, 0.0  ;;  %v2833_v35 = vsel %vm2769_vm6, %v2737_v3, %v2801_v13  ;;  %v8595_v29 = vld [vmem:[#allocation47_spill] sm:$0xff]  ;;  %v2704_v3 = vadd.f32 %v7339_v31, %v7185_v15  ;;  %v2722_v31 = vadd.f32 %v7354_v43, %v7185_v15  ;;  %v8598_v43 = vld [vmem:[#allocation53_spill] sm:$0xff] }
 0x61d   : > { %vm2762_vm7 = vcmp.gt.f32.partialorder %v2730_v28, 0.0  ;;  %v2734_v49 = vadd.f32 %v2702_v61, %v8595_v29  ;;  %v2865_v36 = vmul.f32 %v7251_v45, %v2833_v35 }
 0x61f   : > { %3049 = vadd.xlane.f32.xlu0 %v3048_v23  ;;  %v2794_v23 = vmul.f32 0.2, %v2730_v28  ;;  %v2925_v58 = vsel %vm1488_vm4, %v2865_v36, 0.0  ;;  %vm2766_vm5 = vcmp.gt.f32.partialorder %v2734_v49, 0.0  ;;  %v3021_v61 = vsel %vm947_vm2, %v2865_v36, 0.0 }
 0x620   : > { %3010 = vadd.xlane.f32.xlu1 %v3009_v52  ;;  %v3015_v52 = vsel %vm947_vm2, %v2863_v11, 0.0 }
 0x621   : > { %v2826_v55 = vsel %vm2762_vm7, %v2730_v28, %v2794_v23 }
 0x622   : > { %v2858_v11 = vmul.f32 %v7251_v45, %v2826_v55 }
 0x623   : > { %2965 = vadd.xlane.f32.xlu0 %v2964_v26  ;;  %v2973_v26 = vsel %vm1488_vm4, %v2881_v33, 0.0 }
 0x624   : > { %2920 = vadd.xlane.f32.xlu1 %v2919_v44  ;;  %v2798_v44 = vmul.f32 0.2, %v2734_v49  ;;  %v2904_v28 = vsel %vm1488_vm4, %v2858_v11, 0.0  ;;  %v3000_v34 = vsel %vm947_vm2, %v2858_v11, 0.0 }
 0x626   : > { %v2830_v13 = vsel %vm2766_vm5, %v2734_v49, %v2798_v44 }
 0x627   : > { %3061 = vadd.xlane.f32.xlu0 %v3060_v17  ;;  %v8596_v17 = vld [vmem:[#allocation49_spill] sm:$0xff] }
 0x628   : > { %3016 = vadd.xlane.f32.xlu1 %v3015_v52  ;;  %v2736_v23 = vadd.f32 %v2704_v3, %v8596_v17  ;;  %v2862_v52 = vmul.f32 %v7251_v45, %v2830_v13 }
 0x62a   : > { %v2800_v35 = vmul.f32 0.2, %v2736_v23  ;;  %vm2768_vm6 = vcmp.gt.f32.partialorder %v2736_v23, 0.0  ;;  %v2916_v55 = vsel %vm1488_vm4, %v2862_v52, 0.0  ;;  %v3012_v11 = vsel %vm947_vm2, %v2862_v52, 0.0 }
 0x62b   : > { %2971 = vadd.xlane.f32.xlu0 %v2970_v8  ;;  %v3069_v8 = vsel %vm947_vm2, %v2881_v33, 0.0 }
 0x62c   : > { %2974 = vadd.xlane.f32.xlu1 %v2973_v26  ;;  %v2832_v49 = vsel %vm2768_vm6, %v2736_v23, %v2800_v35  ;;  %v8597_v26 = vld [vmem:[#allocation52_spill] sm:$0xff] }
 0x62d   : > { %v2754_v36 = vadd.f32 %v2722_v31, %v8597_v26  ;;  %v2864_v44 = vmul.f32 %v7251_v45, %v2832_v49 }
 0x62f   : > { %3067 = vadd.xlane.f32.xlu0 %v3066_v7  ;;  %v2706_v7 = vadd.f32 %v7361_v37, %v7185_v15  ;;  %v2818_v3 = vmul.f32 0.2, %v2754_v36  ;;  %vm2786_vm7 = vcmp.gt.f32.partialorder %v2754_v36, 0.0  ;;  %v2922_v33 = vsel %vm1488_vm4, %v2864_v44, 0.0 }
 0x630   : > { %2926 = vadd.xlane.f32.xlu1 %v2925_v58  ;;  %v3018_v23 = vsel %vm947_vm2, %v2864_v44, 0.0 }
 0x631   : > { %v2738_v58 = vadd.f32 %v2706_v7, %v8598_v43 }
 0x633   : > { %2905 = vadd.xlane.f32.xlu0 %v2904_v28  ;;  %v2850_v28 = vsel %vm2786_vm7, %v2754_v36, %v2818_v3  ;;  %v2802_v13 = vmul.f32 0.2, %v2738_v58  ;;  %vm2770_vm5 = vcmp.gt.f32.partialorder %v2738_v58, 0.0 }
 0x634   : > { %3022 = vadd.xlane.f32.xlu1 %v3021_v61  ;;  %v2882_v61 = vmul.f32 %v7251_v45, %v2850_v28 }
 0x635   : > { %v2834_v37 = vsel %vm2770_vm5, %v2738_v58, %v2802_v13 }
 0x636   : > { %v2866_v52 = vmul.f32 %v7251_v45, %v2834_v37 }
 0x637   : > { %3001 = vadd.xlane.f32.xlu0 %v3000_v34  ;;  %v2976_v34 = vsel %vm1488_vm4, %v2882_v61, 0.0 }
 0x638   : > { %3070 = vadd.xlane.f32.xlu1 %v3069_v8  ;;  %v2928_v35 = vsel %vm1488_vm4, %v2866_v52, 0.0  ;;  %v3024_v31 = vsel %vm947_vm2, %v2866_v52, 0.0  ;;  %v3072_v8 = vsel %vm947_vm2, %v2882_v61, 0.0 }
 0x63b   : > { %2917 = vadd.xlane.f32.xlu0 %v2916_v55 }
 0x63f   : > { %3013 = vadd.xlane.f32.xlu0 %v3012_v11 }
 0x643   : > { %2923 = vadd.xlane.f32.xlu0 %v2922_v33 }
 0x647   : > { %3019 = vadd.xlane.f32.xlu0 %v3018_v23 }
 0x64b   : > { %2977 = vadd.xlane.f32.xlu0 %v2976_v34 }
 0x64f   : > { %2929 = vadd.xlane.f32.xlu0 %v2928_v35 }
 0x653   : > { %3025 = vadd.xlane.f32.xlu0 %v3024_v31 }
 0x657   : > { %3073 = vadd.xlane.f32.xlu0 %v3072_v8 }
 0x658   : > { %v2936_v55 = vpop.xlane.xlu0 %2935 }
 0x659   : > { %v7489_v49 = vpop.xlane.xlu1 %2932 }
 0x65c   : > { %v7491_v36 = vpop.xlane.xlu0 %3031 }
 0x65d   : > { %v7493_v7 = vpop.xlane.xlu1 %3028  ;;  %v3092_v27 = vsub.f32 %v2936_v55, %v7491_v36  ;;  %v3218_v10 = vrot.slane %v7491_v36, %v6893_v32 }
 0x65e   : > { %v3091_v24 = vsub.f32 %v7489_v49, %v7493_v7  ;;  %v3214_v55 = vrot.slane %v7493_v7, %v6899_v21 }
 0x65f   : > { %v3521_v49 = vrot.slane %v3092_v27, %v6893_v32 }
 0x660   : > { %v7495_v11 = vpop.xlane.xlu0 %2887 }
 0x661   : > { %v7497_v45 = vpop.xlane.xlu1 %2884 }
 0x664   : > { %v7499_v44 = vpop.xlane.xlu0 %2980 }
 0x665   : > { %v7501_v3 = vpop.xlane.xlu1 %2938  ;;  %v3075_v4 = vsub.f32 %v7497_v45, %v7499_v44 }
 0x668   : > { %v7503_v58 = vpop.xlane.xlu0 %2983 }
 0x669   : > { %v7505_v33 = vpop.xlane.xlu1 %3034  ;;  %v3076_v46 = vsub.f32 %v7495_v11, %v7503_v58  ;;  %v3146_v27 = vrot.slane %v7503_v58, %v6893_v32  ;;  %v3445_v58 = vrot.slane %v3075_v4, %v6899_v21 }
 0x66a   : > { %v3093_v19 = vsub.f32 %v7501_v3, %v7505_v33  ;;  %v3517_v3 = vrot.slane %v3091_v24, %v6899_v21  ;;  %v3223_v36 = vrot.slane %v7505_v33, %v6899_v21 }
 0x66b   : > { %v3449_v45 = vrot.slane %v3076_v46, %v6893_v32 }
 0x66c   : > { %v2942_v28 = vpop.xlane.xlu0 %2941 }
 0x66d   : > { %v7507_v13 = vpop.xlane.xlu1 %2944  ;;  %v3450_v4 = vsel %vm1758_vm8, %v3449_v45, %v3445_v58 }
 0x670   : > { %v3038_v23 = vpop.xlane.xlu0 %3037 }
 0x671   : > { %v7509_v61 = vpop.xlane.xlu1 %3040  ;;  %v3094_v57 = vsub.f32 %v2942_v28, %v3038_v23  ;;  %v3227_v28 = vrot.slane %v3038_v23, %v6893_v32 }
 0x672   : > { %v3095_v7 = vsub.f32 %v7507_v13, %v7509_v61  ;;  %v3232_v33 = vrot.slane %v7509_v61, %v6899_v21 }
 0x673   : > { %v3530_v11 = vrot.slane %v3094_v57, %v6893_v32  ;;  %v3526_v57 = vrot.slane %v3093_v19, %v6899_v21  ;;  %v3228_v24 = vsel %vm1758_vm8, %v3227_v28, %v3223_v36 }
 0x674   : > { %v2948_v37 = vpop.xlane.xlu0 %2947  ;;  %v3535_v61 = vrot.slane %v3095_v7, %v6899_v21 }
 0x675   : > { %v7511_v34 = vpop.xlane.xlu1 %2956  ;;  %v3531_v46 = vsel %vm1758_vm8, %v3530_v11, %v3526_v57 }
 0x678   : > { %v7513_v52 = vpop.xlane.xlu0 %3043 }
 0x679   : > { %v7515_v35 = vpop.xlane.xlu1 %3052  ;;  %v3096_v12 = vsub.f32 %v2948_v37, %v7513_v52  ;;  %v3236_v23 = vrot.slane %v7513_v52, %v6893_v32  ;;  %v3219_v37 = vsel %vm1758_vm8, %v3218_v10, %v3214_v55  ;;  %v3142_v52 = vrot.slane %v7499_v44, %v6899_v21 }
 0x67a   : > { %v3522_v55 = vsel %vm1758_vm8, %v3521_v49, %v3517_v3  ;;  %v3099_v28 = vsub.f32 %v7511_v34, %v7515_v35  ;;  %v3290_v11 = vsel %vm1895_vm9, %v3228_v24, %v3219_v37 }
 0x67b   : > { %v3539_v1 = vrot.slane %v3096_v12, %v6893_v32  ;;  %v3237_v12 = vsel %vm1758_vm8, %v3236_v23, %v3232_v33  ;;  %v3147_v44 = vsel %vm1758_vm8, %v3146_v27, %v3142_v52  ;;  %v3593_v36 = vsel %vm1895_vm9, %v3531_v46, %v3522_v55 }
 0x67c   : > { %v7517_v31 = vpop.xlane.xlu0 %2959  ;;  %v7643_v34 = vsel %vm1897_vm10, %v3237_v12, %v3290_v11  ;;  %v3250_v23 = vrot.slane %v7515_v35, %v6899_v21 }
 0x67d   : > { %v7519_v8 = vpop.xlane.xlu1 %2992  ;;  %v3540_v49 = vsel %vm1758_vm8, %v3539_v1, %v3535_v61  ;;  %v3553_v1 = vrot.slane %v3099_v28, %v6899_v21 }
 0x67e   : > { %v3594_v35 = vsel %vm1897_vm10, %v3540_v49, %v3593_v36 }
 0x680   : > { %v7521_v43 = vpop.xlane.xlu0 %3055 }
 0x681   : > { %v7523_v26 = vpop.xlane.xlu1 %2908  ;;  %v3100_v19 = vsub.f32 %v7517_v31, %v7521_v43  ;;  %v3254_v3 = vrot.slane %v7521_v43, %v6893_v32 }
 0x683   : > { %v3557_v27 = vrot.slane %v3100_v19, %v6893_v32 }
 0x684   : > { %v7525_v17 = vpop.xlane.xlu0 %2890 }
 0x685   : > { %v7527_v29 = vpop.xlane.xlu1 %3004  ;;  %v3558_v58 = vsel %vm1758_vm8, %v3557_v27, %v3553_v1 }
 0x686   : > { %v3083_v43 = vsub.f32 %v7523_v26, %v7527_v29  ;;  %v7668_v26 = vsel %vm1758_vm8, %v3254_v3, %v3250_v23 }
 0x688   : > { %v7529_v42 = vpop.xlane.xlu0 %2893  ;;  %v3481_v55 = vrot.slane %v3083_v43, %v6899_v21 }
 0x689   : > { %v7531_v9 = vpop.xlane.xlu1 %2950 }
 0x68c   : > { %v7533_v40 = vpop.xlane.xlu0 %2986 }
 0x68d   : > { %v7535_v16 = vpop.xlane.xlu1 %3046 }
 0x68e   : > { %v3241_v12 = vrot.slane %v7535_v16, %v6899_v21 }
 0x690   : > { %v7537_v14 = vpop.xlane.xlu0 %2989 }
 0x691   : > { %v7539_v63 = vpop.xlane.xlu1 %2962  ;;  %v3078_v31 = vsub.f32 %v7529_v42, %v7537_v14  ;;  %v3077_v42 = vsub.f32 %v7525_v17, %v7533_v40  ;;  %v3160_v17 = vrot.slane %v7519_v8, %v6899_v21 }
 0x693   : > { %v3458_v24 = vrot.slane %v3078_v31, %v6893_v32  ;;  %v3454_v46 = vrot.slane %v3077_v42, %v6899_v21 }
 0x694   : > { %v7541_v6 = vpop.xlane.xlu0 %2896 }
 0x695   : > { %v7543_v5 = vpop.xlane.xlu1 %3058  ;;  %v3079_v57 = vsub.f32 %v7541_v6, %v7519_v8  ;;  %v3178_v8 = vrot.slane %v7527_v29, %v6899_v21  ;;  %v3459_v29 = vsel %vm1758_vm8, %v3458_v24, %v3454_v46 }
 0x697   : > { %v3463_v61 = vrot.slane %v3079_v57, %v6899_v21 }
 0x698   : > { %v7545_v59 = vpop.xlane.xlu0 %2899 }
 0x699   : > { %v7549_v50 = vpop.xlane.xlu1 %2968 }
 0x69c   : > { %v7547_v41 = vpop.xlane.xlu0 %2995 }
 0x69d   : > { %v7553_v56 = vpop.xlane.xlu1 %3064  ;;  %v3080_v7 = vsub.f32 %v7545_v59, %v7547_v41  ;;  %v3155_v59 = vrot.slane %v7537_v14, %v6893_v32  ;;  %v3164_v33 = vrot.slane %v7547_v41, %v6893_v32  ;;  %v3151_v14 = vrot.slane %v7533_v40, %v6899_v21 }
 0x69e   : > { %v3097_v41 = vsub.f32 %v7531_v9, %v7535_v16  ;;  %v3103_v9 = vsub.f32 %v7549_v50, %v7553_v56 }
 0x69f   : > { %v3467_v6 = vrot.slane %v3080_v7, %v6893_v32  ;;  %v3156_v40 = vsel %vm1758_vm8, %v3155_v59, %v3151_v14  ;;  %v3165_v28 = vsel %vm1758_vm8, %v3164_v33, %v3160_v17 }
 0x6a0   : > { %v7551_v54 = vpop.xlane.xlu0 %2911  ;;  %v3544_v16 = vrot.slane %v3097_v41, %v6899_v21  ;;  %v3283_v3 = vsel %vm1895_vm9, %v3156_v40, %v3147_v44 }
 0x6a1   : > { %v7559_v39 = vpop.xlane.xlu1 %2902  ;;  %v3468_v11 = vsel %vm1758_vm8, %v3467_v6, %v3463_v61  ;;  %v3284_v44 = vsel %vm1897_vm10, %v3165_v28, %v3283_v3 }
 0x6a4   : > { %v7555_v30 = vpop.xlane.xlu0 %3007 }
 0x6a5   : > { %v7563_v25 = vpop.xlane.xlu1 %2998  ;;  %v3084_v31 = vsub.f32 %v7551_v54, %v7555_v30  ;;  %v3182_v7 = vrot.slane %v7555_v30, %v6893_v32  ;;  %v3586_v54 = vsel %vm1895_vm9, %v3459_v29, %v3450_v4  ;;  %v3268_v30 = vrot.slane %v7553_v56, %v6899_v21 }
 0x6a6   : > { %v3081_v42 = vsub.f32 %v7559_v39, %v7563_v25  ;;  %v3587_v1 = vsel %vm1897_vm10, %v3468_v11, %v3586_v54  ;;  %v3169_v33 = vrot.slane %v7563_v25, %v6899_v21 }
 0x6a7   : > { %v3485_v4 = vrot.slane %v3084_v31, %v6893_v32  ;;  %v3183_v39 = vsel %vm1758_vm8, %v3182_v7, %v3178_v8 }
 0x6a8   : > { %v7557_v0 = vpop.xlane.xlu0 %2953  ;;  %v3472_v14 = vrot.slane %v3081_v42, %v6899_v21 }
 0x6a9   : > { %v7569_v18 = vpop.xlane.xlu1 %2914  ;;  %v3486_v25 = vsel %vm1758_vm8, %v3485_v4, %v3481_v55 }
 0x6ac   : > { %v7561_v22 = vpop.xlane.xlu0 %3049 }
 0x6ad   : > { %v7573_v60 = vpop.xlane.xlu1 %3010  ;;  %v3098_v52 = vsub.f32 %v7557_v0, %v7561_v22  ;;  %v3101_v0 = vsub.f32 %v7539_v63, %v7543_v5  ;;  %v3245_v36 = vrot.slane %v7561_v22, %v6893_v32  ;;  %v3259_v22 = vrot.slane %v7543_v5, %v6899_v21 }
 0x6ae   : > { %v3085_v6 = vsub.f32 %v7569_v18, %v7573_v60  ;;  %v3187_v41 = vrot.slane %v7573_v60, %v6899_v21 }
 0x6af   : > { %v3548_v63 = vrot.slane %v3098_v52, %v6893_v32  ;;  %v3562_v27 = vrot.slane %v3101_v0, %v6899_v21  ;;  %v3246_v43 = vsel %vm1758_vm8, %v3245_v36, %v3241_v12 }
 0x6b0   : > { %v7565_v53 = vpop.xlane.xlu0 %2965  ;;  %v3490_v55 = vrot.slane %v3085_v6, %v6899_v21 }
 0x6b1   : > { %v7582_v2 = vpop.xlane.xlu1 %2920  ;;  %v3549_v5 = vsel %vm1758_vm8, %v3548_v63, %v3544_v16 }
 0x6b4   : > { %v7567_v51 = vpop.xlane.xlu0 %3061 }
 0x6b5   : > { %v7616_v13 = vpop.xlane.xlu1 %3016  ;;  %v3263_v59 = vrot.slane %v7567_v51, %v6893_v32  ;;  %v3102_v57 = vsub.f32 %v7565_v53, %v7567_v51  ;;  %v3292_v51 = vsel %vm1899_vm11, %v3246_v43, %v7643_v34  ;;  %v3595_v53 = vsel %vm1899_vm11, %v3549_v5, %v3594_v35 }
 0x6b6   : > { %v3293_v60 = vsel %vm1901_vm12, %v7668_v26, %v3292_v51  ;;  %v3596_v0 = vsel %vm1901_vm12, %v3558_v58, %v3595_v53  ;;  %v3196_v12 = vrot.slane %v7616_v13, %v6899_v21 }
 0x6b7   : > { %v3264_v18 = vsel %vm1758_vm8, %v3263_v59, %v3259_v22  ;;  %v3566_v34 = vrot.slane %v3102_v57, %v6893_v32 }
 0x6b8   : > { %v7571_v62 = vpop.xlane.xlu0 %2971 }
 0x6b9   : > { %v7659_v37 = vpop.xlane.xlu1 %2974  ;;  %v3567_v58 = vsel %vm1758_vm8, %v3566_v34, %v3562_v27 }
 0x6bc   : > { %v7575_v38 = vpop.xlane.xlu0 %3067 }
 0x6bd   : > { %v7698_v49 = vpop.xlane.xlu1 %2926  ;;  %v3104_v35 = vsub.f32 %v7571_v62, %v7575_v38  ;;  %v3294_v62 = vsel %vm1903_vm13, %v3264_v18, %v3293_v60 }
 0x6c0   : > { %v7578_v48 = vpop.xlane.xlu0 %2905 }
 0x6c1   : > { %v3023_v52 = vpop.xlane.xlu1 %3022 }
 0x6c2   : > { %v3205_v54 = vrot.slane %v3023_v52, %v6899_v21 }
 0x6c4   : > { %v7598_v15 = vpop.xlane.xlu0 %3001 }
 0x6c5   : > { %v3082_v50 = vsub.f32 %v7578_v48, %v7598_v15  ;;  %v7719_v48 = vrot.slane %v3103_v9, %v6899_v21  ;;  %v3173_v46 = vrot.slane %v7598_v15, %v6893_v32  ;;  %v3089_v9 = vsub.f32 %v7698_v49, %v3023_v52  ;;  %v3071_v31 = vpop.xlane.xlu1 %3070 }
 0x6c7   : > { %v3476_v17 = vrot.slane %v3082_v50, %v6893_v32  ;;  %v3508_v42 = vrot.slane %v3089_v9, %v6899_v21 }
 0x6c8   : > { %v7624_v10 = vpop.xlane.xlu0 %2917 }
 0x6cc   : > { %v7650_v45 = vpop.xlane.xlu0 %3013 }
 0x6cd   : > { %v3086_v56 = vsub.f32 %v7624_v10, %v7650_v45  ;;  %v3087_v10 = vsub.f32 %v7582_v2, %v7616_v13  ;;  %v3477_v2 = vsel %vm1758_vm8, %v3476_v17, %v3472_v14  ;;  %v3191_v26 = vrot.slane %v7650_v45, %v6893_v32 }
 0x6ce   : > { %v3588_v11 = vsel %vm1899_vm11, %v3477_v2, %v3587_v1  ;;  %v3575_v13 = vrot.slane %v3104_v35, %v6893_v32  ;;  %v3105_v45 = vsub.f32 %v7659_v37, %v3071_v31 }
 0x6cf   : > { %v3494_v40 = vrot.slane %v3086_v56, %v6893_v32  ;;  %v3499_v29 = vrot.slane %v3087_v10, %v6899_v21  ;;  %v3589_v22 = vsel %vm1901_vm12, %v3486_v25, %v3588_v11 }
 0x6d0   : > { %v2924_v19 = vpop.xlane.xlu0 %2923  ;;  %v3576_v6 = vsel %vm1758_vm8, %v3575_v13, %v7719_v48 }
 0x6d1   : > { %v3495_v36 = vsel %vm1758_vm8, %v3494_v40, %v3490_v55  ;;  %v8599_v55 = vld [vmem:[#allocation54_spill] sm:$0xff] }
 0x6d4   : > { %v7706_v23 = vpop.xlane.xlu0 %3019 }
 0x6d5   : > { %v3088_v8 = vsub.f32 %v2924_v19, %v7706_v23  ;;  %v3272_v19 = vrot.slane %v7575_v38, %v6893_v32  ;;  %v3174_v38 = vsel %vm1758_vm8, %v3173_v46, %v3169_v33  ;;  %v3200_v63 = vrot.slane %v7706_v23, %v6893_v32 }
 0x6d6   : > { %v3285_v3 = vsel %vm1899_vm11, %v3174_v38, %v3284_v44  ;;  %v3192_v23 = vsel %vm1758_vm8, %v3191_v26, %v3187_v41  ;;  %v3590_v44 = vsel %vm1903_vm13, %v3495_v36, %v3589_v22  ;;  %v3580_v33 = vrot.slane %v3105_v45, %v6899_v21  ;;  %v8601_v45 = vld [vmem:[#allocation18_spill] sm:$0xff] }
 0x6d7   : > { %v3503_v61 = vrot.slane %v3088_v8, %v6893_v32  ;;  %v3273_v28 = vsel %vm1758_vm8, %v3272_v19, %v3268_v30  ;;  %v3277_v30 = vrot.slane %v3071_v31, %v6899_v21  ;;  %v3201_v4 = vsel %vm1758_vm8, %v3200_v63, %v3196_v12  ;;  %v5709_v22 = vld [vmem:[%s7051_s17 + $0x8] sm:$0xff] }
 0x6d8   : > { %v7732_v24 = vpop.xlane.xlu0 %2977  ;;  %v3295_v27 = vsel %vm1905_vm14, %v3273_v28, %v3294_v62  ;;  %v3286_v37 = vsel %vm1901_vm12, %v3183_v39, %v3285_v3  ;;  %v3597_v46 = vsel %vm1903_vm13, %v3567_v58, %v3596_v0 }
 0x6d9   : > { %v3504_v50 = vsel %vm1758_vm8, %v3503_v61, %v3499_v29  ;;  %v3287_v52 = vsel %vm1903_vm13, %v3192_v23, %v3286_v37  ;;  %v3598_v18 = vsel %vm1905_vm14, %v3576_v6, %v3597_v46  ;;  %v8600_v61 = vld [vmem:[#allocation15_spill] sm:$0xff] }
 0x6da   : > { %v3591_v5 = vsel %vm1905_vm14, %v3504_v50, %v3590_v44  ;;  %v3288_v51 = vsel %vm1905_vm14, %v3201_v4, %v3287_v52  ;;  %v5647_v60 = vpack.i.bf16 %v8600_v61, %v8599_v55  ;;  %v8604_v37 = vld [vmem:[#allocation19_spill] sm:$0xff] }
 0x6dc   : > { %v2930_v15 = vpop.xlane.xlu0 %2929 }
 0x6e0   : > { %v3026_v16 = vpop.xlane.xlu0 %3025 }
 0x6e1   : > { %v3090_v7 = vsub.f32 %v2930_v15, %v3026_v16  ;;  %v3209_v49 = vrot.slane %v3026_v16, %v6893_v32 }
 0x6e3   : > { %v3512_v1 = vrot.slane %v3090_v7, %v6893_v32  ;;  %v3210_v56 = vsel %vm1758_vm8, %v3209_v49, %v3205_v54  ;;  %v5708_v49 = vld [vmem:[%s7051_s17] sm:$0xff] }
 0x6e4   : > { %v3074_v43 = vpop.xlane.xlu0 %3073  ;;  %v3289_v25 = vsel %vm1907_vm15, %v3210_v56, %v3288_v51 }
 0x6e5   : > { %v3106_v59 = vsub.f32 %v7732_v24, %v3074_v43  ;;  %v3281_v57 = vrot.slane %v3074_v43, %v6893_v32  ;;  %v3513_v17 = vsel %vm1758_vm8, %v3512_v1, %v3508_v42  ;;  %v3299_v2 = vsel %vm1713_vm0, %v3289_v25, -1e+30  ;;  %v8602_v43 = vld [vmem:[#allocation20_spill] sm:$0xff] }
 0x6e6   : > { %v3592_v14 = vsel %vm1907_vm15, %v3513_v17, %v3591_v5  ;;  %v3301_v15 = vsel %vm1920_vm3, %v3299_v2, -inf  ;;  %v8603_v5 = vld [vmem:[#allocation17_spill] sm:$0xff] }
 0x6e7   : > { %v3584_v8 = vrot.slane %v3106_v59, %v6893_v32  ;;  %v3602_v39 = vsel %vm1713_vm0, %v3592_v14, -1e+30  ;;  %v3282_v24 = vsel %vm1758_vm8, %v3281_v57, %v3277_v30 }
 0x6e8   : > { %v3604_v53 = vsel %vm1920_vm3, %v3602_v39, -inf  ;;  %v3296_v10 = vsel %vm1907_vm15, %v3282_v24, %v3295_v27 }
 0x6e9   : > { %3605 = vmax.xlane.f32.xlu0 %v3604_v53  ;;  %v3300_v48 = vsel %vm1714_vm1, %v3296_v10, -1e+30  ;;  %v3585_v41 = vsel %vm1758_vm8, %v3584_v8, %v3580_v33 }
 0x6ea   : > { %v3304_v19 = vsel %vm1920_vm3, %v3300_v48, -inf  ;;  %v3599_v34 = vsel %vm1907_vm15, %v3585_v41, %v3598_v18 }
 0x6eb   : > { %3305 = vmax.xlane.f32.xlu1 %v3304_v19  ;;  %v3603_v35 = vsel %vm1714_vm1, %v3599_v34, -1e+30 }
 0x6ec   : > { %v3607_v40 = vsel %vm1920_vm3, %v3603_v35, -inf }
 0x6ed   : > { %3608 = vmax.xlane.f32.xlu0 %v3607_v40 }
 0x6ef   : > { %3302 = vmax.xlane.f32.xlu1 %v3301_v15 }
 0x700   : > { %5648 = vrot.lane.b32.xlu1 %v5647_v60, %s5914_s9 }
 0x776   : > { %v3606_v0 = vpop.xlane.xlu0 %3605 }
 0x777   : > { %v3610_v12 = vsub.f32 %v3602_v39, %v3606_v0 }
 0x778   : > { %v3306_v29 = vpop.xlane.xlu1 %3305 }
 0x779   : > { %v3612_v38 = vmul.f32 1.442695, %v3610_v12  ;;  %v3308_v62 = vsub.f32 %v3300_v48, %v3306_v29 }
 0x77a   : > { %v3609_v28 = vpop.xlane.xlu0 %3608 }
 0x77b   : > { %5673 = vpow2.f32 %v3612_v38  ;;  %v3311_v9 = vmul.f32 1.442695, %v3308_v62  ;;  %v3611_v11 = vsub.f32 %v3603_v35, %v3609_v28  ;;  %v5711_v38 = vld [vmem:[#allocation8 + $0x1] ss:$0 sm:$0xff]  ;;  %v5712_v28 = vld [vmem:[#allocation8 + $0x2] ss:$0 sm:$0xff] }
 0x77c   : > { %v3303_v31 = vpop.xlane.xlu1 %3302 }
 0x77d   : > { %5675 = vpow2.f32 %v3311_v9  ;;  %v3614_v26 = vmul.f32 1.442695, %v3611_v11  ;;  %v3307_v58 = vsub.f32 %v3299_v2, %v3303_v31  ;;  %v5710_v2 = vld [vmem:[#allocation8 + $0x3] ss:$0 sm:$0xff] }
 0x77f   : > { %5677 = vpow2.f32 %v3614_v26  ;;  %v3309_v13 = vmul.f32 1.442695, %v3307_v58 }
 0x780   : > { %v5649_v36 = vpop.permute.xlu1 %5648 }
 0x781   : > { %5679 = vpow2.f32 %v3309_v13  ;;  %v5651_v63 = vunpack.i.h.bf16 %v5649_v36  ;;  %v5650_v16 = vunpack.i.l.bf16 %v5649_v36  ;;  %v8605_v13 = vld [vmem:[#allocation21_spill] sm:$0xff] }
 0x783   : > { %v5531_v3 = vpack.c.bf16 %v5651_v63, %v5650_v16 }
 0x785   : > { %v5674_v7 = vpop.eup %5673  ;;  %5532 = vmatprep.subr.bf16.mxu0 %v5531_v3 }
 0x786   : > { %5534 = vmatpush3.bf16.msra.mxu0 %v5531_v3  ;;  %v3616_v50 = vmul.f32 %v5708_v49, %v5674_v7 }
 0x787   : > { %v5676_v54 = vpop.eup %5675  ;;  %5544 = vmatprep.subr.bf16.mxu0 %v8601_v45 }
 0x788   : > { %5448 = vmatprep.mubr.msk.f32.mxu0 %vm1920_vm3, %v3616_v50  ;;  %v3314_v27 = vmul.f32 %v5709_v22, %v5676_v54  ;;  %v3618_v59 = vsel %vm1920_vm3, %v3616_v50, 0.0 }
 0x789   : > { %v5678_v42 = vpop.eup %5677 }
 0x78a   : > { %v3318_v23 = vsel %vm1920_vm3, %v3314_v27, 0.0  ;;  %v3617_v1 = vmul.f32 %v5709_v22, %v5678_v42  ;;  %v8606_v22 = vld [vmem:[#allocation16_spill] sm:$0xff] }
 0x78b   : > { %v5680_v44 = vpop.eup %5679  ;;  %3319 = vadd.xlane.f32.xlu0 %v3318_v23 }
 0x78c   : > { %5449 = vmatmul.mubr.msk.f32.vlgmr.msra.gmra.mrb[8].mxu0 %vm1920_vm3, %v3617_v1  ;;  %v3313_v30 = vmul.f32 %v5708_v49, %v5680_v44  ;;  %v3621_v57 = vsel %vm1920_vm3, %v3617_v1, 0.0 }
 0x78d   : > { %5546 = vmatpush3.bf16.msra.mxu0 %v8601_v45 }
 0x78e   : > { %5441 = vmatprep.mubr.msk.f32.mxu1 %vm1920_vm3, %v3313_v30  ;;  %v3315_v4 = vsel %vm1920_vm3, %v3313_v30, 0.0  ;;  %5548 = vmatprep.subr.bf16.mxu0 %v8602_v43 }
 0x78f   : > { %5442 = vmatmul.mubr.msk.f32.vlgmr.msra.gmra.mrb[6].mxu1 %vm1920_vm3, %v3314_v27  ;;  %3316 = vadd.xlane.f32.xlu0 %v3315_v4 }
 0x790   : > { %5538 = vmatpush3.bf16.msra.mxu1 %v8603_v5 }
 0x791   : > { %5540 = vmatprep.subr.bf16.mxu1 %v8604_v37  ;;  %5550 = vmatpush3.bf16.msra.mxu0 %v8602_v43 }
 0x793   : > { %3619 = vadd.xlane.f32.xlu0 %v3618_v59 }
 0x794   : > { %5542 = vmatpush3.bf16.msra.mxu1 %v8604_v37 }
 0x797   : > { %3622 = vadd.xlane.f32.xlu0 %v3621_v57 }
 0x818   : > { %v3320_v17 = vpop.xlane.xlu0 %3319 }
 0x819   : > { %5681 = vrcp.f32 %v3320_v17 }
 0x81c   : > { %v3317_v56 = vpop.xlane.xlu0 %3316 }
 0x81d   : > { %5683 = vrcp.f32 %v3317_v56 }
 0x820   : > { %v3620_v33 = vpop.xlane.xlu0 %3619 }
 0x823   : > { %v5682_v52 = vpop.eup %5681 }
 0x824   : > { %v3623_v14 = vpop.xlane.xlu0 %3622 }
 0x825   : > { %5685 = vrcp.f32 %v3623_v14 }
 0x826   : > { %5687 = vrcp.f32 %v3620_v33 }
 0x827   : > { %v5684_v39 = vpop.eup %5683 }
 0x82f   : > { %v5686_v24 = vpop.eup %5685 }
 0x830   : > { %v5688_v53 = vpop.eup %5687 }
 0x85f   : > { %v5450_v6 = vpop.f32.mrb[8].mxu0 }
 0x860   : > { %v3704_v8 = vpop.f32.mrb[9].mxu0  ;;  %v3718_v10 = vmul.f32 %v5686_v24, %v5450_v6  ;;  %v8607_v24 = vld [vmem:[#allocation22_spill] sm:$0xff] }
 0x861   : > { %v3717_v48 = vmul.f32 %v5688_v53, %v3704_v8 }
 0x862   : > { %v5443_v51 = vpop.f32.mrb[6].mxu1 }
 0x863   : > { %v3407_v46 = vmul.f32 %v5682_v52, %v5443_v51  ;;  %v3393_v25 = vpop.f32.mrb[7].mxu1 }
 0x864   : > { %v3406_v41 = vmul.f32 %v5684_v39, %v3393_v25 }
 0x865   : > { %v3720_v18 = vadd.f32 %v3718_v10, %v3407_v46  ;;  %v8608_v10 = vld [vmem:[#allocation24_spill] sm:$0xff] }
 0x866   : > { %v3719_v19 = vadd.f32 %v3717_v48, %v3406_v41 }
 0x867   : > { %v3722_v34 = vmul.f32 0.5, %v3720_v18  ;;  %v8609_v18 = vld [vmem:[#allocation25_spill] sm:$0xff] }
 0x868   : > { %v3721_v35 = vmul.f32 0.5, %v3719_v19 }
 0x869   : > { %v3724_v40 = vadd.f32 %v5710_v2, %v3722_v34  ;;  %v8610_v34 = vld [vmem:[#allocation23_spill] sm:$0xff] }
 0x86a   : > { %v3723_v15 = vadd.f32 %v5710_v2, %v3721_v35 }
 0x86b   : > { %v3728_v55 = vmul.f32 0.01, %v3724_v40  ;;  %vm3726_vm7 = vcmp.gt.f32.partialorder %v3724_v40, 0.0 }
 0x86c   : > { %vm3725_vm6 = vcmp.gt.f32.partialorder %v3723_v15, 0.0  ;;  %v3727_v61 = vmul.f32 0.01, %v3723_v15 }
 0x86d   : > { %v3730_v0 = vsel %vm3726_vm7, %v3724_v40, %v3728_v55 }
 0x86e   : > { %v3729_v60 = vsel %vm3725_vm6, %v3723_v15, %v3727_v61  ;;  %v7912_v61 = vld [vmem:[#allocation8 + $0x4] ss:$0 sm:$0xff] }
 0x86f   : > { %5459 = vmatprep.mubr.msk.f32.mxu1 %vm947_vm2, %v3729_v60  ;;  %5470 = vmatprep.mubr.msk.f32.mxu0 %vm947_vm2, %v3729_v60 }
 0x870   : > { %5460 = vmatmul.mubr.msk.f32.vlgmr.msra.gmra.mrb[8].mxu1 %vm947_vm2, %v3730_v0  ;;  %5471 = vmatmul.mubr.msk.f32.vlgmr.msra.gmra.mrb[10].mxu0 %vm947_vm2, %v3730_v0 }
 0x943   : > { %v5461_v12 = vpop.f32.mrb[8].mxu1  ;;  %v5472_v29 = vpop.f32.mrb[10].mxu0 }
 0x944   : > { %v7847_v62 = vadd.f32 %v5711_v38, %v5461_v12  ;;  %v3884_v9 = vadd.f32 %v5712_v28, %v5472_v29  ;;  %v3803_v11 = vpop.f32.mrb[9].mxu1  ;;  %v3878_v31 = vpop.f32.mrb[11].mxu0  ;;  %v8611_v29 = vld [vmem:[#allocation27_spill] sm:$0xff] }
 0x945   : > { %v7849_v26 = vadd.f32 %v5711_v38, %v3803_v11  ;;  %v3879_v58 = vadd.f32 %v5712_v28, %v3878_v31 }
 0x946   : > { %v3945_v36 = vrot.slane %v3884_v9, %v8605_v13  ;;  %v3938_v4 = vcombine.high %v3884_v9, %v3884_v9 }
 0x947   : > { %v3889_v63 = vcombine.high %v3879_v58, %v3879_v58  ;;  %v3896_v16 = vrot.slane %v3879_v58, %v8605_v13  ;;  %v5551_v3 = vpack.c.bf16 %v7847_v62, %v7849_v26 }
 0x948   : > { %v3961_v7 = vrot.slane %v3945_v36, %v8605_v13  ;;  %v3953_v54 = vcombine.high %v3945_v36, %v3945_v36  ;;  %v3952_v52 = vrot.slane %v3938_v4, %v8605_v13 }
 0x949   : > { %v7857_v49 = vrot.slane %v3889_v63, %v8605_v13  ;;  %v3904_v50 = vcombine.high %v3896_v16, %v3896_v16  ;;  %5552 = vmatprep.subr.bf16.mxu1 %v5551_v3  ;;  %v3912_v45 = vrot.slane %v3896_v16, %v8605_v13 }
 0x94a   : > { %5554 = vmatpush3.bf16.msra.mxu1 %v5551_v3  ;;  %v4022_v27 = vrot.slane %v3961_v7, %v8606_v22  ;;  %v7869_v1 = vrot.slane %v3953_v54, %v8605_v13  ;;  %v3983_v44 = vcombine.high %v3961_v7, %v3961_v7  ;;  %v7910_v2 = vrot.slane %v3952_v52, %v8605_v13 }
 0x94b   : > { %v7863_v42 = vrot.slane %v7857_v49, %v8605_v13  ;;  %v7866_v23 = vrot.slane %v3904_v50, %v8605_v13  ;;  %v3934_v30 = vcombine.high %v3912_v45, %v3912_v45  ;;  %v3990_v5 = vrot.slane %v3912_v45, %v8606_v22  ;;  %v8612_v45 = vld [vmem:[#allocation26_spill] sm:$0xff] }
 0x94c   : > { %v4084_v43 = vadd.f32 %v4022_v27, %v7847_v62  ;;  %v4026_v17 = vrot.slane %v7869_v1, %v8606_v22  ;;  %v4030_v56 = vrot.slane %v3983_v44, %v8606_v22  ;;  %v4083_v53 = vadd.f32 %v4022_v27, %v7849_v26 }
 0x94d   : > { %v7875_v37 = vrot.slane %v7866_v23, %v8606_v22  ;;  %v7878_v59 = vrot.slane %v3934_v30, %v8606_v22  ;;  %v7882_v57 = vrot.slane %v7863_v42, %v8606_v22  ;;  %v4067_v33 = vadd.f32 %v3990_v5, %v7849_v26 }
 0x94e   : > { %v4068_v14 = vadd.f32 %v3990_v5, %v7847_v62  ;;  %v4116_v51 = vadd.f32 %v4084_v43, %v8607_v24  ;;  %v4085_v25 = vadd.f32 %v4026_v17, %v7849_v26  ;;  %v4087_v48 = vadd.f32 %v4030_v56, %v7849_v26 }
 0x94f   : > { %v7891_v6 = vadd.f32 %v7875_v37, %v7849_v26  ;;  %v7896_v8 = vadd.f32 %v7878_v59, %v7849_v26  ;;  %v7900_v39 = vadd.f32 %v7882_v57, %v7849_v26  ;;  %v4115_v19 = vadd.f32 %v4083_v53, %v8609_v18 }
 0x950   : > { %v4100_v46 = vadd.f32 %v4068_v14, %v8608_v10  ;;  %vm4148_vm5 = vcmp.gt.f32.partialorder %v4116_v51, 0.0  ;;  %v4180_v41 = vmul.f32 0.2, %v4116_v51  ;;  %v4099_v35 = vadd.f32 %v4067_v33, %v8610_v34 }
 0x951   : > { %vm4147_vm6 = vcmp.gt.f32.partialorder %v4115_v19, 0.0  ;;  %v4179_v15 = vmul.f32 0.2, %v4115_v19  ;;  %v4117_v38 = vadd.f32 %v4085_v25, %v8611_v29  ;;  %v4038_v28 = vrot.slane %v7910_v2, %v8606_v22 }
 0x952   : > { %v4212_v40 = vsel %vm4148_vm5, %v4116_v51, %v4180_v41  ;;  %v4164_v55 = vmul.f32 0.2, %v4100_v46  ;;  %vm4132_vm7 = vcmp.gt.f32.partialorder %v4100_v46, 0.0  ;;  %v4163_v12 = vmul.f32 0.2, %v4099_v35  ;;  %v8614_v41 = vld [vmem:[#allocation28_spill] sm:$0xff] }
 0x953   : > { %v4244_v60 = vmul.f32 %v7912_v61, %v4212_v40  ;;  %v4211_v0 = vsel %vm4147_vm6, %v4115_v19, %v4179_v15  ;;  %vm4131_vm5 = vcmp.gt.f32.partialorder %v4099_v35, 0.0  ;;  %v4086_v31 = vadd.f32 %v4026_v17, %v7847_v62  ;;  %v8613_v17 = vld [vmem:[#allocation29_spill] sm:$0xff]  ;;  %v8615_v15 = vld [vmem:[#allocation31_spill] sm:$0xff] }
 0x954   : > { %v4243_v11 = vmul.f32 %v7912_v61, %v4211_v0  ;;  %v4196_v58 = vsel %vm4132_vm7, %v4100_v46, %v4164_v55  ;;  %v3954_v63 = vcombine.high %v3952_v52, %v3952_v52  ;;  %v4195_v16 = vsel %vm4131_vm5, %v4099_v35, %v4163_v12 }
 0x955   : > { %v4310_v9 = vsel %vm1488_vm4, %v4244_v60, 0.0  ;;  %v4181_v3 = vmul.f32 0.2, %v4117_v38  ;;  %v4406_v7 = vsel %vm947_vm2, %v4244_v60, 0.0  ;;  %v4228_v50 = vmul.f32 %v7912_v61, %v4196_v58 }
 0x956   : > { %4311 = vadd.xlane.f32.xlu0 %v4310_v9  ;;  %v4307_v36 = vsel %vm1488_vm4, %v4243_v11, 0.0  ;;  %vm4149_vm6 = vcmp.gt.f32.partialorder %v4117_v38, 0.0  ;;  %v4091_v54 = vadd.f32 %v4038_v28, %v7849_v26  ;;  %v4118_v27 = vadd.f32 %v4086_v31, %v8612_v45 }
 0x957   : > { %4308 = vadd.xlane.f32.xlu1 %v4307_v36  ;;  %v4403_v44 = vsel %vm947_vm2, %v4243_v11, 0.0  ;;  %v4227_v30 = vmul.f32 %v7912_v61, %v4195_v16  ;;  %v7929_v4 = vrot.slane %v3954_v63, %v8605_v13  ;;  %v3985_v43 = vcombine.high %v7869_v1, %v7869_v1 }
 0x958   : > { %v4213_v5 = vsel %vm4149_vm6, %v4117_v38, %v4181_v3  ;;  %v4119_v33 = vadd.f32 %v4087_v48, %v8613_v17  ;;  %v4262_v14 = vsel %vm1488_vm4, %v4228_v50, 0.0  ;;  %v4088_v52 = vadd.f32 %v4030_v56, %v7847_v62 }
 0x959   : > { %v4182_v24 = vmul.f32 0.2, %v4118_v27  ;;  %v4259_v51 = vsel %vm1488_vm4, %v4227_v30, 0.0  ;;  %v4245_v53 = vmul.f32 %v7912_v61, %v4213_v5  ;;  %vm4150_vm7 = vcmp.gt.f32.partialorder %v4118_v27, 0.0 }
 0x95a   : > { %4407 = vadd.xlane.f32.xlu0 %v4406_v7  ;;  %v7939_v10 = vrot.slane %v3985_v43, %v8606_v22  ;;  %v7943_v1 = vrot.slane %v7929_v4, %v8606_v22  ;;  %v4183_v46 = vmul.f32 0.2, %v4119_v33  ;;  %v4355_v25 = vsel %vm947_vm2, %v4227_v30, 0.0 }
 0x95b   : > { %4404 = vadd.xlane.f32.xlu1 %v4403_v44  ;;  %vm4151_vm5 = vcmp.gt.f32.partialorder %v4119_v33, 0.0  ;;  %v3984_v56 = vcombine.high %v7910_v2, %v7910_v2  ;;  %v4214_v48 = vsel %vm4150_vm7, %v4118_v27, %v4182_v24  ;;  %v4120_v18 = vadd.f32 %v4088_v52, %v8614_v41  ;;  %v8617_v27 = vld [vmem:[#allocation34_spill] sm:$0xff] }
 0x95c   : > { %v3905_v19 = vcombine.high %v7857_v49, %v7857_v49  ;;  %v3936_v34 = vcombine.high %v7866_v23, %v7866_v23  ;;  %v4313_v35 = vsel %vm1488_vm4, %v4245_v53, 0.0  ;;  %v4215_v40 = vsel %vm4151_vm5, %v4119_v33, %v4183_v46 }
 0x95d   : > { %v4123_v55 = vadd.f32 %v4091_v54, %v8615_v15  ;;  %v7957_v60 = vadd.f32 %v7939_v10, %v7849_v26  ;;  %v7961_v2 = vadd.f32 %v7943_v1, %v7849_v26  ;;  %v4358_v0 = vsel %vm947_vm2, %v4228_v50, 0.0  ;;  %v8620_v15 = vld [vmem:[#allocation33_spill] sm:$0xff] }
 0x95e   : > { %4263 = vadd.xlane.f32.xlu0 %v4262_v14  ;;  %v4246_v49 = vmul.f32 %v7912_v61, %v4214_v48  ;;  %v7966_v23 = vrot.slane %v3984_v56, %v8606_v22  ;;  %v4092_v12 = vadd.f32 %v4038_v28, %v7847_v62  ;;  %v4184_v29 = vmul.f32 0.2, %v4120_v18  ;;  %v8616_v28 = vld [vmem:[#allocation30_spill] sm:$0xff]  ;;  %v8619_v56 = vld [vmem:[#allocation32_spill] sm:$0xff] }
 0x95f   : > { %4260 = vadd.xlane.f32.xlu1 %v4259_v51  ;;  %v7970_v38 = vrot.slane %v3936_v34, %v8606_v22  ;;  %v4409_v9 = vsel %vm947_vm2, %v4245_v53, 0.0  ;;  %v4247_v11 = vmul.f32 %v7912_v61, %v4215_v40  ;;  %vm4152_vm6 = vcmp.gt.f32.partialorder %v4120_v18, 0.0 }
 0x960   : > { %v3933_v31 = vrot.slane %v3905_v19, %v8605_v13  ;;  %v4187_v58 = vmul.f32 0.2, %v4123_v55  ;;  %v4316_v36 = vsel %vm1488_vm4, %v4246_v49, 0.0  ;;  %vm4155_vm7 = vcmp.gt.f32.partialorder %v4123_v55, 0.0 }
 0x961   : > { %v4216_v63 = vsel %vm4152_vm6, %v4120_v18, %v4184_v29  ;;  %v4124_v16 = vadd.f32 %v4092_v12, %v8616_v28  ;;  %v7979_v3 = vadd.f32 %v7966_v23, %v7849_v26  ;;  %v4319_v7 = vsel %vm1488_vm4, %v4247_v11, 0.0  ;;  %v8621_v29 = vld [vmem:[#allocation38_spill] sm:$0xff] }
 0x962   : > { %4356 = vadd.xlane.f32.xlu0 %v4355_v25  ;;  %v7984_v50 = vadd.f32 %v7970_v38, %v7849_v26  ;;  %v3935_v13 = vcombine.high %v7863_v42, %v7863_v42  ;;  %v7989_v54 = vrot.slane %v3933_v31, %v8606_v22  ;;  %v4219_v45 = vsel %vm4155_vm7, %v4123_v55, %v4187_v58 }
 0x963   : > { %4314 = vadd.xlane.f32.xlu1 %v4313_v35  ;;  %v4103_v44 = vadd.f32 %v7896_v8, %v8617_v27  ;;  %v4412_v30 = vsel %vm947_vm2, %v4246_v49, 0.0  ;;  %v4248_v43 = vmul.f32 %v7912_v61, %v4216_v63  ;;  %v4188_v5 = vmul.f32 0.2, %v4124_v16  ;;  %v8618_v8 = vld [vmem:[#allocation36_spill] sm:$0xff] }
 0x964   : > { %v3986_v17 = vcombine.high %v7929_v4, %v7929_v4  ;;  %v4415_v33 = vsel %vm947_vm2, %v4247_v11, 0.0  ;;  %v4251_v42 = vmul.f32 %v7912_v61, %v4219_v45  ;;  %vm4156_vm5 = vcmp.gt.f32.partialorder %v4124_v16, 0.0 }
 0x965   : > { %v8000_v14 = vrot.slane %v3935_v13, %v8606_v22  ;;  %v4167_v52 = vmul.f32 0.2, %v4103_v44  ;;  %v4107_v24 = vadd.f32 %v7900_v39, %v8618_v8  ;;  %v8006_v51 = vadd.f32 %v7989_v54, %v7849_v26 }
 0x966   : > { %4359 = vadd.xlane.f32.xlu0 %v4358_v0  ;;  %v3937_v53 = vcombine.high %v3933_v31, %v3933_v31  ;;  %v4322_v4 = vsel %vm1488_vm4, %v4248_v43, 0.0  ;;  %vm4135_vm6 = vcmp.gt.f32.partialorder %v4103_v44, 0.0  ;;  %v4070_v46 = vadd.f32 %v7875_v37, %v7847_v62 }
 0x967   : > { %4410 = vadd.xlane.f32.xlu1 %v4409_v9  ;;  %v4220_v25 = vsel %vm4156_vm5, %v4124_v16, %v4188_v5  ;;  %v4101_v48 = vadd.f32 %v7891_v6, %v8619_v56  ;;  %v4331_v41 = vsel %vm1488_vm4, %v4251_v42, 0.0  ;;  %v8015_v39 = vrot.slane %v3986_v17, %v8606_v22 }
 0x968   : > { %v4199_v18 = vsel %vm4135_vm6, %v4103_v44, %v4167_v52  ;;  %v4171_v19 = vmul.f32 0.2, %v4107_v24  ;;  %v8019_v34 = vadd.f32 %v8000_v14, %v7849_v26  ;;  %v8022_v35 = vrot.slane %v3937_v53, %v8606_v22  ;;  %v8622_v44 = vld [vmem:[#allocation40_spill] sm:$0xff] }
 0x969   : > { %v4418_v37 = vsel %vm947_vm2, %v4248_v43, 0.0  ;;  %v4252_v40 = vmul.f32 %v7912_v61, %v4220_v25  ;;  %vm4139_vm7 = vcmp.gt.f32.partialorder %v4107_v24, 0.0  ;;  %v4165_v6 = vmul.f32 0.2, %v4101_v48 }
 0x96a   : > { %4317 = vadd.xlane.f32.xlu0 %v4316_v36  ;;  %v4102_v55 = vadd.f32 %v4070_v46, %v8620_v15  ;;  %v4427_v0 = vsel %vm947_vm2, %v4251_v42, 0.0  ;;  %v4231_v49 = vmul.f32 %v7912_v61, %v4199_v18  ;;  %vm4133_vm5 = vcmp.gt.f32.partialorder %v4101_v48, 0.0  ;;  %v8624_v46 = vld [vmem:[#allocation42_spill] sm:$0xff] }
 0x96b   : > { %4320 = vadd.xlane.f32.xlu1 %v4319_v7  ;;  %v4203_v12 = vsel %vm4139_vm7, %v4107_v24, %v4171_v19  ;;  %v4121_v22 = vadd.f32 %v7957_v60, %v8621_v29  ;;  %v8033_v9 = vadd.f32 %v8015_v39, %v7849_v26  ;;  %v4334_v11 = vsel %vm1488_vm4, %v4252_v40, 0.0  ;;  %v8623_v24 = vld [vmem:[#allocation35_spill] sm:$0xff] }
 0x96c   : > { %v8038_v31 = vadd.f32 %v8022_v35, %v7849_v26  ;;  %v4197_v58 = vsel %vm4133_vm5, %v4101_v48, %v4165_v6  ;;  %v4166_v36 = vmul.f32 0.2, %v4102_v55  ;;  %v4367_v63 = vsel %vm947_vm2, %v4231_v49, 0.0 }
 0x96d   : > { %v4235_v28 = vmul.f32 %v7912_v61, %v4203_v12  ;;  %vm4134_vm6 = vcmp.gt.f32.partialorder %v4102_v55, 0.0  ;;  %v4185_v60 = vmul.f32 0.2, %v4121_v22  ;;  %v4430_v16 = vsel %vm947_vm2, %v4252_v40, 0.0 }
 0x96e   : > { %4413 = vadd.xlane.f32.xlu0 %v4412_v30  ;;  %v4229_v7 = vmul.f32 %v7912_v61, %v4197_v58  ;;  %vm4153_vm7 = vcmp.gt.f32.partialorder %v4121_v22, 0.0  ;;  %v4198_v13 = vsel %vm4134_vm6, %v4102_v55, %v4166_v36  ;;  %v4125_v30 = vadd.f32 %v7961_v2, %v8622_v44  ;;  %v8626_v55 = vld [vmem:[#allocation44_spill] sm:$0xff] }
 0x96f   : > { %4416 = vadd.xlane.f32.xlu1 %v4415_v33  ;;  %v4283_v45 = vsel %vm1488_vm4, %v4235_v28, 0.0  ;;  %v4217_v27 = vsel %vm4153_vm7, %v4121_v22, %v4185_v60  ;;  %v4230_v5 = vmul.f32 %v7912_v61, %v4198_v13  ;;  %v4072_v17 = vadd.f32 %v7878_v59, %v7847_v62  ;;  %v8628_v13 = vld [vmem:[#allocation46_spill] sm:$0xff] }
 0x970   : > { %v4265_v43 = vsel %vm1488_vm4, %v4229_v7, 0.0  ;;  %v4379_v33 = vsel %vm947_vm2, %v4235_v28, 0.0  ;;  %v4249_v42 = vmul.f32 %v7912_v61, %v4217_v27  ;;  %v4189_v52 = vmul.f32 0.2, %v4125_v30 }
 0x971   : > { %v4268_v8 = vsel %vm1488_vm4, %v4230_v5, 0.0  ;;  %vm4157_vm5 = vcmp.gt.f32.partialorder %v4125_v30, 0.0  ;;  %v4104_v2 = vadd.f32 %v4072_v17, %v8623_v24  ;;  %v4127_v59 = vadd.f32 %v7979_v3, %v8624_v46  ;;  %v8625_v3 = vld [vmem:[#allocation37_spill] sm:$0xff] }
 0x972   : > { %4323 = vadd.xlane.f32.xlu0 %v4322_v4  ;;  %v4325_v53 = vsel %vm1488_vm4, %v4249_v42, 0.0  ;;  %v4221_v4 = vsel %vm4157_vm5, %v4125_v30, %v4189_v52  ;;  %v4361_v25 = vsel %vm947_vm2, %v4229_v7, 0.0  ;;  %v4076_v56 = vadd.f32 %v7882_v57, %v7847_v62 }
 0x973   : > { %4332 = vadd.xlane.f32.xlu1 %v4331_v41  ;;  %v4168_v48 = vmul.f32 0.2, %v4104_v2  ;;  %v4421_v41 = vsel %vm947_vm2, %v4249_v42, 0.0  ;;  %v4253_v18 = vmul.f32 %v7912_v61, %v4221_v4  ;;  %vm4136_vm6 = vcmp.gt.f32.partialorder %v4104_v2, 0.0  ;;  %v8629_v42 = vld [vmem:[#allocation41_spill] sm:$0xff] }
 0x974   : > { %v4191_v19 = vmul.f32 0.2, %v4127_v59  ;;  %vm4159_vm7 = vcmp.gt.f32.partialorder %v4127_v59, 0.0  ;;  %v4108_v6 = vadd.f32 %v4076_v56, %v8625_v3  ;;  %v4271_v12 = vsel %vm1488_vm4, %v4231_v49, 0.0  ;;  %v8627_v49 = vld [vmem:[#allocation39_spill] sm:$0xff]  ;;  %v8632_v3 = vld [vmem:[#allocation50_spill] sm:$0xff] }
 0x975   : > { %v4200_v40 = vsel %vm4136_vm6, %v4104_v2, %v4168_v48  ;;  %v4337_v15 = vsel %vm1488_vm4, %v4253_v18, 0.0  ;;  %v4433_v58 = vsel %vm947_vm2, %v4253_v18, 0.0  ;;  %v4094_v30 = vadd.f32 %v7943_v1, %v7847_v62  ;;  %v8630_v2 = vld [vmem:[#allocation48_spill] sm:$0xff]  ;;  %v8631_v18 = vld [vmem:[#allocation43_spill] sm:$0xff] }
 0x976   : > { %4419 = vadd.xlane.f32.xlu0 %v4418_v37  ;;  %v4364_v37 = vsel %vm947_vm2, %v4230_v5, 0.0  ;;  %v4223_v57 = vsel %vm4159_vm7, %v4127_v59, %v4191_v19  ;;  %v4232_v29 = vmul.f32 %v7912_v61, %v4200_v40  ;;  %v4172_v22 = vmul.f32 0.2, %v4108_v6 }
 0x977   : > { %4428 = vadd.xlane.f32.xlu1 %v4427_v0  ;;  %v4105_v0 = vadd.f32 %v7984_v50, %v8626_v55  ;;  %v4255_v36 = vmul.f32 %v7912_v61, %v4223_v57  ;;  %vm4140_vm5 = vcmp.gt.f32.partialorder %v4108_v6, 0.0  ;;  %v4126_v52 = vadd.f32 %v4094_v30, %v8629_v42 }
 0x978   : > { %v4274_v28 = vsel %vm1488_vm4, %v4232_v29, 0.0  ;;  %v4204_v50 = vsel %vm4140_vm5, %v4108_v6, %v4172_v22  ;;  %v4111_v1 = vadd.f32 %v8019_v34, %v8630_v2  ;;  %v4096_v59 = vadd.f32 %v7966_v23, %v7847_v62  ;;  %v8633_v22 = vld [vmem:[#allocation51_spill] sm:$0xff] }
 0x979   : > { %vm4137_vm6 = vcmp.gt.f32.partialorder %v4105_v0, 0.0  ;;  %v4236_v27 = vmul.f32 %v7912_v61, %v4204_v50  ;;  %v4190_v46 = vmul.f32 0.2, %v4126_v52  ;;  %v4129_v23 = vadd.f32 %v8033_v9, %v8632_v3 }
 0x97a   : > { %4335 = vadd.xlane.f32.xlu0 %v4334_v11  ;;  %v4090_v11 = vadd.f32 %v7939_v10, %v7847_v62  ;;  %v4109_v10 = vadd.f32 %v8006_v51, %v8628_v13  ;;  %v4175_v48 = vmul.f32 0.2, %v4111_v1  ;;  %v4128_v19 = vadd.f32 %v4096_v59, %v8631_v18 }
 0x97b   : > { %4368 = vadd.xlane.f32.xlu1 %v4367_v63  ;;  %v4169_v63 = vmul.f32 0.2, %v4105_v0  ;;  %v4074_v55 = vadd.f32 %v7970_v38, %v7847_v62 }
 0x97c   : > { %v4122_v60 = vadd.f32 %v4090_v11, %v8627_v49  ;;  %v4173_v17 = vmul.f32 0.2, %v4109_v10  ;;  %vm4141_vm5 = vcmp.gt.f32.partialorder %v4109_v10, 0.0  ;;  %v4192_v57 = vmul.f32 0.2, %v4128_v19 }
 0x97d   : > { %v4201_v7 = vsel %vm4137_vm6, %v4105_v0, %v4169_v63  ;;  %vm4158_vm6 = vcmp.gt.f32.partialorder %v4126_v52, 0.0  ;;  %v4113_v11 = vadd.f32 %v8038_v31, %v8633_v22  ;;  %v4078_v31 = vadd.f32 %v7989_v54, %v7847_v62 }
 0x97e   : > { %4431 = vadd.xlane.f32.xlu0 %v4430_v16  ;;  %v4343_v16 = vsel %vm1488_vm4, %v4255_v36, 0.0  ;;  %v4186_v44 = vmul.f32 0.2, %v4122_v60  ;;  %v4233_v5 = vmul.f32 %v7912_v61, %v4201_v7  ;;  %vm4154_vm7 = vcmp.gt.f32.partialorder %v4122_v60, 0.0 }
 0x97f   : > { %4284 = vadd.xlane.f32.xlu1 %v4283_v45  ;;  %v4370_v45 = vsel %vm947_vm2, %v4232_v29, 0.0  ;;  %v4205_v24 = vsel %vm4141_vm5, %v4109_v10, %v4173_v17  ;;  %v4222_v34 = vsel %vm4158_vm6, %v4126_v52, %v4190_v46  ;;  %vm4160_vm5 = vcmp.gt.f32.partialorder %v4128_v19, 0.0 }
 0x980   : > { %v4218_v51 = vsel %vm4154_vm7, %v4122_v60, %v4186_v44  ;;  %v4237_v56 = vmul.f32 %v7912_v61, %v4205_v24  ;;  %vm4143_vm7 = vcmp.gt.f32.partialorder %v4111_v1, 0.0  ;;  %v4193_v29 = vmul.f32 0.2, %v4129_v23  ;;  %v8635_v44 = vld [vmem:[#allocation47_spill] sm:$0xff]  ;;  %v8636_v24 = vld [vmem:[#allocation49_spill] sm:$0xff] }
 0x981   : > { %v4250_v4 = vmul.f32 %v7912_v61, %v4218_v51  ;;  %v4207_v40 = vsel %vm4143_vm7, %v4111_v1, %v4175_v48  ;;  %vm4161_vm6 = vcmp.gt.f32.partialorder %v4129_v23, 0.0  ;;  %v4177_v50 = vmul.f32 0.2, %v4113_v11  ;;  %v8637_v48 = vld [vmem:[#allocation52_spill] sm:$0xff] }
 0x982   : > { %4266 = vadd.xlane.f32.xlu0 %v4265_v43  ;;  %v4439_v43 = vsel %vm947_vm2, %v4255_v36, 0.0  ;;  %v4385_v0 = vsel %vm947_vm2, %v4237_v56, 0.0  ;;  %v8634_v36 = vld [vmem:[#allocation45_spill] sm:$0xff]  ;;  %v4225_v38 = vsel %vm4161_vm6, %v4129_v23, %v4193_v29  ;;  %vm4145_vm7 = vcmp.gt.f32.partialorder %v4113_v11, 0.0 }
 0x983   : > { %4380 = vadd.xlane.f32.xlu1 %v4379_v33  ;;  %v4286_v33 = vsel %vm1488_vm4, %v4236_v27, 0.0  ;;  %v4424_v6 = vsel %vm947_vm2, %v4250_v4, 0.0  ;;  %v4106_v63 = vadd.f32 %v4074_v55, %v8634_v36  ;;  %v4257_v13 = vmul.f32 %v7912_v61, %v4225_v38 }
 0x984   : > { %v4209_v10 = vsel %vm4145_vm7, %v4113_v11, %v4177_v50  ;;  %v4110_v30 = vadd.f32 %v4078_v31, %v8635_v44  ;;  %v4080_v51 = vadd.f32 %v8000_v14, %v7847_v62  ;;  %v4098_v14 = vadd.f32 %v8015_v39, %v7847_v62  ;;  %v8638_v39 = vld [vmem:[#allocation53_spill] sm:$0xff] }
 0x985   : > { %v4445_v59 = vsel %vm947_vm2, %v4257_v13, 0.0 }
 0x986   : > { %4269 = vadd.xlane.f32.xlu0 %v4268_v8  ;;  %v4277_v8 = vsel %vm1488_vm4, %v4233_v5, 0.0  ;;  %vm4142_vm6 = vcmp.gt.f32.partialorder %v4110_v30, 0.0  ;;  %v4112_v2 = vadd.f32 %v4080_v51, %v8636_v24 }
 0x987   : > { %4326 = vadd.xlane.f32.xlu1 %v4325_v53  ;;  %v4382_v53 = vsel %vm947_vm2, %v4236_v27, 0.0 }
 0x988   : > { %v4176_v46 = vmul.f32 0.2, %v4112_v2  ;;  %vm4144_vm7 = vcmp.gt.f32.partialorder %v4112_v2, 0.0 }
 0x98a   : > { %4362 = vadd.xlane.f32.xlu0 %v4361_v25  ;;  %v4373_v25 = vsel %vm947_vm2, %v4233_v5, 0.0  ;;  %v4241_v5 = vmul.f32 %v7912_v61, %v4209_v10 }
 0x98b   : > { %4422 = vadd.xlane.f32.xlu1 %v4421_v41  ;;  %v4328_v41 = vsel %vm1488_vm4, %v4250_v4, 0.0 }
 0x98c   : > { %v4301_v42 = vsel %vm1488_vm4, %v4241_v5, 0.0  ;;  %v4397_v1 = vsel %vm947_vm2, %v4241_v5, 0.0 }
 0x98e   : > { %4365 = vadd.xlane.f32.xlu0 %v4364_v37  ;;  %v4289_v37 = vsel %vm1488_vm4, %v4237_v56, 0.0  ;;  %v4208_v56 = vsel %vm4144_vm7, %v4112_v2, %v4176_v46 }
 0x98f   : > { %4338 = vadd.xlane.f32.xlu1 %v4337_v15  ;;  %v4254_v15 = vmul.f32 %v7912_v61, %v4222_v34  ;;  %v4082_v34 = vadd.f32 %v8022_v35, %v7847_v62 }
 0x991   : > { %v4340_v9 = vsel %vm1488_vm4, %v4254_v15, 0.0  ;;  %v4436_v49 = vsel %vm947_vm2, %v4254_v15, 0.0 }
 0x992   : > { %4272 = vadd.xlane.f32.xlu0 %v4271_v12  ;;  %v4239_v12 = vmul.f32 %v7912_v61, %v4207_v40  ;;  %v4114_v40 = vadd.f32 %v4082_v34, %v8638_v39 }
 0x993   : > { %4434 = vadd.xlane.f32.xlu1 %v4433_v58  ;;  %v4224_v58 = vsel %vm4160_vm5, %v4128_v19, %v4192_v57  ;;  %vm4138_vm5 = vcmp.gt.f32.partialorder %v4106_v63, 0.0  ;;  %v4240_v19 = vmul.f32 %v7912_v61, %v4208_v56 }
 0x994   : > { %v4256_v60 = vmul.f32 %v7912_v61, %v4224_v58  ;;  %v4391_v7 = vsel %vm947_vm2, %v4239_v12, 0.0 }
 0x995   : > { %v4298_v3 = vsel %vm1488_vm4, %v4240_v19, 0.0  ;;  %v4394_v15 = vsel %vm947_vm2, %v4240_v19, 0.0 }
 0x996   : > { %4275 = vadd.xlane.f32.xlu0 %v4274_v28  ;;  %v4295_v28 = vsel %vm1488_vm4, %v4239_v12, 0.0  ;;  %v4442_v54 = vsel %vm947_vm2, %v4256_v60, 0.0 }
 0x997   : > { %4344 = vadd.xlane.f32.xlu1 %v4343_v16  ;;  %v4170_v16 = vmul.f32 0.2, %v4106_v63 }
 0x999   : > { %v4202_v27 = vsel %vm4138_vm5, %v4106_v63, %v4170_v16 }
 0x99a   : > { %4371 = vadd.xlane.f32.xlu0 %v4370_v45  ;;  %v4346_v45 = vsel %vm1488_vm4, %v4256_v60, 0.0  ;;  %v4234_v17 = vmul.f32 %v7912_v61, %v4202_v27 }
 0x99b   : > { %4440 = vadd.xlane.f32.xlu1 %v4439_v43  ;;  %v4349_v43 = vsel %vm1488_vm4, %v4257_v13, 0.0 }
 0x99c   : > { %v4280_v52 = vsel %vm1488_vm4, %v4234_v17, 0.0 }
 0x99e   : > { %4287 = vadd.xlane.f32.xlu0 %v4286_v33  ;;  %v4174_v33 = vmul.f32 0.2, %v4110_v30 }
 0x99f   : > { %4278 = vadd.xlane.f32.xlu1 %v4277_v8 }
 0x9a0   : > { %v4206_v8 = vsel %vm4142_vm6, %v4110_v30, %v4174_v33  ;;  %vm4146_vm6 = vcmp.gt.f32.partialorder %v4114_v40, 0.0 }
 0x9a1   : > { %v4238_v4 = vmul.f32 %v7912_v61, %v4206_v8 }
 0x9a2   : > { %4383 = vadd.xlane.f32.xlu0 %v4382_v53  ;;  %v4376_v53 = vsel %vm947_vm2, %v4234_v17, 0.0 }
 0x9a3   : > { %4374 = vadd.xlane.f32.xlu1 %v4373_v25  ;;  %v4292_v25 = vsel %vm1488_vm4, %v4238_v4, 0.0  ;;  %v4388_v18 = vsel %vm947_vm2, %v4238_v4, 0.0 }
 0x9a6   : > { %4329 = vadd.xlane.f32.xlu0 %v4328_v41  ;;  %v4130_v41 = vadd.f32 %v4098_v14, %v8637_v48 }
 0x9a7   : > { %4290 = vadd.xlane.f32.xlu1 %v4289_v37 }
 0x9a8   : > { %v4194_v37 = vmul.f32 0.2, %v4130_v41  ;;  %vm4162_vm5 = vcmp.gt.f32.partialorder %v4130_v41, 0.0 }
 0x9aa   : > { %4425 = vadd.xlane.f32.xlu0 %v4424_v6  ;;  %v4226_v23 = vsel %vm4162_vm5, %v4130_v41, %v4194_v37  ;;  %v4178_v6 = vmul.f32 0.2, %v4114_v40 }
 0x9ab   : > { %4386 = vadd.xlane.f32.xlu1 %v4385_v0  ;;  %v4258_v57 = vmul.f32 %v7912_v61, %v4226_v23 }
 0x9ac   : > { %v4210_v35 = vsel %vm4146_vm6, %v4114_v40, %v4178_v6 }
 0x9ad   : > { %v4352_v55 = vsel %vm1488_vm4, %v4258_v57, 0.0  ;;  %v4242_v0 = vmul.f32 %v7912_v61, %v4210_v35  ;;  %v4448_v22 = vsel %vm947_vm2, %v4258_v57, 0.0 }
 0x9ae   : > { %4341 = vadd.xlane.f32.xlu0 %v4340_v9 }
 0x9af   : > { %4296 = vadd.xlane.f32.xlu1 %v4295_v28  ;;  %v4304_v12 = vsel %vm1488_vm4, %v4242_v0, 0.0  ;;  %v4400_v29 = vsel %vm947_vm2, %v4242_v0, 0.0 }
 0x9b2   : > { %4437 = vadd.xlane.f32.xlu0 %v4436_v49 }
 0x9b3   : > { %4392 = vadd.xlane.f32.xlu1 %v4391_v7 }
 0x9b6   : > { %4347 = vadd.xlane.f32.xlu0 %v4346_v45 }
 0x9b7   : > { %4350 = vadd.xlane.f32.xlu1 %v4349_v43 }
 0x9ba   : > { %4443 = vadd.xlane.f32.xlu0 %v4442_v54 }
 0x9bb   : > { %4302 = vadd.xlane.f32.xlu1 %v4301_v42 }
 0x9be   : > { %4281 = vadd.xlane.f32.xlu0 %v4280_v52 }
 0x9bf   : > { %4398 = vadd.xlane.f32.xlu1 %v4397_v1 }
 0x9c2   : > { %4377 = vadd.xlane.f32.xlu0 %v4376_v53 }
 0x9c3   : > { %4446 = vadd.xlane.f32.xlu1 %v4445_v59 }
 0x9c6   : > { %4293 = vadd.xlane.f32.xlu0 %v4292_v25 }
 0x9ca   : > { %4389 = vadd.xlane.f32.xlu0 %v4388_v18 }
 0x9ce   : > { %4299 = vadd.xlane.f32.xlu0 %v4298_v3 }
 0x9d2   : > { %4395 = vadd.xlane.f32.xlu0 %v4394_v15 }
 0x9d6   : > { %4353 = vadd.xlane.f32.xlu0 %v4352_v55 }
 0x9da   : > { %4305 = vadd.xlane.f32.xlu0 %v4304_v12 }
 0x9de   : > { %4401 = vadd.xlane.f32.xlu0 %v4400_v29 }
 0x9e2   : > { %4449 = vadd.xlane.f32.xlu0 %v4448_v22 }
 0x9e3   : > { %v4312_v11 = vpop.xlane.xlu0 %4311 }
 0x9e4   : > { %v4309_v9 = vpop.xlane.xlu1 %4308 }
 0x9e7   : > { %v4408_v58 = vpop.xlane.xlu0 %4407 }
 0x9e8   : > { %v4468_v36 = vsub.f32 %v4312_v11, %v4408_v58  ;;  %v4594_v63 = vrot.slane %v4408_v58, %v6893_v32  ;;  %v4405_v28 = vpop.xlane.xlu1 %4404 }
 0x9e9   : > { %v4467_v61 = vsub.f32 %v4309_v9, %v4405_v28  ;;  %v4590_v50 = vrot.slane %v4405_v28, %v6899_v21 }
 0x9ea   : > { %v4897_v38 = vrot.slane %v4468_v36, %v6893_v32 }
 0x9eb   : > { %v4264_v49 = vpop.xlane.xlu0 %4263  ;;  %v4595_v60 = vsel %vm1758_vm8, %v4594_v63, %v4590_v50  ;;  %v4893_v16 = vrot.slane %v4467_v61, %v6899_v21 }
 0x9ec   : > { %v4261_v31 = vpop.xlane.xlu1 %4260 }
 0x9ed   : > { %v4898_v7 = vsel %vm1758_vm8, %v4897_v38, %v4893_v16 }
 0x9ef   : > { %v4357_v13 = vpop.xlane.xlu0 %4356 }
 0x9f0   : > { %v4451_v10 = vsub.f32 %v4261_v31, %v4357_v13  ;;  %v4315_v45 = vpop.xlane.xlu1 %4314  ;;  %v4518_v44 = vrot.slane %v4357_v13, %v6899_v21 }
 0x9f2   : > { %v4821_v54 = vrot.slane %v4451_v10, %v6899_v21 }
 0x9f3   : > { %v4360_v27 = vpop.xlane.xlu0 %4359 }
 0x9f4   : > { %v4452_v30 = vsub.f32 %v4264_v49, %v4360_v27  ;;  %v4522_v43 = vrot.slane %v4360_v27, %v6893_v32  ;;  %v4411_v5 = vpop.xlane.xlu1 %4410 }
 0x9f5   : > { %v4469_v51 = vsub.f32 %v4315_v45, %v4411_v5  ;;  %v4599_v2 = vrot.slane %v4411_v5, %v6899_v21 }
 0x9f6   : > { %v4523_v17 = vsel %vm1758_vm8, %v4522_v43, %v4518_v44  ;;  %v4825_v33 = vrot.slane %v4452_v30, %v6893_v32 }
 0x9f7   : > { %v4318_v42 = vpop.xlane.xlu0 %4317  ;;  %v4902_v46 = vrot.slane %v4469_v51, %v6899_v21 }
 0x9f8   : > { %v4826_v52 = vsel %vm1758_vm8, %v4825_v33, %v4821_v54  ;;  %v4321_v8 = vpop.xlane.xlu1 %4320 }
 0x9fb   : > { %v4414_v24 = vpop.xlane.xlu0 %4413 }
 0x9fc   : > { %v4470_v1 = vsub.f32 %v4318_v42, %v4414_v24  ;;  %v4603_v53 = vrot.slane %v4414_v24, %v6893_v32  ;;  %v4417_v4 = vpop.xlane.xlu1 %4416 }
 0x9fd   : > { %v4471_v25 = vsub.f32 %v4321_v8, %v4417_v4  ;;  %v4608_v37 = vrot.slane %v4417_v4, %v6899_v21 }
 0x9fe   : > { %v4604_v14 = vsel %vm1758_vm8, %v4603_v53, %v4599_v2  ;;  %v4906_v59 = vrot.slane %v4470_v1, %v6893_v32 }
 0x9ff   : > { %v4666_v56 = vsel %vm1895_vm9, %v4604_v14, %v4595_v60  ;;  %v4324_v48 = vpop.xlane.xlu0 %4323  ;;  %v4911_v23 = vrot.slane %v4471_v25, %v6899_v21 }
 0xa00   : > { %v4907_v41 = vsel %vm1758_vm8, %v4906_v59, %v4902_v46  ;;  %v4333_v18 = vpop.xlane.xlu1 %4332 }
 0xa01   : > { %v4969_v34 = vsel %vm1895_vm9, %v4907_v41, %v4898_v7 }
 0xa03   : > { %v4420_v19 = vpop.xlane.xlu0 %4419 }
 0xa04   : > { %v4472_v39 = vsub.f32 %v4324_v48, %v4420_v19  ;;  %v4612_v40 = vrot.slane %v4420_v19, %v6893_v32  ;;  %v4429_v3 = vpop.xlane.xlu1 %4428 }
 0xa05   : > { %v4475_v57 = vsub.f32 %v4333_v18, %v4429_v3  ;;  %v4626_v11 = vrot.slane %v4429_v3, %v6899_v21 }
 0xa06   : > { %v4613_v6 = vsel %vm1758_vm8, %v4612_v40, %v4608_v37  ;;  %v4915_v15 = vrot.slane %v4472_v39, %v6893_v32 }
 0xa07   : > { %v8176_v35 = vsel %vm1897_vm10, %v4613_v6, %v4666_v56  ;;  %v4336_v55 = vpop.xlane.xlu0 %4335  ;;  %v4929_v63 = vrot.slane %v4475_v57, %v6899_v21 }
 0xa08   : > { %v4916_v0 = vsel %vm1758_vm8, %v4915_v15, %v4911_v23  ;;  %v4369_v29 = vpop.xlane.xlu1 %4368 }
 0xa09   : > { %v8180_v12 = vsel %vm1897_vm10, %v4916_v0, %v4969_v34  ;;  %v4536_v4 = vrot.slane %v4369_v29, %v6899_v21 }
 0xa0b   : > { %v4432_v22 = vpop.xlane.xlu0 %4431 }
 0xa0c   : > { %v4476_v9 = vsub.f32 %v4336_v55, %v4432_v22  ;;  %v4630_v58 = vrot.slane %v4432_v22, %v6893_v32  ;;  %v8184_v36 = vpop.xlane.xlu1 %4284 }
 0xa0e   : > { %v4631_v28 = vsel %vm1758_vm8, %v4630_v58, %v4626_v11  ;;  %v4933_v38 = vrot.slane %v4476_v9, %v6893_v32 }
 0xa0f   : > { %v4267_v61 = vpop.xlane.xlu0 %4266 }
 0xa10   : > { %v4934_v50 = vsel %vm1758_vm8, %v4933_v38, %v4929_v63  ;;  %v8190_v49 = vpop.xlane.xlu1 %4380 }
 0xa11   : > { %v4554_v37 = vrot.slane %v8190_v49, %v6899_v21 }
 0xa13   : > { %v4270_v60 = vpop.xlane.xlu0 %4269 }
 0xa14   : > { %v4327_v16 = vpop.xlane.xlu1 %4326 }
 0xa17   : > { %v4363_v31 = vpop.xlane.xlu0 %4362 }
 0xa18   : > { %v4453_v7 = vsub.f32 %v4267_v61, %v4363_v31  ;;  %v4423_v13 = vpop.xlane.xlu1 %4422  ;;  %v4527_v45 = vrot.slane %v4363_v31, %v6899_v21 }
 0xa19   : > { %v4473_v6 = vsub.f32 %v4327_v16, %v4423_v13  ;;  %v4617_v57 = vrot.slane %v4423_v13, %v6899_v21 }
 0xa1a   : > { %v4830_v43 = vrot.slane %v4453_v7, %v6899_v21 }
 0xa1b   : > { %v4366_v10 = vpop.xlane.xlu0 %4365 }
 0xa1c   : > { %v4454_v27 = vsub.f32 %v4270_v60, %v4366_v10  ;;  %v4531_v44 = vrot.slane %v4366_v10, %v6893_v32  ;;  %v8194_v30 = vpop.xlane.xlu1 %4338 }
 0xa1e   : > { %v4532_v5 = vsel %vm1758_vm8, %v4531_v44, %v4527_v45  ;;  %v4834_v54 = vrot.slane %v4454_v27, %v6893_v32 }
 0xa1f   : > { %v4659_v33 = vsel %vm1895_vm9, %v4532_v5, %v4523_v17  ;;  %v4273_v51 = vpop.xlane.xlu0 %4272 }
 0xa20   : > { %v4835_v42 = vsel %vm1758_vm8, %v4834_v54, %v4830_v43  ;;  %v8202_v24 = vpop.xlane.xlu1 %4434  ;;  %v4455_v1 = vsub.f32 %v4273_v51, %v4369_v29  ;;  %v4920_v29 = vrot.slane %v4473_v6, %v6899_v21 }
 0xa21   : > { %v4962_v8 = vsel %vm1895_vm9, %v4835_v42, %v4826_v52 }
 0xa22   : > { %v4839_v25 = vrot.slane %v4455_v1, %v6899_v21 }
 0xa23   : > { %v4276_v2 = vpop.xlane.xlu0 %4275 }
 0xa24   : > { %v8205_v46 = vpop.xlane.xlu1 %4344 }
 0xa27   : > { %v4372_v53 = vpop.xlane.xlu0 %4371 }
 0xa28   : > { %v4456_v14 = vsub.f32 %v4276_v2, %v4372_v53  ;;  %v4540_v59 = vrot.slane %v4372_v53, %v6893_v32  ;;  %v8216_v18 = vpop.xlane.xlu1 %4440 }
 0xa2a   : > { %v4541_v17 = vsel %vm1758_vm8, %v4540_v59, %v4536_v4  ;;  %v4843_v56 = vrot.slane %v4456_v14, %v6893_v32  ;;  %v4459_v14 = vsub.f32 %v8184_v36, %v8190_v49 }
 0xa2b   : > { %v4660_v52 = vsel %vm1897_vm10, %v4541_v17, %v4659_v33  ;;  %v4288_v48 = vpop.xlane.xlu0 %4287  ;;  %v4479_v17 = vsub.f32 %v8205_v46, %v8216_v18  ;;  %v4635_v46 = vrot.slane %v8202_v24, %v6899_v21 }
 0xa2c   : > { %v4844_v41 = vsel %vm1758_vm8, %v4843_v56, %v4839_v25  ;;  %v4279_v23 = vpop.xlane.xlu1 %4278  ;;  %v4477_v25 = vsub.f32 %v8194_v30, %v8202_v24  ;;  %v4857_v36 = vrot.slane %v4459_v14, %v6899_v21 }
 0xa2d   : > { %v8214_v34 = vsel %vm1897_vm10, %v4844_v41, %v4962_v8 }
 0xa2f   : > { %v4384_v19 = vpop.xlane.xlu0 %4383 }
 0xa30   : > { %v4558_v39 = vrot.slane %v4384_v19, %v6893_v32  ;;  %v4375_v22 = vpop.xlane.xlu1 %4374  ;;  %v4460_v4 = vsub.f32 %v4288_v48, %v4384_v19 }
 0xa31   : > { %v4457_v59 = vsub.f32 %v4279_v23, %v4375_v22  ;;  %v4644_v23 = vrot.slane %v8216_v18, %v6899_v21 }
 0xa32   : > { %v4559_v40 = vsel %vm1758_vm8, %v4558_v39, %v4554_v37  ;;  %v4861_v39 = vrot.slane %v4460_v4, %v6893_v32 }
 0xa33   : > { %v4330_v3 = vpop.xlane.xlu0 %4329  ;;  %v4848_v49 = vrot.slane %v4457_v59, %v6899_v21 }
 0xa34   : > { %v4291_v7 = vpop.xlane.xlu1 %4290 }
 0xa37   : > { %v4426_v15 = vpop.xlane.xlu0 %4425 }
 0xa38   : > { %v4474_v55 = vsub.f32 %v4330_v3, %v4426_v15  ;;  %v4621_v0 = vrot.slane %v4426_v15, %v6893_v32  ;;  %v8240_v10 = vpop.xlane.xlu1 %4386  ;;  %v4938_v3 = vrot.slane %v4477_v25, %v6899_v21  ;;  %v4947_v15 = vrot.slane %v4479_v17, %v6899_v21 }
 0xa39   : > { %v4461_v30 = vsub.f32 %v4291_v7, %v8240_v10 }
 0xa3a   : > { %v4622_v11 = vsel %vm1758_vm8, %v4621_v0, %v4617_v57  ;;  %v4924_v9 = vrot.slane %v4474_v55, %v6893_v32 }
 0xa3b   : > { %v4668_v58 = vsel %vm1899_vm11, %v4622_v11, %v8176_v35  ;;  %v4342_v63 = vpop.xlane.xlu0 %4341 }
 0xa3c   : > { %v4925_v38 = vsel %vm1758_vm8, %v4924_v9, %v4920_v29  ;;  %v8231_v61 = vsel %vm1901_vm12, %v4631_v28, %v4668_v58  ;;  %v4297_v27 = vpop.xlane.xlu1 %4296  ;;  %v4545_v28 = vrot.slane %v4375_v22, %v6899_v21  ;;  %v4862_v22 = vsel %vm1758_vm8, %v4861_v39, %v4857_v36 }
 0xa3d   : > { %v4971_v60 = vsel %vm1899_vm11, %v4925_v38, %v8180_v12  ;;  %v4563_v9 = vrot.slane %v8240_v10, %v6899_v21  ;;  %v4866_v58 = vrot.slane %v4461_v30, %v6899_v21 }
 0xa3e   : > { %v8236_v16 = vsel %vm1901_vm12, %v4934_v50, %v4971_v60 }
 0xa3f   : > { %v4438_v31 = vpop.xlane.xlu0 %4437 }
 0xa40   : > { %v8246_v5 = vpop.xlane.xlu1 %4392  ;;  %v4478_v56 = vsub.f32 %v4342_v63, %v4438_v31 }
 0xa41   : > { %v4463_v6 = vsub.f32 %v4297_v27, %v8246_v5  ;;  %v4572_v63 = vrot.slane %v8246_v5, %v6899_v21 }
 0xa42   : > { %v4942_v57 = vrot.slane %v4478_v56, %v6893_v32 }
 0xa43   : > { %v8238_v13 = vpop.xlane.xlu0 %4347  ;;  %v4875_v60 = vrot.slane %v4463_v6, %v6899_v21 }
 0xa44   : > { %v8253_v42 = vpop.xlane.xlu1 %4350 }
 0xa47   : > { %v8242_v45 = vpop.xlane.xlu0 %4443 }
 0xa48   : > { %v4303_v2 = vpop.xlane.xlu1 %4302  ;;  %v4648_v11 = vrot.slane %v8242_v45, %v6893_v32  ;;  %v4480_v38 = vsub.f32 %v8238_v13, %v8242_v45 }
 0xa4a   : > { %v4649_v13 = vsel %vm1758_vm8, %v4648_v11, %v4644_v23 }
 0xa4b   : > { %v4282_v35 = vpop.xlane.xlu0 %4281 }
 0xa4c   : > { %v4399_v48 = vpop.xlane.xlu1 %4398 }
 0xa4f   : > { %v4378_v44 = vpop.xlane.xlu0 %4377 }
 0xa50   : > { %v4549_v43 = vrot.slane %v4378_v44, %v6893_v32  ;;  %v4458_v1 = vsub.f32 %v4282_v35, %v4378_v44  ;;  %v4447_v35 = vpop.xlane.xlu1 %4446  ;;  %v4943_v44 = vsel %vm1758_vm8, %v4942_v57, %v4938_v3 }
 0xa51   : > { %v4653_v4 = vrot.slane %v4447_v35, %v6899_v21  ;;  %v4973_v3 = vsel %vm1903_vm13, %v4943_v44, %v8236_v16 }
 0xa52   : > { %v4550_v12 = vsel %vm1758_vm8, %v4549_v43, %v4545_v28 }
 0xa53   : > { %v4661_v50 = vsel %vm1899_vm11, %v4550_v12, %v4660_v52  ;;  %v4294_v54 = vpop.xlane.xlu0 %4293  ;;  %v4852_v52 = vrot.slane %v4458_v1, %v6893_v32 }
 0xa54   : > { %v8251_v33 = vsel %vm1901_vm12, %v4559_v40, %v4661_v50  ;;  %v4639_v40 = vrot.slane %v4438_v31, %v6893_v32  ;;  %v4465_v31 = vsub.f32 %v4303_v2, %v4399_v48  ;;  %v4951_v50 = vrot.slane %v4480_v38, %v6893_v32 }
 0xa55   : > { %v4853_v55 = vsel %vm1758_vm8, %v4852_v52, %v4848_v49 }
 0xa56   : > { %v4640_v24 = vsel %vm1758_vm8, %v4639_v40, %v4635_v46  ;;  %v4964_v7 = vsel %vm1899_vm11, %v4853_v55, %v8214_v34  ;;  %v4884_v2 = vrot.slane %v4465_v31, %v6899_v21 }
 0xa57   : > { %v4390_v51 = vpop.xlane.xlu0 %4389  ;;  %v4670_v5 = vsel %vm1903_vm13, %v4640_v24, %v8231_v61 }
 0xa58   : > { %v4462_v41 = vsub.f32 %v4294_v54, %v4390_v51  ;;  %v4567_v27 = vrot.slane %v4390_v51, %v6893_v32  ;;  %v4581_v54 = vrot.slane %v4399_v48, %v6899_v21  ;;  %v4481_v51 = vsub.f32 %v8253_v42, %v4447_v35 }
 0xa59   : > { %v4671_v17 = vsel %vm1905_vm14, %v4649_v13, %v4670_v5  ;;  %v4952_v48 = vsel %vm1758_vm8, %v4951_v50, %v4947_v15  ;;  %v5715_v5 = vld [vmem:[%s7051_s17 + $0x8] sm:$0xff] }
 0xa5a   : > { %v4870_v0 = vrot.slane %v4462_v41, %v6893_v32  ;;  %v4568_v1 = vsel %vm1758_vm8, %v4567_v27, %v4563_v9  ;;  %v4956_v39 = vrot.slane %v4481_v51, %v6899_v21  ;;  %v4974_v6 = vsel %vm1905_vm14, %v4952_v48, %v4973_v3 }
 0xa5b   : > { %v4300_v8 = vpop.xlane.xlu0 %4299 }
 0xa5c   : > { %v4871_v10 = vsel %vm1758_vm8, %v4870_v0, %v4866_v58 }
 0xa5f   : > { %v4396_v53 = vpop.xlane.xlu0 %4395 }
 0xa60   : > { %v4464_v19 = vsub.f32 %v4300_v8, %v4396_v53  ;;  %v4576_v28 = vrot.slane %v4396_v53, %v6893_v32  ;;  %v4965_v8 = vsel %vm1901_vm12, %v4862_v22, %v4964_v7  ;;  %v5652_v22 = vpack.i.bf16 %v7847_v62, %v7849_v26 }
 0xa61   : > { %v4966_v53 = vsel %vm1903_vm13, %v4871_v10, %v4965_v8  ;;  %v5714_v10 = vld [vmem:[%s7051_s17] sm:$0xff] }
 0xa62   : > { %v4879_v18 = vrot.slane %v4464_v19, %v6893_v32  ;;  %v4577_v14 = vsel %vm1758_vm8, %v4576_v28, %v4572_v63  ;;  %v4663_v19 = vsel %vm1903_vm13, %v4568_v1, %v8251_v33 }
 0xa63   : > { %v4354_v37 = vpop.xlane.xlu0 %4353  ;;  %v4664_v30 = vsel %vm1905_vm14, %v4577_v14, %v4663_v19 }
 0xa64   : > { %v4880_v34 = vsel %vm1758_vm8, %v4879_v18, %v4875_v60 }
 0xa65   : > { %v4967_v25 = vsel %vm1905_vm14, %v4880_v34, %v4966_v53 }
 0xa67   : > { %v4306_v29 = vpop.xlane.xlu0 %4305 }
 0xa6b   : > { %v4402_v43 = vpop.xlane.xlu0 %4401 }
 0xa6c   : > { %v4466_v45 = vsub.f32 %v4306_v29, %v4402_v43  ;;  %v4585_v12 = vrot.slane %v4402_v43, %v6893_v32 }
 0xa6e   : > { %v4888_v61 = vrot.slane %v4466_v45, %v6893_v32  ;;  %v4586_v41 = vsel %vm1758_vm8, %v4585_v12, %v4581_v54 }
 0xa6f   : > { %v4450_v59 = vpop.xlane.xlu0 %4449  ;;  %v4665_v23 = vsel %vm1907_vm15, %v4586_v41, %v4664_v30 }
 0xa70   : > { %v4482_v42 = vsub.f32 %v4354_v37, %v4450_v59  ;;  %v4657_v56 = vrot.slane %v4450_v59, %v6893_v32  ;;  %v4889_v52 = vsel %vm1758_vm8, %v4888_v61, %v4884_v2  ;;  %v4675_v16 = vsel %vm1713_vm0, %v4665_v23, -1e+30 }
 0xa71   : > { %v4968_v40 = vsel %vm1907_vm15, %v4889_v52, %v4967_v25  ;;  %v4677_v29 = vsel %vm1920_vm3, %v4675_v16, -inf }
 0xa72   : > { %v4960_v36 = vrot.slane %v4482_v42, %v6893_v32  ;;  %v4978_v37 = vsel %vm1713_vm0, %v4968_v40, -1e+30  ;;  %v4658_v49 = vsel %vm1758_vm8, %v4657_v56, %v4653_v4 }
 0xa73   : > { %v4980_v46 = vsel %vm1920_vm3, %v4978_v37, -inf  ;;  %v4672_v21 = vsel %vm1907_vm15, %v4658_v49, %v4671_v17 }
 0xa74   : > { %4981 = vmax.xlane.f32.xlu0 %v4980_v46  ;;  %v4676_v32 = vsel %vm1714_vm1, %v4672_v21, -1e+30  ;;  %v4961_v33 = vsel %vm1758_vm8, %v4960_v36, %v4956_v39  ;;  %v5716_v46 = vld [vmem:[#allocation8 + $0x3] ss:$0 sm:$0xff] }
 0xa75   : > { %v4680_v15 = vsel %vm1920_vm3, %v4676_v32, -inf  ;;  %v4975_v57 = vsel %vm1907_vm15, %v4961_v33, %v4974_v6 }
 0xa76   : > { %4681 = vmax.xlane.f32.xlu1 %v4680_v15  ;;  %v4979_v55 = vsel %vm1714_vm1, %v4975_v57, -1e+30 }
 0xa77   : > { %v4983_v0 = vsel %vm1920_vm3, %v4979_v55, -inf }
 0xa78   : > { %4984 = vmax.xlane.f32.xlu0 %v4983_v0 }
 0xa7a   : > { %4678 = vmax.xlane.f32.xlu1 %v4677_v29 }
 0xa8b   : > { %5653 = vrot.lane.b32.xlu1 %v5652_v22, %s5914_s9 }
 0xb01   : > { %v4982_v24 = vpop.xlane.xlu0 %4981 }
 0xb02   : > { %v4986_v11 = vsub.f32 %v4978_v37, %v4982_v24 }
 0xb03   : > { %v4682_v18 = vpop.xlane.xlu1 %4681 }
 0xb04   : > { %v4988_v9 = vmul.f32 1.442695, %v4986_v11  ;;  %v4684_v47 = vsub.f32 %v4676_v32, %v4682_v18 }
 0xb05   : > { %v4985_v58 = vpop.xlane.xlu0 %4984 }
 0xb06   : > { %5689 = vpow2.f32 %v4988_v9  ;;  %v4687_v20 = vmul.f32 1.442695, %v4684_v47  ;;  %v4987_v63 = vsub.f32 %v4979_v55, %v4985_v58 }
 0xb07   : > { %v4679_v38 = vpop.xlane.xlu1 %4678 }
 0xb08   : > { %5691 = vpow2.f32 %v4687_v20  ;;  %v4990_v60 = vmul.f32 1.442695, %v4987_v63  ;;  %v4683_v31 = vsub.f32 %v4675_v16, %v4679_v38 }
 0xb0a   : > { %5693 = vpow2.f32 %v4990_v60  ;;  %v4685_v7 = vmul.f32 1.442695, %v4683_v31 }
 0xb0b   : > { %v5654_v62 = vpop.permute.xlu1 %5653 }
 0xb0c   : > { %5695 = vpow2.f32 %v4685_v7  ;;  %v5656_v26 = vunpack.i.h.bf16 %v5654_v62  ;;  %v5655_v35 = vunpack.i.l.bf16 %v5654_v62 }
 0xb0e   : > { %v5555_v27 = vpack.c.bf16 %v5656_v26, %v5655_v35 }
 0xb10   : > { %v5690_v44 = vpop.eup %5689  ;;  %5556 = vmatprep.subr.bf16.mxu0 %v5555_v27 }
 0xb11   : > { %5558 = vmatpush3.bf16.msra.mxu0 %v5555_v27  ;;  %v4992_v28 = vmul.f32 %v5714_v10, %v5690_v44 }
 0xb12   : > { %v5692_v43 = vpop.eup %5691 }
 0xb13   : > { %5484 = vmatprep.mubr.msk.f32.mxu0 %vm1920_vm3, %v4992_v28  ;;  %v4690_v13 = vmul.f32 %v5715_v5, %v5692_v43  ;;  %v4994_v8 = vsel %vm1920_vm3, %v4992_v28, 0.0 }
 0xb14   : > { %v5694_v45 = vpop.eup %5693 }
 0xb15   : > { %v4694_v12 = vsel %vm1920_vm3, %v4690_v13, 0.0  ;;  %v4993_v34 = vmul.f32 %v5715_v5, %v5694_v45 }
 0xb16   : > { %v5696_v50 = vpop.eup %5695  ;;  %4695 = vadd.xlane.f32.xlu0 %v4694_v12 }
 0xb17   : > { %5485 = vmatmul.mubr.msk.f32.vlgmr.msra.gmra.mrb[12].mxu0 %vm1920_vm3, %v4993_v34  ;;  %v4689_v54 = vmul.f32 %v5714_v10, %v5696_v50  ;;  %v4997_v2 = vsel %vm1920_vm3, %v4993_v34, 0.0 }
 0xb19   : > { %5477 = vmatprep.mubr.msk.f32.mxu1 %vm1920_vm3, %v4689_v54  ;;  %v4691_v51 = vsel %vm1920_vm3, %v4689_v54, 0.0 }
 0xb1a   : > { %5478 = vmatmul.mubr.msk.f32.vlgmr.msra.gmra.mrb[10].mxu1 %vm1920_vm3, %v4690_v13  ;;  %4692 = vadd.xlane.f32.xlu0 %v4691_v51 }
 0xb1e   : > { %4995 = vadd.xlane.f32.xlu0 %v4994_v8 }
 0xb22   : > { %4998 = vadd.xlane.f32.xlu0 %v4997_v2 }
 0xba3   : > { %v4696_v1 = vpop.xlane.xlu0 %4695 }
 0xba4   : > { %5697 = vrcp.f32 %v4696_v1 }
 0xba7   : > { %v4693_v61 = vpop.xlane.xlu0 %4692 }
 0xba8   : > { %5699 = vrcp.f32 %v4693_v61 }
 0xbab   : > { %v4996_v53 = vpop.xlane.xlu0 %4995 }
 0xbae   : > { %v5698_v59 = vpop.eup %5697 }
 0xbaf   : > { %v4999_v4 = vpop.xlane.xlu0 %4998 }
 0xbb0   : > { %5701 = vrcp.f32 %v4999_v4 }
 0xbb1   : > { %5703 = vrcp.f32 %v4996_v53 }
 0xbb2   : > { %v5700_v17 = vpop.eup %5699 }
 0xbba   : > { %v5702_v42 = vpop.eup %5701 }
 0xbbb   : > { %v5704_v52 = vpop.eup %5703 }
 0xbea   : > { %v5486_v14 = vpop.f32.mrb[12].mxu0 }
 0xbeb   : > { %v5080_v25 = vpop.f32.mrb[13].mxu0  ;;  %v5094_v41 = vmul.f32 %v5702_v42, %v5486_v14 }
 0xbec   : > { %v5093_v48 = vmul.f32 %v5704_v52, %v5080_v25 }
 0xbed   : > { %v5479_v56 = vpop.f32.mrb[10].mxu1 }
 0xbee   : > { %v4783_v39 = vmul.f32 %v5698_v59, %v5479_v56  ;;  %v4769_v40 = vpop.f32.mrb[11].mxu1 }
 0xbef   : > { %v4782_v19 = vmul.f32 %v5700_v17, %v4769_v40 }
 0xbf0   : > { %v5096_v36 = vadd.f32 %v5094_v41, %v4783_v39 }
 0xbf1   : > { %v5095_v37 = vadd.f32 %v5093_v48, %v4782_v19 }
 0xbf2   : > { %v5098_v49 = vmul.f32 0.5, %v5096_v36 }
 0xbf3   : > { %v5097_v30 = vmul.f32 0.5, %v5095_v37 }
 0xbf4   : > { %v5100_v21 = vadd.f32 %v5716_v46, %v5098_v49 }
 0xbf5   : > { %v5099_v3 = vadd.f32 %v5716_v46, %v5097_v30 }
 0xbf6   : > { %vm5102_vm4 = vcmp.gt.f32.partialorder %v5100_v21, 0.0  ;;  %v5104_v23 = vmul.f32 0.01, %v5100_v21 }
 0xbf7   : > { %vm5101_vm8 = vcmp.gt.f32.partialorder %v5099_v3, 0.0  ;;  %v5103_v32 = vmul.f32 0.01, %v5099_v3 }
 0xbf8   : > { %v5106_v33 = vsel %vm5102_vm4, %v5100_v21, %v5104_v23 }
 0xbf9   : > { %5108 = vst.msk [vmem:[%s366_s14 + $0x8] sm:$0xff] %vm947_vm2, %v5106_v33  ;;  %v5105_v6 = vsel %vm5101_vm8, %v5099_v3, %v5103_v32 }
 0xbfa   : > { %5107 = vst.msk [vmem:[%s366_s14] sm:$0xff] %vm947_vm2, %v5105_v6 }
 0xbfb   : > { %5844 = shalt.err (!%p5841_p0)
}
 0xbfc   : > { %s5845_s17 = scalar_lea.hbm %s8361_s13, 256  ;;  %s5849_s18 = scalar_lea.hbm %s8415_s7, 1024 }
 0xbfd   : > { %p5846_p5 = scmp.ne.s32.totalorder %s8361_s13, %s5845_s17  ;;  %p5850_p13 = scmp.lt.u32.totalorder %s8361_s13, %s8415_s7 }
 0xbfe   : > { %p5851_p2 = scmp.lt.u32.totalorder %s5849_s18, %s5845_s17  ;;  %p5853_p4 = scmp.lt.u32.totalorder %s5845_s17, %s8361_s13 }
 0xbff   : > { %p5847_p10 = pnand %p5846_p5, %p6098_p6 }
 0xc00   : > { %p5852_p1 = por %p5851_p2, %p5850_p13 }
 0xc01   : > { %p5848_p11 = pneg %p5847_p10 }
 0xc02   : > { %p5854_p8 = por %p5853_p4, %p5852_p1 }
 0xc04   : > { %p5855_p3 = pnand %p5854_p8, %p5848_p11 }
 0xc06   : > { %5858 = shalt.err (!%p5855_p3)
}
 0xc07   : > { %s5916_s10 = smov 128   ;;  %s5917_s21 = smov 8  }
 0xc08   : > { %5573 = dma.vmem_to_hbm [thread:$0]  (%p6098_p6), %s8363_s16, 256, %s8361_s13, %s5110_s28, %s5916_s10, %s5916_s10, %s5917_s21  }
 0xc09 PF: > { %p5600_p7 = scmp.ge.s32.totalorder %s5905_s27, 2  ;;  %s5138_s12 = sand.u32 1, %s5893_s24  }
 0xc0a   : > { %p8639_p9 = scmp.ne.s32.totalorder %s8506_s8, 0  ;;  %s5139_s23 = scalar_lea.sflag [#allocation4], %s5138_s12 }
 0xc0c   : > { %p5590_p12 = pnand %p5600_p7, %p8639_p9 }
 0xc0e   : > { %5888 = dma.done.wait (!%p5590_p12), %s5139_s23, 256  }
 0xc0f   : > { %5890 = vsyncadd (!%p5590_p12), %s5139_s23, 4294967040  ;;  %p22_p0 = scmp.ge.s32.totalorder %s6084_s22, 6   ;;  %s8640_s24 = smov %s5897_s25 }
 0xc10   : > { %s8641_s25 = smov %s5901_s26  ;;  %s8642_s26 = smov %s6094_s19 }
 0xc11   : > { %s8643_s27 = smov %s6084_s22  ;;  %24 = sbr.rel (!%p22_p0) target bundleno = 7 (0x7), region = 111 }
 0xc18   :  { %5144 = vsyncpa [#allocation3], 1 }
 0xc19   :  { %5146 = vsyncpa [#allocation3 + $0x1], 1 }
 0xc1a   :  { %5147 = vsyncpa [#allocation6], 1 }
 0xc1b   :  { %5148 = vsyncpa [#allocation9], 1 }
 0xc1c   :  { %5149 = vsyncpa [#allocation4], 1 }
 0xc1d   :  { %5151 = vsyncpa [#allocation4 + $0x1], 1 }

</bundles_post_ra>
